<compile_context>
chip_gen: v7x
topology: tpu7x:2x2x1
jax: 0.10.0
libtpu: 0.0.40
codegen_flags: <defaults>
</compile_context>

<pallas_src>
import functools

import jax
import jax.numpy as jnp
from jax.experimental import pallas as pl
from jax.experimental.pallas import tpu as pltpu


NET_PARAMS = dict(
    in_dim=16, hidden_dim=8, n_heads=4, out_dim=32, n_classes=4,
    L=2, batch_norm=True, residual=True, in_feat_dropout=0.0, dropout=0.0,
    readout="mean", pos_enc=False,
)


def layer_configs(p):
    hidden, heads, out_dim, L = p["hidden_dim"], p["n_heads"], p["out_dim"], p["L"]
    # (L-1) x GATLayer(hidden*heads, hidden, heads) + GATLayer(hidden*heads, out_dim, 1)
    return [(hidden * heads, hidden, heads)] * (L - 1) + [(hidden * heads, out_dim, 1)]


# ---------------------------------------------------------------------------
# Fused whole-network kernel
# ---------------------------------------------------------------------------

def _gatnet_kernel(*refs, layer_cfgs, batch_norm, residual, n_mlp):
    """Entire GATNet forward (eval mode) in a single kernel invocation."""
    f32, bf16 = jnp.float32, jnp.bfloat16

    it = iter(refs)
    x_ref = next(it)                    # (N, in_dim) node features
    adjb_ref = next(it)                 # (N, N) additive mask: 0.0 edge / -1e9 non-edge
    emb_w_ref = next(it)                # (in_dim, HD)
    emb_b_ref = next(it)                # (1, HD)
    layer_refs = [tuple(next(it) for _ in range(5)) for _ in layer_cfgs]
    mlp_refs = [tuple(next(it) for _ in range(2)) for _ in range(n_mlp)]
    o_ref = next(it)                    # (N, n_classes) output
    slab_ref = next(it)                 # VMEM scratch (N, max dout): per-head concat-by-store

    adj_bias = adjb_ref[...]            # stays resident in vregs/VMEM for all layers
    N = adj_bias.shape[0]

    # ---- embedding_h: h = x @ W + b (bf16 MXU operands, f32 accumulate) -----------
    h = jnp.dot(x_ref[...].astype(bf16), emb_w_ref[...].astype(bf16),
                preferred_element_type=f32) + emb_b_ref[...]          # (N, HD)

    # ---- GAT layers -----------------------------------------------------------------
    for (fc_w_ref, al_ref, ar_ref, sc_ref, sh_ref), (lin, head_dim, num_heads) in zip(
            layer_refs, layer_cfgs):
        dout = num_heads * head_dim

        # Bias-free projection (DGL GATConv fc) — one MXU pass for all heads.
        feat = jnp.dot(h.astype(bf16), fc_w_ref[...].astype(bf16),
                       preferred_element_type=f32)                    # (N, dout)
        feat_bf = feat.astype(bf16)
        # Ones column folds the softmax denominator into the aggregation matmul.
        feat_aug = jnp.concatenate(
            [feat_bf, jnp.ones((N, 1), dtype=bf16)], axis=-1)         # (N, dout+1)

        # All heads' attention logits via block-diagonal projections (MXU, not VPU+XLU).
        el = jnp.dot(feat_bf, al_ref[...].astype(bf16),
                     preferred_element_type=f32)                      # (N, H) source scores
        er = jnp.dot(feat_bf, ar_ref[...].astype(bf16),
                     preferred_element_type=f32)                      # (N, H) dest scores

        for hh in range(num_heads):                                   # static unroll (H = 4 or 1)
            lo = hh * head_dim
            el_row = jnp.transpose(el[:, hh:hh + 1])                  # (1, N) tiny XLU transpose
            # s[dst, src] = leaky_relu(er[dst] + el[src], 0.2) + mask_bias
            s = er[:, hh:hh + 1] + el_row                             # (N, N)
            s = jnp.maximum(s, 0.2 * s)                               # leaky ReLU, slope 0.2
            s = s + adj_bias                                          # -1e9 on non-edges
            # Masked softmax (assumes >=1 incoming edge per dst, e.g. self-loops).
            p = jnp.exp(s - jnp.max(s, axis=-1, keepdims=True))       # unnormalized
            agg = jnp.dot(p.astype(bf16), feat_aug,
                          preferred_element_type=f32)                 # (N, dout+1)
            denom = jnp.maximum(agg[:, dout:dout + 1], 1e-9)          # = sum_src p (ones column)
            out_h = agg[:, lo:lo + head_dim] * pl.reciprocal(denom, approx=True)
            slab_ref[:, lo:lo + head_dim] = out_h                     # concat-by-store

        x = slab_ref[:, :dout]                                        # (N, dout)
        if batch_norm:
            # eval-mode BN folded host-side: scale = gamma*rsqrt(var+eps), shift = beta - mean*scale
            x = x * sc_ref[...] + sh_ref[...]
        x = jnp.where(x > 0, x, jnp.exp(x) - 1.0)                     # ELU(alpha=1)
        if residual and (lin == dout):                                # GATLayer disables on mismatch
            x = x + h
        h = x

    # ---- MLPReadout (L=2): FC -> ReLU -> FC -> ReLU -> FC ----------------------------
    y = h
    for i, (w_ref, b_ref) in enumerate(mlp_refs):
        y = jnp.dot(y.astype(bf16), w_ref[...].astype(bf16),
                    preferred_element_type=f32) + b_ref[...]
        if i < n_mlp - 1:
            y = jnp.maximum(y, 0.0)
    o_ref[...] = y.astype(o_ref.dtype)


# ---------------------------------------------------------------------------
# Wrapper
# ---------------------------------------------------------------------------

def _full_spec(shape):
    return pl.BlockSpec(shape, lambda *_: (0,) * len(shape))


def gatnet_forward(params, h, adj, p=NET_PARAMS):
    cfgs = layer_configs(p)
    N = h.shape[0]
    n_classes = p["n_classes"]
    slab_w = max(nh * hd for (_, hd, nh) in cfgs)

    # Additive attention mask (single host-side select, fused under jit; adjacency DMA'd once).
    adj_bias = jnp.where(adj > 0, 0.0, -1e9).astype(jnp.float32)

    inputs = [h.astype(jnp.float32), adj_bias, params["emb_w"], params["emb_b"]]
    for lp in params["layers"]:
        scale = lp["bn_gamma"] * jax.lax.rsqrt(lp["bn_var"] + 1e-5)
        shift = lp["bn_beta"] - lp["bn_mean"] * scale
        inputs += [lp["fc_w"], lp["attn_proj_l"], lp["attn_proj_r"], scale, shift]
    for (w, b) in params["mlp"]:
        inputs += [w, b]

    kernel = functools.partial(
        _gatnet_kernel,
        layer_cfgs=tuple(cfgs),
        batch_norm=p["batch_norm"],
        residual=p["residual"],
        n_mlp=len(params["mlp"]),
    )

    return pl.pallas_call(
        kernel,
        out_shape=jax.ShapeDtypeStruct((N, n_classes), jnp.float32),
        grid=(1,),
        in_specs=[_full_spec(x.shape) for x in inputs],
        out_specs=_full_spec((N, n_classes)),
        scratch_shapes=[pltpu.VMEM((N, slab_w), jnp.float32)],
        compiler_params=pltpu.CompilerParams(dimension_semantics=("arbitrary",)),
    )(*inputs)


# ---------------------------------------------------------------------------
# Parameters
# ---------------------------------------------------------------------------

def init_params(key, p):
    hidden, heads, out_dim = p["hidden_dim"], p["n_heads"], p["out_dim"]
    in_dim, n_classes = p["in_dim"], p["n_classes"]

    def nrm(k, shape, scale):
        return jax.random.normal(k, shape, jnp.float32) * scale

    def block_diag(attn, num_heads, head_dim):
        # attn: (H, D) per-head attention vectors -> (H*D, H) block-diagonal projection,
        # so the MXU computes all heads' el/er in one pass.
        m = jnp.zeros((num_heads * head_dim, num_heads), jnp.float32)
        for hh in range(num_heads):
            m = m.at[hh * head_dim:(hh + 1) * head_dim, hh].set(attn[hh])
        return m

    keys = iter(jax.random.split(key, 64))
    params = {}

    # embedding_h : Linear(in_dim, hidden*heads) with bias
    params["emb_w"] = nrm(next(keys), (in_dim, hidden * heads), 1.0 / jnp.sqrt(in_dim))
    params["emb_b"] = nrm(next(keys), (1, hidden * heads), 0.01)

    layers = []
    for (lin, lout, lheads) in layer_configs(p):
        dout = lheads * lout
        layers.append({
            "fc_w": nrm(next(keys), (lin, dout), 1.0 / jnp.sqrt(lin)),
            "attn_proj_l": block_diag(nrm(next(keys), (lheads, lout), 0.1), lheads, lout),
            "attn_proj_r": block_diag(nrm(next(keys), (lheads, lout), 0.1), lheads, lout),
            # BatchNorm1d(dout) eval-mode params (PyTorch defaults)
            "bn_gamma": jnp.ones((1, dout), jnp.float32),
            "bn_beta": jnp.zeros((1, dout), jnp.float32),
            "bn_mean": jnp.zeros((1, dout), jnp.float32),
            "bn_var": jnp.ones((1, dout), jnp.float32),
        })
    params["layers"] = layers

    # MLPReadout(out_dim, n_classes), L=2: out_dim -> out_dim//2 -> out_dim//4 -> n_classes
    dims = [out_dim, out_dim // 2, out_dim // 4, n_classes]
    mlp = []
    for i in range(3):
        mlp.append((
            nrm(next(keys), (dims[i], dims[i + 1]), 1.0 / jnp.sqrt(dims[i])),
            nrm(next(keys), (1, dims[i + 1]), 0.01),
        ))
    params["mlp"] = mlp
    return params


# ---------------------------------------------------------------------------
# Main
# ---------------------------------------------------------------------------

if __name__ == "__main__":
    key = jax.random.PRNGKey(0)
    k_param, k_feat, k_adj = jax.random.split(key, 3)

    # N padded to 128 (vreg lane width) -> lane-dense (N,N) attention tiles & (N, H*D) slabs.
    N = 128
    p = NET_PARAMS

    # node features (N, in_dim)
    h = jax.random.normal(k_feat, (N, p["in_dim"]), jnp.float32)

    # random sparse symmetric adjacency WITH self-loops; adj[dst, src] in {0,1}
    # (self-loops guarantee every dst row has an incoming edge -> masked softmax is valid)
    rnd = jax.random.uniform(k_adj, (N, N))
    adj = (rnd < 0.06).astype(jnp.float32)
    adj = jnp.maximum(adj, adj.T)
    adj = jnp.maximum(adj, jnp.eye(N, dtype=jnp.float32))

    params = init_params(k_param, p)

    fwd = jax.jit(functools.partial(gatnet_forward, p=p))
    logits = fwd(params, h, adj)
    logits = jax.block_until_ready(logits)

    assert logits.shape == (N, p["n_classes"]), logits.shape
    assert bool(jnp.all(jnp.isfinite(logits)))
    print("KERNEL_OK")
</pallas_src>

<mosaic_0001>
module attributes {stable_mosaic.version = 11 : i64} {
  func.func @_gatnet_kernel(%arg0: i32, %arg1: memref<128x16xf32, #tpu.memory_space<vmem>>, %arg2: memref<128x128xf32, #tpu.memory_space<vmem>>, %arg3: memref<16x32xf32, #tpu.memory_space<vmem>>, %arg4: memref<1x32xf32, #tpu.memory_space<vmem>>, %arg5: memref<32x32xf32, #tpu.memory_space<vmem>>, %arg6: memref<32x4xf32, #tpu.memory_space<vmem>>, %arg7: memref<32x4xf32, #tpu.memory_space<vmem>>, %arg8: memref<1x32xf32, #tpu.memory_space<vmem>>, %arg9: memref<1x32xf32, #tpu.memory_space<vmem>>, %arg10: memref<32x32xf32, #tpu.memory_space<vmem>>, %arg11: memref<32x1xf32, #tpu.memory_space<vmem>>, %arg12: memref<32x1xf32, #tpu.memory_space<vmem>>, %arg13: memref<1x32xf32, #tpu.memory_space<vmem>>, %arg14: memref<1x32xf32, #tpu.memory_space<vmem>>, %arg15: memref<32x16xf32, #tpu.memory_space<vmem>>, %arg16: memref<1x16xf32, #tpu.memory_space<vmem>>, %arg17: memref<16x8xf32, #tpu.memory_space<vmem>>, %arg18: memref<1x8xf32, #tpu.memory_space<vmem>>, %arg19: memref<8x4xf32, #tpu.memory_space<vmem>>, %arg20: memref<1x4xf32, #tpu.memory_space<vmem>>, %arg21: memref<128x4xf32, #tpu.memory_space<vmem>>, %arg22: memref<128x32xf32, #tpu.memory_space<vmem>>) attributes {dimension_semantics = [#tpu.dimension_semantics<arbitrary>], iteration_bounds = array<i64: 1>, scalar_prefetch = 0 : i64, scratch_operands = 1 : i64, tpu.core_type = #tpu.core_type<tc>, window_params = [{pipeline_mode = #tpu.pipeline_mode<synchronous>, transform_indices = @transform_0, window_bounds = array<i64: 128, 16>}, {pipeline_mode = #tpu.pipeline_mode<synchronous>, transform_indices = @transform_1, window_bounds = array<i64: 128, 128>}, {pipeline_mode = #tpu.pipeline_mode<synchronous>, transform_indices = @transform_2, window_bounds = array<i64: 16, 32>}, {pipeline_mode = #tpu.pipeline_mode<synchronous>, transform_indices = @transform_3, window_bounds = array<i64: 1, 32>}, {pipeline_mode = #tpu.pipeline_mode<synchronous>, transform_indices = @transform_4, window_bounds = array<i64: 32, 32>}, {pipeline_mode = #tpu.pipeline_mode<synchronous>, transform_indices = @transform_5, window_bounds = array<i64: 32, 4>}, {pipeline_mode = #tpu.pipeline_mode<synchronous>, transform_indices = @transform_6, window_bounds = array<i64: 32, 4>}, {pipeline_mode = #tpu.pipeline_mode<synchronous>, transform_indices = @transform_7, window_bounds = array<i64: 1, 32>}, {pipeline_mode = #tpu.pipeline_mode<synchronous>, transform_indices = @transform_8, window_bounds = array<i64: 1, 32>}, {pipeline_mode = #tpu.pipeline_mode<synchronous>, transform_indices = @transform_9, window_bounds = array<i64: 32, 32>}, {pipeline_mode = #tpu.pipeline_mode<synchronous>, transform_indices = @transform_10, window_bounds = array<i64: 32, 1>}, {pipeline_mode = #tpu.pipeline_mode<synchronous>, transform_indices = @transform_11, window_bounds = array<i64: 32, 1>}, {pipeline_mode = #tpu.pipeline_mode<synchronous>, transform_indices = @transform_12, window_bounds = array<i64: 1, 32>}, {pipeline_mode = #tpu.pipeline_mode<synchronous>, transform_indices = @transform_13, window_bounds = array<i64: 1, 32>}, {pipeline_mode = #tpu.pipeline_mode<synchronous>, transform_indices = @transform_14, window_bounds = array<i64: 32, 16>}, {pipeline_mode = #tpu.pipeline_mode<synchronous>, transform_indices = @transform_15, window_bounds = array<i64: 1, 16>}, {pipeline_mode = #tpu.pipeline_mode<synchronous>, transform_indices = @transform_16, window_bounds = array<i64: 16, 8>}, {pipeline_mode = #tpu.pipeline_mode<synchronous>, transform_indices = @transform_17, window_bounds = array<i64: 1, 8>}, {pipeline_mode = #tpu.pipeline_mode<synchronous>, transform_indices = @transform_18, window_bounds = array<i64: 8, 4>}, {pipeline_mode = #tpu.pipeline_mode<synchronous>, transform_indices = @transform_19, window_bounds = array<i64: 1, 4>}, {pipeline_mode = #tpu.pipeline_mode<synchronous>, transform_indices = @transform_20, window_bounds = array<i64: 128, 4>}]} {
    %c0 = arith.constant 0 : index
    %c0_0 = arith.constant 0 : index
    %0 = vector.load %arg2[%c0, %c0_0] : memref<128x128xf32, #tpu.memory_space<vmem>>, vector<128x128xf32>
    %c0_1 = arith.constant 0 : index
    %c0_2 = arith.constant 0 : index
    %1 = vector.load %arg1[%c0_1, %c0_2] : memref<128x16xf32, #tpu.memory_space<vmem>>, vector<128x16xf32>
    %2 = arith.truncf %1 : vector<128x16xf32> to vector<128x16xbf16>
    %c0_3 = arith.constant 0 : index
    %c0_4 = arith.constant 0 : index
    %3 = vector.load %arg3[%c0_3, %c0_4] : memref<16x32xf32, #tpu.memory_space<vmem>>, vector<16x32xf32>
    %4 = arith.truncf %3 : vector<16x32xf32> to vector<16x32xbf16>
    %cst = arith.constant dense<0.000000e+00> : vector<128x32xf32>
    %5 = tpu.matmul %2, %4, %cst {dimension_numbers = #tpu.dot_dimension_numbers<[1], [0], [0], [1], [0, 0, 1, 1], [], []>} : vector<128x16xbf16>, vector<16x32xbf16>, vector<128x32xf32> -> vector<128x32xf32>
    %c0_5 = arith.constant 0 : index
    %c0_6 = arith.constant 0 : index
    %6 = vector.load %arg4[%c0_5, %c0_6] : memref<1x32xf32, #tpu.memory_space<vmem>>, vector<1x32xf32>
    %7 = vector.broadcast %6 : vector<1x32xf32> to vector<128x32xf32>
    %8 = arith.addf %5, %7 : vector<128x32xf32>
    %9 = arith.truncf %8 : vector<128x32xf32> to vector<128x32xbf16>
    %c0_7 = arith.constant 0 : index
    %c0_8 = arith.constant 0 : index
    %10 = vector.load %arg5[%c0_7, %c0_8] : memref<32x32xf32, #tpu.memory_space<vmem>>, vector<32x32xf32>
    %11 = arith.truncf %10 : vector<32x32xf32> to vector<32x32xbf16>
    %cst_9 = arith.constant dense<0.000000e+00> : vector<128x32xf32>
    %12 = tpu.matmul %9, %11, %cst_9 {dimension_numbers = #tpu.dot_dimension_numbers<[1], [0], [0], [1], [0, 0, 1, 1], [], []>} : vector<128x32xbf16>, vector<32x32xbf16>, vector<128x32xf32> -> vector<128x32xf32>
    %13 = arith.truncf %12 : vector<128x32xf32> to vector<128x32xbf16>
    %cst_10 = arith.constant 1.000000e+00 : bf16
    %14 = vector.broadcast %cst_10 : bf16 to vector<128x1xbf16>
    %15 = tpu.concatenate %13, %14 in 1 : vector<128x32xbf16>, vector<128x1xbf16> -> vector<128x33xbf16>
    %c0_11 = arith.constant 0 : index
    %c0_12 = arith.constant 0 : index
    %16 = vector.load %arg6[%c0_11, %c0_12] : memref<32x4xf32, #tpu.memory_space<vmem>>, vector<32x4xf32>
    %17 = arith.truncf %16 : vector<32x4xf32> to vector<32x4xbf16>
    %cst_13 = arith.constant dense<0.000000e+00> : vector<128x4xf32>
    %18 = tpu.matmul %13, %17, %cst_13 {dimension_numbers = #tpu.dot_dimension_numbers<[1], [0], [0], [1], [0, 0, 1, 1], [], []>} : vector<128x32xbf16>, vector<32x4xbf16>, vector<128x4xf32> -> vector<128x4xf32>
    %c0_14 = arith.constant 0 : index
    %c0_15 = arith.constant 0 : index
    %19 = vector.load %arg7[%c0_14, %c0_15] : memref<32x4xf32, #tpu.memory_space<vmem>>, vector<32x4xf32>
    %20 = arith.truncf %19 : vector<32x4xf32> to vector<32x4xbf16>
    %cst_16 = arith.constant dense<0.000000e+00> : vector<128x4xf32>
    %21 = tpu.matmul %13, %20, %cst_16 {dimension_numbers = #tpu.dot_dimension_numbers<[1], [0], [0], [1], [0, 0, 1, 1], [], []>} : vector<128x32xbf16>, vector<32x4xbf16>, vector<128x4xf32> -> vector<128x4xf32>
    %22 = vector.extract_strided_slice %18 {offsets = [0, 0], sizes = [128, 1], strides = [1, 1]} : vector<128x4xf32> to vector<128x1xf32>
    %23 = tpu.transpose %22, [1, 0] : vector<128x1xf32> -> vector<1x128xf32>
    %24 = vector.extract_strided_slice %21 {offsets = [0, 0], sizes = [128, 1], strides = [1, 1]} : vector<128x4xf32> to vector<128x1xf32>
    %25 = vector.broadcast %24 : vector<128x1xf32> to vector<128x128xf32>
    %26 = vector.broadcast %23 : vector<1x128xf32> to vector<128x128xf32>
    %27 = arith.addf %25, %26 : vector<128x128xf32>
    %cst_17 = arith.constant 2.000000e-01 : f32
    %28 = vector.broadcast %cst_17 : f32 to vector<128x128xf32>
    %29 = arith.mulf %28, %27 : vector<128x128xf32>
    %30 = arith.maximumf %27, %29 : vector<128x128xf32>
    %31 = arith.addf %30, %0 : vector<128x128xf32>
    %cst_18 = arith.constant dense<0xFF800000> : vector<128xf32>
    %32 = vector.multi_reduction <maximumf>, %31, %cst_18 [1] : vector<128x128xf32> to vector<128xf32>
    %33 = vector.shape_cast %32 : vector<128xf32> to vector<128x1xf32>
    %34 = vector.broadcast %33 : vector<128x1xf32> to vector<128x128xf32>
    %35 = arith.subf %31, %34 : vector<128x128xf32>
    %36 = math.exp %35 : vector<128x128xf32>
    %37 = arith.truncf %36 : vector<128x128xf32> to vector<128x128xbf16>
    %cst_19 = arith.constant dense<0.000000e+00> : vector<128x33xf32>
    %38 = tpu.matmul %37, %15, %cst_19 {dimension_numbers = #tpu.dot_dimension_numbers<[1], [0], [0], [1], [0, 0, 1, 1], [], []>} : vector<128x128xbf16>, vector<128x33xbf16>, vector<128x33xf32> -> vector<128x33xf32>
    %39 = vector.extract_strided_slice %38 {offsets = [0, 32], sizes = [128, 1], strides = [1, 1]} : vector<128x33xf32> to vector<128x1xf32>
    %cst_20 = arith.constant 9.99999971E-10 : f32
    %40 = vector.broadcast %cst_20 : f32 to vector<128x1xf32>
    %41 = arith.maximumf %39, %40 : vector<128x1xf32>
    %42 = vector.extract_strided_slice %38 {offsets = [0, 0], sizes = [128, 8], strides = [1, 1]} : vector<128x33xf32> to vector<128x8xf32>
    %43 = tpu.reciprocal %41 {approx = true} : vector<128x1xf32> -> vector<128x1xf32>
    %44 = vector.broadcast %43 : vector<128x1xf32> to vector<128x8xf32>
    %45 = arith.mulf %42, %44 : vector<128x8xf32>
    %c0_21 = arith.constant 0 : index
    %c0_22 = arith.constant 0 : index
    %46 = vector.load %arg22[%c0_21, %c0_22] : memref<128x32xf32, #tpu.memory_space<vmem>>, vector<128x8xf32>
    tpu.vector_store %arg22[%c0_21, %c0_22], %45 {strides = array<i32>} : memref<128x32xf32, #tpu.memory_space<vmem>>, vector<128x8xf32>,
    %47 = vector.extract_strided_slice %18 {offsets = [0, 1], sizes = [128, 1], strides = [1, 1]} : vector<128x4xf32> to vector<128x1xf32>
    %48 = tpu.transpose %47, [1, 0] : vector<128x1xf32> -> vector<1x128xf32>
    %49 = vector.extract_strided_slice %21 {offsets = [0, 1], sizes = [128, 1], strides = [1, 1]} : vector<128x4xf32> to vector<128x1xf32>
    %50 = vector.broadcast %49 : vector<128x1xf32> to vector<128x128xf32>
    %51 = vector.broadcast %48 : vector<1x128xf32> to vector<128x128xf32>
    %52 = arith.addf %50, %51 : vector<128x128xf32>
    %cst_23 = arith.constant 2.000000e-01 : f32
    %53 = vector.broadcast %cst_23 : f32 to vector<128x128xf32>
    %54 = arith.mulf %53, %52 : vector<128x128xf32>
    %55 = arith.maximumf %52, %54 : vector<128x128xf32>
    %56 = arith.addf %55, %0 : vector<128x128xf32>
    %cst_24 = arith.constant dense<0xFF800000> : vector<128xf32>
    %57 = vector.multi_reduction <maximumf>, %56, %cst_24 [1] : vector<128x128xf32> to vector<128xf32>
    %58 = vector.shape_cast %57 : vector<128xf32> to vector<128x1xf32>
    %59 = vector.broadcast %58 : vector<128x1xf32> to vector<128x128xf32>
    %60 = arith.subf %56, %59 : vector<128x128xf32>
    %61 = math.exp %60 : vector<128x128xf32>
    %62 = arith.truncf %61 : vector<128x128xf32> to vector<128x128xbf16>
    %cst_25 = arith.constant dense<0.000000e+00> : vector<128x33xf32>
    %63 = tpu.matmul %62, %15, %cst_25 {dimension_numbers = #tpu.dot_dimension_numbers<[1], [0], [0], [1], [0, 0, 1, 1], [], []>} : vector<128x128xbf16>, vector<128x33xbf16>, vector<128x33xf32> -> vector<128x33xf32>
    %64 = vector.extract_strided_slice %63 {offsets = [0, 32], sizes = [128, 1], strides = [1, 1]} : vector<128x33xf32> to vector<128x1xf32>
    %cst_26 = arith.constant 9.99999971E-10 : f32
    %65 = vector.broadcast %cst_26 : f32 to vector<128x1xf32>
    %66 = arith.maximumf %64, %65 : vector<128x1xf32>
    %67 = vector.extract_strided_slice %63 {offsets = [0, 8], sizes = [128, 8], strides = [1, 1]} : vector<128x33xf32> to vector<128x8xf32>
    %68 = tpu.reciprocal %66 {approx = true} : vector<128x1xf32> -> vector<128x1xf32>
    %69 = vector.broadcast %68 : vector<128x1xf32> to vector<128x8xf32>
    %70 = arith.mulf %67, %69 : vector<128x8xf32>
    %c0_27 = arith.constant 0 : index
    %c8 = arith.constant 8 : index
    %71 = vector.load %arg22[%c0_27, %c8] : memref<128x32xf32, #tpu.memory_space<vmem>>, vector<128x8xf32>
    tpu.vector_store %arg22[%c0_27, %c8], %70 {strides = array<i32>} : memref<128x32xf32, #tpu.memory_space<vmem>>, vector<128x8xf32>,
    %72 = vector.extract_strided_slice %18 {offsets = [0, 2], sizes = [128, 1], strides = [1, 1]} : vector<128x4xf32> to vector<128x1xf32>
    %73 = tpu.transpose %72, [1, 0] : vector<128x1xf32> -> vector<1x128xf32>
    %74 = vector.extract_strided_slice %21 {offsets = [0, 2], sizes = [128, 1], strides = [1, 1]} : vector<128x4xf32> to vector<128x1xf32>
    %75 = vector.broadcast %74 : vector<128x1xf32> to vector<128x128xf32>
    %76 = vector.broadcast %73 : vector<1x128xf32> to vector<128x128xf32>
    %77 = arith.addf %75, %76 : vector<128x128xf32>
    %cst_28 = arith.constant 2.000000e-01 : f32
    %78 = vector.broadcast %cst_28 : f32 to vector<128x128xf32>
    %79 = arith.mulf %78, %77 : vector<128x128xf32>
    %80 = arith.maximumf %77, %79 : vector<128x128xf32>
    %81 = arith.addf %80, %0 : vector<128x128xf32>
    %cst_29 = arith.constant dense<0xFF800000> : vector<128xf32>
    %82 = vector.multi_reduction <maximumf>, %81, %cst_29 [1] : vector<128x128xf32> to vector<128xf32>
    %83 = vector.shape_cast %82 : vector<128xf32> to vector<128x1xf32>
    %84 = vector.broadcast %83 : vector<128x1xf32> to vector<128x128xf32>
    %85 = arith.subf %81, %84 : vector<128x128xf32>
    %86 = math.exp %85 : vector<128x128xf32>
    %87 = arith.truncf %86 : vector<128x128xf32> to vector<128x128xbf16>
    %cst_30 = arith.constant dense<0.000000e+00> : vector<128x33xf32>
    %88 = tpu.matmul %87, %15, %cst_30 {dimension_numbers = #tpu.dot_dimension_numbers<[1], [0], [0], [1], [0, 0, 1, 1], [], []>} : vector<128x128xbf16>, vector<128x33xbf16>, vector<128x33xf32> -> vector<128x33xf32>
    %89 = vector.extract_strided_slice %88 {offsets = [0, 32], sizes = [128, 1], strides = [1, 1]} : vector<128x33xf32> to vector<128x1xf32>
    %cst_31 = arith.constant 9.99999971E-10 : f32
    %90 = vector.broadcast %cst_31 : f32 to vector<128x1xf32>
    %91 = arith.maximumf %89, %90 : vector<128x1xf32>
    %92 = vector.extract_strided_slice %88 {offsets = [0, 16], sizes = [128, 8], strides = [1, 1]} : vector<128x33xf32> to vector<128x8xf32>
    %93 = tpu.reciprocal %91 {approx = true} : vector<128x1xf32> -> vector<128x1xf32>
    %94 = vector.broadcast %93 : vector<128x1xf32> to vector<128x8xf32>
    %95 = arith.mulf %92, %94 : vector<128x8xf32>
    %c0_32 = arith.constant 0 : index
    %c16 = arith.constant 16 : index
    %96 = vector.load %arg22[%c0_32, %c16] : memref<128x32xf32, #tpu.memory_space<vmem>>, vector<128x8xf32>
    tpu.vector_store %arg22[%c0_32, %c16], %95 {strides = array<i32>} : memref<128x32xf32, #tpu.memory_space<vmem>>, vector<128x8xf32>,
    %97 = vector.extract_strided_slice %18 {offsets = [0, 3], sizes = [128, 1], strides = [1, 1]} : vector<128x4xf32> to vector<128x1xf32>
    %98 = tpu.transpose %97, [1, 0] : vector<128x1xf32> -> vector<1x128xf32>
    %99 = vector.extract_strided_slice %21 {offsets = [0, 3], sizes = [128, 1], strides = [1, 1]} : vector<128x4xf32> to vector<128x1xf32>
    %100 = vector.broadcast %99 : vector<128x1xf32> to vector<128x128xf32>
    %101 = vector.broadcast %98 : vector<1x128xf32> to vector<128x128xf32>
    %102 = arith.addf %100, %101 : vector<128x128xf32>
    %cst_33 = arith.constant 2.000000e-01 : f32
    %103 = vector.broadcast %cst_33 : f32 to vector<128x128xf32>
    %104 = arith.mulf %103, %102 : vector<128x128xf32>
    %105 = arith.maximumf %102, %104 : vector<128x128xf32>
    %106 = arith.addf %105, %0 : vector<128x128xf32>
    %cst_34 = arith.constant dense<0xFF800000> : vector<128xf32>
    %107 = vector.multi_reduction <maximumf>, %106, %cst_34 [1] : vector<128x128xf32> to vector<128xf32>
    %108 = vector.shape_cast %107 : vector<128xf32> to vector<128x1xf32>
    %109 = vector.broadcast %108 : vector<128x1xf32> to vector<128x128xf32>
    %110 = arith.subf %106, %109 : vector<128x128xf32>
    %111 = math.exp %110 : vector<128x128xf32>
    %112 = arith.truncf %111 : vector<128x128xf32> to vector<128x128xbf16>
    %cst_35 = arith.constant dense<0.000000e+00> : vector<128x33xf32>
    %113 = tpu.matmul %112, %15, %cst_35 {dimension_numbers = #tpu.dot_dimension_numbers<[1], [0], [0], [1], [0, 0, 1, 1], [], []>} : vector<128x128xbf16>, vector<128x33xbf16>, vector<128x33xf32> -> vector<128x33xf32>
    %114 = vector.extract_strided_slice %113 {offsets = [0, 32], sizes = [128, 1], strides = [1, 1]} : vector<128x33xf32> to vector<128x1xf32>
    %cst_36 = arith.constant 9.99999971E-10 : f32
    %115 = vector.broadcast %cst_36 : f32 to vector<128x1xf32>
    %116 = arith.maximumf %114, %115 : vector<128x1xf32>
    %117 = vector.extract_strided_slice %113 {offsets = [0, 24], sizes = [128, 8], strides = [1, 1]} : vector<128x33xf32> to vector<128x8xf32>
    %118 = tpu.reciprocal %116 {approx = true} : vector<128x1xf32> -> vector<128x1xf32>
    %119 = vector.broadcast %118 : vector<128x1xf32> to vector<128x8xf32>
    %120 = arith.mulf %117, %119 : vector<128x8xf32>
    %c0_37 = arith.constant 0 : index
    %c24 = arith.constant 24 : index
    %121 = vector.load %arg22[%c0_37, %c24] : memref<128x32xf32, #tpu.memory_space<vmem>>, vector<128x8xf32>
    tpu.vector_store %arg22[%c0_37, %c24], %120 {strides = array<i32>} : memref<128x32xf32, #tpu.memory_space<vmem>>, vector<128x8xf32>,
    %c0_38 = arith.constant 0 : index
    %c0_39 = arith.constant 0 : index
    %122 = vector.load %arg22[%c0_38, %c0_39] : memref<128x32xf32, #tpu.memory_space<vmem>>, vector<128x32xf32>
    %c0_40 = arith.constant 0 : index
    %c0_41 = arith.constant 0 : index
    %123 = vector.load %arg8[%c0_40, %c0_41] : memref<1x32xf32, #tpu.memory_space<vmem>>, vector<1x32xf32>
    %124 = vector.broadcast %123 : vector<1x32xf32> to vector<128x32xf32>
    %125 = arith.mulf %122, %124 : vector<128x32xf32>
    %c0_42 = arith.constant 0 : index
    %c0_43 = arith.constant 0 : index
    %126 = vector.load %arg9[%c0_42, %c0_43] : memref<1x32xf32, #tpu.memory_space<vmem>>, vector<1x32xf32>
    %127 = vector.broadcast %126 : vector<1x32xf32> to vector<128x32xf32>
    %128 = arith.addf %125, %127 : vector<128x32xf32>
    %cst_44 = arith.constant 0.000000e+00 : f32
    %129 = vector.broadcast %cst_44 : f32 to vector<128x32xf32>
    %130 = arith.cmpf ogt, %128, %129 : vector<128x32xf32>
    %131 = math.exp %128 : vector<128x32xf32>
    %cst_45 = arith.constant 1.000000e+00 : f32
    %132 = vector.broadcast %cst_45 : f32 to vector<128x32xf32>
    %133 = arith.subf %131, %132 : vector<128x32xf32>
    %134 = arith.select %130, %128, %133 : vector<128x32xi1>, vector<128x32xf32>
    %135 = arith.addf %134, %8 : vector<128x32xf32>
    %136 = arith.truncf %135 : vector<128x32xf32> to vector<128x32xbf16>
    %c0_46 = arith.constant 0 : index
    %c0_47 = arith.constant 0 : index
    %137 = vector.load %arg10[%c0_46, %c0_47] : memref<32x32xf32, #tpu.memory_space<vmem>>, vector<32x32xf32>
    %138 = arith.truncf %137 : vector<32x32xf32> to vector<32x32xbf16>
    %cst_48 = arith.constant dense<0.000000e+00> : vector<128x32xf32>
    %139 = tpu.matmul %136, %138, %cst_48 {dimension_numbers = #tpu.dot_dimension_numbers<[1], [0], [0], [1], [0, 0, 1, 1], [], []>} : vector<128x32xbf16>, vector<32x32xbf16>, vector<128x32xf32> -> vector<128x32xf32>
    %140 = arith.truncf %139 : vector<128x32xf32> to vector<128x32xbf16>
    %cst_49 = arith.constant 1.000000e+00 : bf16
    %141 = vector.broadcast %cst_49 : bf16 to vector<128x1xbf16>
    %142 = tpu.concatenate %140, %141 in 1 : vector<128x32xbf16>, vector<128x1xbf16> -> vector<128x33xbf16>
    %c0_50 = arith.constant 0 : index
    %c0_51 = arith.constant 0 : index
    %143 = vector.load %arg11[%c0_50, %c0_51] : memref<32x1xf32, #tpu.memory_space<vmem>>, vector<32x1xf32>
    %144 = arith.truncf %143 : vector<32x1xf32> to vector<32x1xbf16>
    %cst_52 = arith.constant dense<0.000000e+00> : vector<128x1xf32>
    %145 = tpu.matmul %140, %144, %cst_52 {dimension_numbers = #tpu.dot_dimension_numbers<[1], [0], [0], [1], [0, 0, 1, 1], [], []>} : vector<128x32xbf16>, vector<32x1xbf16>, vector<128x1xf32> -> vector<128x1xf32>
    %c0_53 = arith.constant 0 : index
    %c0_54 = arith.constant 0 : index
    %146 = vector.load %arg12[%c0_53, %c0_54] : memref<32x1xf32, #tpu.memory_space<vmem>>, vector<32x1xf32>
    %147 = arith.truncf %146 : vector<32x1xf32> to vector<32x1xbf16>
    %cst_55 = arith.constant dense<0.000000e+00> : vector<128x1xf32>
    %148 = tpu.matmul %140, %147, %cst_55 {dimension_numbers = #tpu.dot_dimension_numbers<[1], [0], [0], [1], [0, 0, 1, 1], [], []>} : vector<128x32xbf16>, vector<32x1xbf16>, vector<128x1xf32> -> vector<128x1xf32>
    %149 = tpu.transpose %145, [1, 0] : vector<128x1xf32> -> vector<1x128xf32>
    %150 = vector.broadcast %148 : vector<128x1xf32> to vector<128x128xf32>
    %151 = vector.broadcast %149 : vector<1x128xf32> to vector<128x128xf32>
    %152 = arith.addf %150, %151 : vector<128x128xf32>
    %cst_56 = arith.constant 2.000000e-01 : f32
    %153 = vector.broadcast %cst_56 : f32 to vector<128x128xf32>
    %154 = arith.mulf %153, %152 : vector<128x128xf32>
    %155 = arith.maximumf %152, %154 : vector<128x128xf32>
    %156 = arith.addf %155, %0 : vector<128x128xf32>
    %cst_57 = arith.constant dense<0xFF800000> : vector<128xf32>
    %157 = vector.multi_reduction <maximumf>, %156, %cst_57 [1] : vector<128x128xf32> to vector<128xf32>
    %158 = vector.shape_cast %157 : vector<128xf32> to vector<128x1xf32>
    %159 = vector.broadcast %158 : vector<128x1xf32> to vector<128x128xf32>
    %160 = arith.subf %156, %159 : vector<128x128xf32>
    %161 = math.exp %160 : vector<128x128xf32>
    %162 = arith.truncf %161 : vector<128x128xf32> to vector<128x128xbf16>
    %cst_58 = arith.constant dense<0.000000e+00> : vector<128x33xf32>
    %163 = tpu.matmul %162, %142, %cst_58 {dimension_numbers = #tpu.dot_dimension_numbers<[1], [0], [0], [1], [0, 0, 1, 1], [], []>} : vector<128x128xbf16>, vector<128x33xbf16>, vector<128x33xf32> -> vector<128x33xf32>
    %164 = vector.extract_strided_slice %163 {offsets = [0, 32], sizes = [128, 1], strides = [1, 1]} : vector<128x33xf32> to vector<128x1xf32>
    %cst_59 = arith.constant 9.99999971E-10 : f32
    %165 = vector.broadcast %cst_59 : f32 to vector<128x1xf32>
    %166 = arith.maximumf %164, %165 : vector<128x1xf32>
    %167 = vector.extract_strided_slice %163 {offsets = [0, 0], sizes = [128, 32], strides = [1, 1]} : vector<128x33xf32> to vector<128x32xf32>
    %168 = tpu.reciprocal %166 {approx = true} : vector<128x1xf32> -> vector<128x1xf32>
    %169 = vector.broadcast %168 : vector<128x1xf32> to vector<128x32xf32>
    %170 = arith.mulf %167, %169 : vector<128x32xf32>
    %c0_60 = arith.constant 0 : index
    %c0_61 = arith.constant 0 : index
    %171 = vector.load %arg22[%c0_60, %c0_61] : memref<128x32xf32, #tpu.memory_space<vmem>>, vector<128x32xf32>
    tpu.vector_store %arg22[%c0_60, %c0_61], %170 {strides = array<i32>} : memref<128x32xf32, #tpu.memory_space<vmem>>, vector<128x32xf32>,
    %c0_62 = arith.constant 0 : index
    %c0_63 = arith.constant 0 : index
    %172 = vector.load %arg22[%c0_62, %c0_63] : memref<128x32xf32, #tpu.memory_space<vmem>>, vector<128x32xf32>
    %c0_64 = arith.constant 0 : index
    %c0_65 = arith.constant 0 : index
    %173 = vector.load %arg13[%c0_64, %c0_65] : memref<1x32xf32, #tpu.memory_space<vmem>>, vector<1x32xf32>
    %174 = vector.broadcast %173 : vector<1x32xf32> to vector<128x32xf32>
    %175 = arith.mulf %172, %174 : vector<128x32xf32>
    %c0_66 = arith.constant 0 : index
    %c0_67 = arith.constant 0 : index
    %176 = vector.load %arg14[%c0_66, %c0_67] : memref<1x32xf32, #tpu.memory_space<vmem>>, vector<1x32xf32>
    %177 = vector.broadcast %176 : vector<1x32xf32> to vector<128x32xf32>
    %178 = arith.addf %175, %177 : vector<128x32xf32>
    %cst_68 = arith.constant 0.000000e+00 : f32
    %179 = vector.broadcast %cst_68 : f32 to vector<128x32xf32>
    %180 = arith.cmpf ogt, %178, %179 : vector<128x32xf32>
    %181 = math.exp %178 : vector<128x32xf32>
    %cst_69 = arith.constant 1.000000e+00 : f32
    %182 = vector.broadcast %cst_69 : f32 to vector<128x32xf32>
    %183 = arith.subf %181, %182 : vector<128x32xf32>
    %184 = arith.select %180, %178, %183 : vector<128x32xi1>, vector<128x32xf32>
    %185 = arith.addf %184, %135 : vector<128x32xf32>
    %186 = arith.truncf %185 : vector<128x32xf32> to vector<128x32xbf16>
    %c0_70 = arith.constant 0 : index
    %c0_71 = arith.constant 0 : index
    %187 = vector.load %arg15[%c0_70, %c0_71] : memref<32x16xf32, #tpu.memory_space<vmem>>, vector<32x16xf32>
    %188 = arith.truncf %187 : vector<32x16xf32> to vector<32x16xbf16>
    %cst_72 = arith.constant dense<0.000000e+00> : vector<128x16xf32>
    %189 = tpu.matmul %186, %188, %cst_72 {dimension_numbers = #tpu.dot_dimension_numbers<[1], [0], [0], [1], [0, 0, 1, 1], [], []>} : vector<128x32xbf16>, vector<32x16xbf16>, vector<128x16xf32> -> vector<128x16xf32>
    %c0_73 = arith.constant 0 : index
    %c0_74 = arith.constant 0 : index
    %190 = vector.load %arg16[%c0_73, %c0_74] : memref<1x16xf32, #tpu.memory_space<vmem>>, vector<1x16xf32>
    %191 = vector.broadcast %190 : vector<1x16xf32> to vector<128x16xf32>
    %192 = arith.addf %189, %191 : vector<128x16xf32>
    %cst_75 = arith.constant 0.000000e+00 : f32
    %193 = vector.broadcast %cst_75 : f32 to vector<128x16xf32>
    %194 = arith.maximumf %192, %193 : vector<128x16xf32>
    %195 = arith.truncf %194 : vector<128x16xf32> to vector<128x16xbf16>
    %c0_76 = arith.constant 0 : index
    %c0_77 = arith.constant 0 : index
    %196 = vector.load %arg17[%c0_76, %c0_77] : memref<16x8xf32, #tpu.memory_space<vmem>>, vector<16x8xf32>
    %197 = arith.truncf %196 : vector<16x8xf32> to vector<16x8xbf16>
    %cst_78 = arith.constant dense<0.000000e+00> : vector<128x8xf32>
    %198 = tpu.matmul %195, %197, %cst_78 {dimension_numbers = #tpu.dot_dimension_numbers<[1], [0], [0], [1], [0, 0, 1, 1], [], []>} : vector<128x16xbf16>, vector<16x8xbf16>, vector<128x8xf32> -> vector<128x8xf32>
    %c0_79 = arith.constant 0 : index
    %c0_80 = arith.constant 0 : index
    %199 = vector.load %arg18[%c0_79, %c0_80] : memref<1x8xf32, #tpu.memory_space<vmem>>, vector<1x8xf32>
    %200 = vector.broadcast %199 : vector<1x8xf32> to vector<128x8xf32>
    %201 = arith.addf %198, %200 : vector<128x8xf32>
    %cst_81 = arith.constant 0.000000e+00 : f32
    %202 = vector.broadcast %cst_81 : f32 to vector<128x8xf32>
    %203 = arith.maximumf %201, %202 : vector<128x8xf32>
    %204 = arith.truncf %203 : vector<128x8xf32> to vector<128x8xbf16>
    %c0_82 = arith.constant 0 : index
    %c0_83 = arith.constant 0 : index
    %205 = vector.load %arg19[%c0_82, %c0_83] : memref<8x4xf32, #tpu.memory_space<vmem>>, vector<8x4xf32>
    %206 = arith.truncf %205 : vector<8x4xf32> to vector<8x4xbf16>
    %cst_84 = arith.constant dense<0.000000e+00> : vector<128x4xf32>
    %207 = tpu.matmul %204, %206, %cst_84 {dimension_numbers = #tpu.dot_dimension_numbers<[1], [0], [0], [1], [0, 0, 1, 1], [], []>} : vector<128x8xbf16>, vector<8x4xbf16>, vector<128x4xf32> -> vector<128x4xf32>
    %c0_85 = arith.constant 0 : index
    %c0_86 = arith.constant 0 : index
    %208 = vector.load %arg20[%c0_85, %c0_86] : memref<1x4xf32, #tpu.memory_space<vmem>>, vector<1x4xf32>
    %209 = vector.broadcast %208 : vector<1x4xf32> to vector<128x4xf32>
    %210 = arith.addf %207, %209 : vector<128x4xf32>
    %c0_87 = arith.constant 0 : index
    %c0_88 = arith.constant 0 : index
    %211 = vector.load %arg21[%c0_87, %c0_88] : memref<128x4xf32, #tpu.memory_space<vmem>>, vector<128x4xf32>
    tpu.vector_store %arg21[%c0_87, %c0_88], %210 {strides = array<i32>} : memref<128x4xf32, #tpu.memory_space<vmem>>, vector<128x4xf32>,
    return
  }
  func.func @transform_0(%arg0: i32) -> (i32, i32) {
    %c0_i32 = arith.constant 0 : i32
    %c0_i32_0 = arith.constant 0 : i32
    %c0_i32_1 = arith.constant 0 : i32
    return %c0_i32, %c0_i32_0 : i32, i32
  }
  func.func @transform_1(%arg0: i32) -> (i32, i32) {
    %c0_i32 = arith.constant 0 : i32
    %c0_i32_0 = arith.constant 0 : i32
    %c0_i32_1 = arith.constant 0 : i32
    return %c0_i32, %c0_i32_0 : i32, i32
  }
  func.func @transform_2(%arg0: i32) -> (i32, i32) {
    %c0_i32 = arith.constant 0 : i32
    %c0_i32_0 = arith.constant 0 : i32
    %c0_i32_1 = arith.constant 0 : i32
    return %c0_i32, %c0_i32_0 : i32, i32
  }
  func.func @transform_3(%arg0: i32) -> (i32, i32) {
    %c0_i32 = arith.constant 0 : i32
    %c0_i32_0 = arith.constant 0 : i32
    %c0_i32_1 = arith.constant 0 : i32
    return %c0_i32, %c0_i32_0 : i32, i32
  }
  func.func @transform_4(%arg0: i32) -> (i32, i32) {
    %c0_i32 = arith.constant 0 : i32
    %c0_i32_0 = arith.constant 0 : i32
    %c0_i32_1 = arith.constant 0 : i32
    return %c0_i32, %c0_i32_0 : i32, i32
  }
  func.func @transform_5(%arg0: i32) -> (i32, i32) {
    %c0_i32 = arith.constant 0 : i32
    %c0_i32_0 = arith.constant 0 : i32
    %c0_i32_1 = arith.constant 0 : i32
    return %c0_i32, %c0_i32_0 : i32, i32
  }
  func.func @transform_6(%arg0: i32) -> (i32, i32) {
    %c0_i32 = arith.constant 0 : i32
    %c0_i32_0 = arith.constant 0 : i32
    %c0_i32_1 = arith.constant 0 : i32
    return %c0_i32, %c0_i32_0 : i32, i32
  }
  func.func @transform_7(%arg0: i32) -> (i32, i32) {
    %c0_i32 = arith.constant 0 : i32
    %c0_i32_0 = arith.constant 0 : i32
    %c0_i32_1 = arith.constant 0 : i32
    return %c0_i32, %c0_i32_0 : i32, i32
  }
  func.func @transform_8(%arg0: i32) -> (i32, i32) {
    %c0_i32 = arith.constant 0 : i32
    %c0_i32_0 = arith.constant 0 : i32
    %c0_i32_1 = arith.constant 0 : i32
    return %c0_i32, %c0_i32_0 : i32, i32
  }
  func.func @transform_9(%arg0: i32) -> (i32, i32) {
    %c0_i32 = arith.constant 0 : i32
    %c0_i32_0 = arith.constant 0 : i32
    %c0_i32_1 = arith.constant 0 : i32
    return %c0_i32, %c0_i32_0 : i32, i32
  }
  func.func @transform_10(%arg0: i32) -> (i32, i32) {
    %c0_i32 = arith.constant 0 : i32
    %c0_i32_0 = arith.constant 0 : i32
    %c0_i32_1 = arith.constant 0 : i32
    return %c0_i32, %c0_i32_0 : i32, i32
  }
  func.func @transform_11(%arg0: i32) -> (i32, i32) {
    %c0_i32 = arith.constant 0 : i32
    %c0_i32_0 = arith.constant 0 : i32
    %c0_i32_1 = arith.constant 0 : i32
    return %c0_i32, %c0_i32_0 : i32, i32
  }
  func.func @transform_12(%arg0: i32) -> (i32, i32) {
    %c0_i32 = arith.constant 0 : i32
    %c0_i32_0 = arith.constant 0 : i32
    %c0_i32_1 = arith.constant 0 : i32
    return %c0_i32, %c0_i32_0 : i32, i32
  }
  func.func @transform_13(%arg0: i32) -> (i32, i32) {
    %c0_i32 = arith.constant 0 : i32
    %c0_i32_0 = arith.constant 0 : i32
    %c0_i32_1 = arith.constant 0 : i32
    return %c0_i32, %c0_i32_0 : i32, i32
  }
  func.func @transform_14(%arg0: i32) -> (i32, i32) {
    %c0_i32 = arith.constant 0 : i32
    %c0_i32_0 = arith.constant 0 : i32
    %c0_i32_1 = arith.constant 0 : i32
    return %c0_i32, %c0_i32_0 : i32, i32
  }
  func.func @transform_15(%arg0: i32) -> (i32, i32) {
    %c0_i32 = arith.constant 0 : i32
    %c0_i32_0 = arith.constant 0 : i32
    %c0_i32_1 = arith.constant 0 : i32
    return %c0_i32, %c0_i32_0 : i32, i32
  }
  func.func @transform_16(%arg0: i32) -> (i32, i32) {
    %c0_i32 = arith.constant 0 : i32
    %c0_i32_0 = arith.constant 0 : i32
    %c0_i32_1 = arith.constant 0 : i32
    return %c0_i32, %c0_i32_0 : i32, i32
  }
  func.func @transform_17(%arg0: i32) -> (i32, i32) {
    %c0_i32 = arith.constant 0 : i32
    %c0_i32_0 = arith.constant 0 : i32
    %c0_i32_1 = arith.constant 0 : i32
    return %c0_i32, %c0_i32_0 : i32, i32
  }
  func.func @transform_18(%arg0: i32) -> (i32, i32) {
    %c0_i32 = arith.constant 0 : i32
    %c0_i32_0 = arith.constant 0 : i32
    %c0_i32_1 = arith.constant 0 : i32
    return %c0_i32, %c0_i32_0 : i32, i32
  }
  func.func @transform_19(%arg0: i32) -> (i32, i32) {
    %c0_i32 = arith.constant 0 : i32
    %c0_i32_0 = arith.constant 0 : i32
    %c0_i32_1 = arith.constant 0 : i32
    return %c0_i32, %c0_i32_0 : i32, i32
  }
  func.func @transform_20(%arg0: i32) -> (i32, i32) {
    %c0_i32 = arith.constant 0 : i32
    %c0_i32_0 = arith.constant 0 : i32
    %c0_i32_1 = arith.constant 0 : i32
    return %c0_i32, %c0_i32_0 : i32, i32
  }
}

</mosaic_0001>

<bundles_post_ra>
// kernel: gatnet_forward.1
= control target key start
LH: loop header
LB: loop body
LE: loop exit
PB: predicated region body
PF: predicated region fallthrough
CT: control target
= control target key end

     0   :  { %vm117_vm0 = vcmask 130048   ;;  %vm253_vm1 = vcmask 261120   ;;  %s5607_s29 = smov 125   ;;  %vm1123_vm2 = vcmask 64512   ;;  %vm1681_vm3 = vcmask 130112   ;;  %s8069_s2 = inlined_call_operand.vmem [shape: f32[16,32], index: 2, kind: input, shape index: {}]   ;;  %s8070_s0 = inlined_call_operand.vmem [shape: f32[128,16], index: 0, kind: input, shape index: {}]   ;;  %s8071_s4 = inlined_call_operand.vmem [shape: f32[32,32], index: 4, kind: input, shape index: {}]   ;;  %s8072_s6 = inlined_call_operand.vmem [shape: f32[32,4], index: 6, kind: input, shape index: {}]   ;;  %s8073_s5 = inlined_call_operand.vmem [shape: f32[32,4], index: 5, kind: input, shape index: {}]   ;;  %s8074_s3 = inlined_call_operand.vmem [shape: f32[1,32], index: 3, kind: input, shape index: {}]   ;;  %s8075_s1 = inlined_call_operand.vmem [shape: f32[128,128], index: 1, kind: input, shape index: {}]   ;;  %s8076_s9 = inlined_call_operand.vmem [shape: f32[32,32], index: 9, kind: input, shape index: {}]   ;;  %s8077_s11 = inlined_call_operand.vmem [shape: f32[32,1], index: 11, kind: input, shape index: {}]   ;;  %s8078_s10 = inlined_call_operand.vmem [shape: f32[32,1], index: 10, kind: input, shape index: {}]   ;;  %s8079_s7 = inlined_call_operand.vmem [shape: f32[1,32], index: 7, kind: input, shape index: {}]   ;;  %s8080_s8 = inlined_call_operand.vmem [shape: f32[1,32], index: 8, kind: input, shape index: {}]   ;;  %s8081_s14 = inlined_call_operand.vmem [shape: f32[32,16], index: 14, kind: input, shape index: {}]   ;;  %s8082_s12 = inlined_call_operand.vmem [shape: f32[1,32], index: 12, kind: input, shape index: {}]   ;;  %s8083_s13 = inlined_call_operand.vmem [shape: f32[1,32], index: 13, kind: input, shape index: {}]   ;;  %s8084_s16 = inlined_call_operand.vmem [shape: f32[16,8], index: 16, kind: input, shape index: {}]   ;;  %s8085_s15 = inlined_call_operand.vmem [shape: f32[1,16], index: 15, kind: input, shape index: {}]   ;;  %s8086_s18 = inlined_call_operand.vmem [shape: f32[8,4], index: 18, kind: input, shape index: {}]   ;;  %s8087_s17 = inlined_call_operand.vmem [shape: f32[1,8], index: 17, kind: input, shape index: {}]   ;;  %s8088_s19 = inlined_call_operand.vmem [shape: f32[1,4], index: 19, kind: input, shape index: {}]   ;;  %s8089_s20 = inlined_call_operand.vmem [shape: f32[128,4], index: 20, kind: output, shape index: {}]  }
   0x1   :  { %8176 = sst [smem:[#allocation98_spill]] %s8069_s2  ;;  %v4472_v43 = vld [vmem:[%s8074_s3] ss:$0 sm:$0xff]  ;;  %s5605_s3 = smov 126   ;;  %vm2223_vm4 = vcmask 195712   ;;  %vm2765_vm5 = vcmask 261312  }
   0x2   :  { %8177 = sst [smem:[#allocation99_spill]] %s8070_s0  ;;  %s8181_s23 = sld [smem:[#allocation98_spill]] }
   0x3   :  { %8178 = sst [smem:[#allocation100_spill]] %s8071_s4  ;;  %s8182_s26 = sld [smem:[#allocation99_spill]] }
   0x4   :  { %8179 = sst [smem:[#allocation101_spill]] %s8072_s6  ;;  %s8183_s24 = sld [smem:[#allocation100_spill]] }
   0x5   :  { %8180 = sst [smem:[#allocation102_spill]] %s8073_s5  ;;  %s8184_s6 = sld [smem:[#allocation101_spill]] }
   0x6   :  { %s8185_s30 = sld [smem:[#allocation102_spill]] }
   0x8   :  { %v107_v0 = vld [vmem:[%s8181_s23] sm:$0xff]  ;;  %v108_v1 = vld [vmem:[%s8181_s23 + $0x8] sm:$0xff] }
   0x9   :  { %v83_v2 = vld [vmem:[%s8182_s26] sm:$0xff]  ;;  %v109_v3 = vpack.c.bf16 %v108_v1, %v107_v0  ;;  %v84_v4 = vld [vmem:[%s8182_s26 + $0x8] sm:$0xff]  ;;  %v85_v5 = vld [vmem:[%s8182_s26 + $0x10] sm:$0xff] }
   0xa   :  { %v86_v6 = vld [vmem:[%s8182_s26 + $0x18] sm:$0xff]  ;;  %v99_v7 = vpack.c.bf16 %v84_v4, %v83_v2  ;;  %v87_v8 = vld [vmem:[%s8182_s26 + $0x20] sm:$0xff]  ;;  %v88_v9 = vld [vmem:[%s8182_s26 + $0x28] sm:$0xff] }
   0xb   :  { %4769 = vmatprep.subr.bf16.mxu0 %v109_v3  ;;  %v100_v10 = vpack.c.bf16 %v86_v6, %v85_v5  ;;  %5123 = vmatprep.subr.bf16.mxu1 %v109_v3  ;;  %v91_v11 = vld [vmem:[%s8182_s26 + $0x40] sm:$0xff]  ;;  %v92_v12 = vld [vmem:[%s8182_s26 + $0x48] sm:$0xff]  ;;  %v101_v13 = vpack.c.bf16 %v88_v9, %v87_v8  ;;  %v93_v15 = vld [vmem:[%s8182_s26 + $0x50] sm:$0xff] }
   0xc   :  { %4770 = vmatpush3.bf16.msra.mxu0 %v109_v3  ;;  %4771 = vmatprep.mubr.msk.bf16.mxu0 %vm117_vm0, %v99_v7  ;;  %v103_v14 = vpack.c.bf16 %v92_v12, %v91_v11  ;;  %v94_v16 = vld [vmem:[%s8182_s26 + $0x58] sm:$0xff]  ;;  %v95_v17 = vld [vmem:[%s8182_s26 + $0x60] sm:$0xff]  ;;  %v96_v19 = vld [vmem:[%s8182_s26 + $0x68] sm:$0xff] }
   0xd   :  { %5124 = vmatpush3.bf16.msra.mxu1 %v109_v3  ;;  %v104_v18 = vpack.c.bf16 %v94_v16, %v93_v15  ;;  %v105_v20 = vpack.c.bf16 %v96_v19, %v95_v17  ;;  %v247_v21 = vld [vmem:[%s8183_s24] sm:$0xff]  ;;  %v248_v22 = vld [vmem:[%s8183_s24 + $0x8] sm:$0xff]  ;;  %v89_v24 = vld [vmem:[%s8182_s26 + $0x30] sm:$0xff] }
   0xe   :  { %4779 = vmatprep.mubr.msk.bf16.mxu1 %vm117_vm0, %v103_v14  ;;  %v251_v23 = vpack.c.bf16 %v248_v22, %v247_v21  ;;  %v90_v25 = vld [vmem:[%s8182_s26 + $0x38] sm:$0xff]  ;;  %v97_v26 = vld [vmem:[%s8182_s26 + $0x70] sm:$0xff]  ;;  %v527_v33 = vld [vmem:[%s8184_s6] sm:$0xff] }
   0xf   :  { %4772 = vmatmul.mubr.msk.bf16.vlgmr.msra.gmra.mrb[0].mxu0 %vm117_vm0, %v100_v10  ;;  %v98_v27 = vld [vmem:[%s8182_s26 + $0x78] sm:$0xff]  ;;  %v102_v28 = vpack.c.bf16 %v90_v25, %v89_v24  ;;  %v249_v30 = vld [vmem:[%s8183_s24 + $0x10] sm:$0xff]  ;;  %v528_v34 = vld [vmem:[%s8184_s6 + $0x8] sm:$0xff] }
  0x10   :  { %4775 = vmatprep.mubr.msk.bf16.mxu0 %vm117_vm0, %v101_v13  ;;  %4780 = vmatmul.mubr.msk.bf16.vlgmr.msra.gmra.mrb[0].mxu1 %vm117_vm0, %v104_v18  ;;  %v106_v29 = vpack.c.bf16 %v98_v27, %v97_v26  ;;  %v250_v31 = vld [vmem:[%s8183_s24 + $0x18] sm:$0xff]  ;;  %v408_v35 = vld [vmem:[%s8185_s30] sm:$0xff]  ;;  %v531_v36 = vpack.c.bf16 %v528_v34, %v527_v33  ;;  %v409_v37 = vld [vmem:[%s8185_s30 + $0x8] sm:$0xff] }
  0x11   :  { %4783 = vmatprep.mubr.msk.bf16.mxu1 %vm117_vm0, %v105_v20  ;;  %4787 = vmatprep.subr.bf16.mxu1 %v251_v23  ;;  %v252_v32 = vpack.c.bf16 %v250_v31, %v249_v30  ;;  %v412_v38 = vpack.c.bf16 %v409_v37, %v408_v35  ;;  %v410_v39 = vld [vmem:[%s8185_s30 + $0x10] sm:$0xff]  ;;  %v411_v40 = vld [vmem:[%s8185_s30 + $0x18] sm:$0xff] }
  0x12   :  { %4788 = vmatpush3.bf16.msra.mxu1 %v251_v23  ;;  %v413_v41 = vpack.c.bf16 %v411_v40, %v410_v39  ;;  %v529_v54 = vld [vmem:[%s8184_s6 + $0x10] sm:$0xff]  ;;  %v530_v55 = vld [vmem:[%s8184_s6 + $0x18] sm:$0xff]  ;;  %s5606_s6 = smov 127  }
  0x13   :  { %4789 = vmatprep.subr.bf16.mxu1 %v252_v32  ;;  %4807 = vmatprep.subr.bf16.mxu0 %v412_v38  ;;  %v532_v59 = vpack.c.bf16 %v530_v55, %v529_v54 }
  0x14   :  { %4808 = vmatpush3.bf16.msra.mxu0 %v412_v38 }
  0x15   :  { %4809 = vmatprep.subr.bf16.mxu0 %v413_v41 }
  0x16   :  { %4790 = vmatpush3.bf16.msra.mxu1 %v252_v32 }
  0x17   :  { %4776 = vmatmul.mubr.msk.bf16.gmra.mrb[4].mxu0 %vm117_vm0, %v102_v28  ;;  %4827 = vmatprep.subr.bf16.mxu1 %v531_v36 }
  0x18   :  { %4784 = vmatmul.mubr.msk.bf16.gmra.mrb[4].mxu1 %vm117_vm0, %v106_v29  ;;  %4810 = vmatpush3.bf16.msra.mxu0 %v413_v41 }
  0xe2   :  { %v4773_v42 = vpop.f32.mrb[0].mxu0 }
  0xe3   :  { %v176_v44 = vpop.f32.mrb[1].mxu0  ;;  %v4781_v45 = vpop.f32.mrb[0].mxu1  ;;  %v5823_v56 = vadd.f32 %v4773_v42, %v4472_v43 }
  0xe4   :  { %v4774_v46 = vpop.f32.mrb[2].mxu0  ;;  %v208_v47 = vpop.f32.mrb[1].mxu1  ;;  %v5813_v51 = vadd.f32 %v4472_v43, %v176_v44  ;;  %v5850_v13 = vadd.f32 %v4781_v45, %v4472_v43 }
  0xe5   :  { %v5811_v48 = vadd.f32 %v4774_v46, %v4472_v43  ;;  %v179_v49 = vpop.f32.mrb[3].mxu0  ;;  %v4782_v50 = vpop.f32.mrb[2].mxu1  ;;  %8189 = vst [vmem:[#allocation6_spill] sm:$0xff] %v5823_v56  ;;  %v5835_v2 = vadd.f32 %v4472_v43, %v208_v47 }
  0xe6   :  { %8187 = vst [vmem:[#allocation4_spill] sm:$0xff] %v5813_v51  ;;  %v5815_v52 = vadd.f32 %v4472_v43, %v179_v49  ;;  %v211_v53 = vpop.f32.mrb[3].mxu1  ;;  %8196 = vst [vmem:[#allocation13_spill] sm:$0xff] %v5850_v13  ;;  %v5853_v14 = vadd.f32 %v4782_v50, %v4472_v43 }
  0xe7   :  { %8186 = vst [vmem:[#allocation3_spill] sm:$0xff] %v5811_v48  ;;  %v240_v58 = vpack.c.bf16 %v5811_v48, %v5823_v56  ;;  %8192 = vst [vmem:[#allocation9_spill] sm:$0xff] %v5835_v2  ;;  %v5837_v3 = vadd.f32 %v4472_v43, %v211_v53 }
  0xe8   :  { %8188 = vst [vmem:[#allocation5_spill] sm:$0xff] %v5815_v52  ;;  %v239_v57 = vpack.c.bf16 %v5815_v52, %v5813_v51  ;;  %8197 = vst [vmem:[#allocation14_spill] sm:$0xff] %v5853_v14  ;;  %v244_v17 = vpack.c.bf16 %v5853_v14, %v5850_v13 }
  0xe9   :  { %8193 = vst [vmem:[#allocation10_spill] sm:$0xff] %v5837_v3  ;;  %v243_v12 = vpack.c.bf16 %v5837_v3, %v5835_v2  ;;  %v8221_v3 = vmov 1  }
  0xea   :  { %v4777_v60 = vpop.f32.mrb[4].mxu0  ;;  %4791 = vmatprep.mubr.msk.bf16.mxu1 %vm253_vm1, %v239_v57 }
  0xeb   :  { %v5830_v61 = vadd.f32 %v4777_v60, %v4472_v43  ;;  %v192_v62 = vpop.f32.mrb[5].mxu0  ;;  %4792 = vmatmul.mubr.msk.bf16.vlgmr.msra.gmra.mrb[8].mxu1 %vm253_vm1, %v240_v58  ;;  %v4785_v63 = vpop.f32.mrb[4].mxu1  ;;  %v8095_v58 = vmov 0  }
  0xec   :  { %v5833_v0 = vadd.f32 %v4472_v43, %v192_v62  ;;  %v4778_v1 = vpop.f32.mrb[6].mxu0  ;;  %v224_v4 = vpop.f32.mrb[5].mxu1  ;;  %4828 = vmatpush3.bf16.msra.mxu1 %v531_v36  ;;  %v5864_v19 = vadd.f32 %v4785_v63, %v4472_v43  ;;  %5134 = vset.pattern.permute.xlu0 %v8095_v58 }
  0xed   :  { %8190 = vst [vmem:[#allocation7_spill] sm:$0xff] %v5830_v61  ;;  %v5839_v5 = vadd.f32 %v4778_v1, %v4472_v43  ;;  %v195_v6 = vpop.f32.mrb[7].mxu0  ;;  %v4786_v7 = vpop.f32.mrb[6].mxu1  ;;  %4829 = vmatprep.subr.bf16.mxu1 %v532_v59  ;;  %v5856_v15 = vadd.f32 %v4472_v43, %v224_v4 }
  0xee   :  { %8191 = vst [vmem:[#allocation8_spill] sm:$0xff] %v5833_v0  ;;  %v5841_v8 = vadd.f32 %v4472_v43, %v195_v6  ;;  %v227_v9 = vpop.f32.mrb[7].mxu1  ;;  %8200 = vst [vmem:[#allocation17_spill] sm:$0xff] %v5864_v19  ;;  %v5867_v20 = vadd.f32 %v4786_v7, %v4472_v43 }
  0xef   :  { %8194 = vst [vmem:[#allocation11_spill] sm:$0xff] %v5839_v5  ;;  %v242_v10 = vpack.c.bf16 %v5839_v5, %v5830_v61  ;;  %8198 = vst [vmem:[#allocation15_spill] sm:$0xff] %v5856_v15  ;;  %v5858_v16 = vadd.f32 %v4472_v43, %v227_v9 }
  0xf0   :  { %8195 = vst [vmem:[#allocation12_spill] sm:$0xff] %v5841_v8  ;;  %v241_v11 = vpack.c.bf16 %v5841_v8, %v5833_v0  ;;  %4830 = vmatpush3.bf16.msra.mxu1 %v532_v59  ;;  %8201 = vst [vmem:[#allocation18_spill] sm:$0xff] %v5867_v20  ;;  %v246_v21 = vpack.c.bf16 %v5867_v20, %v5864_v19  ;;  %v8100_v59 = vmov 3   ;;  %v8226_v0 = vmov 3  }
  0xf1   :  { %8199 = vst [vmem:[#allocation16_spill] sm:$0xff] %v5858_v16  ;;  %v245_v18 = vpack.c.bf16 %v5858_v16, %v5856_v15  ;;  %5137 = vset.pattern.permute.xlu1 %v8100_v59 }
  0xf2   :  { %4795 = vmatprep.mubr.msk.bf16.mxu1 %vm253_vm1, %v241_v11 }
  0xf3   :  { %4796 = vmatmul.mubr.msk.bf16.gmra.mrb[12].mxu1 %vm253_vm1, %v242_v10  ;;  %v8104_v10 = vmov 1  }
  0xf4   :  { %4799 = vmatprep.mubr.msk.bf16.mxu1 %vm253_vm1, %v243_v12 }
  0xfb   :  { %4800 = vmatmul.mubr.msk.bf16.gmra.mrb[16].mxu1 %vm253_vm1, %v244_v17 }
  0xfc   :  { %4803 = vmatprep.mubr.msk.bf16.mxu1 %vm253_vm1, %v245_v18 }
 0x103   :  { %4804 = vmatmul.mubr.msk.bf16.gmra.mrb[20].mxu1 %vm253_vm1, %v246_v21 }
 0x1be   :  { %v4793_v22 = vpop.f32.mrb[8].mxu1 }
 0x1bf   :  { %v312_v23 = vpop.f32.mrb[9].mxu1 }
 0x1c0   :  { %v4794_v24 = vpop.f32.mrb[10].mxu1 }
 0x1c1   :  { %v376_v25 = vpack.c.bf16 %v4794_v24, %v4793_v22  ;;  %v315_v26 = vpop.f32.mrb[11].mxu1 }
 0x1c2   :  { %v375_v27 = vpack.c.bf16 %v315_v26, %v312_v23 }
 0x1c3   :  { %v5883_v30 = vsel %vm253_vm1, %v376_v25, 1065369472 }
 0x1c4   :  { %v5874_v28 = vsel %vm253_vm1, %v375_v27, 1065369472  ;;  %4811 = vmatprep.mubr.msk.bf16.mxu0 %vm253_vm1, %v375_v27  ;;  %4831 = vmatprep.mubr.msk.bf16.mxu1 %vm253_vm1, %v375_v27  ;;  %8203 = vst [vmem:[#allocation20_spill] sm:$0xff] %v5883_v30 }
 0x1c5   :  { %8202 = vst [vmem:[#allocation19_spill] sm:$0xff] %v5874_v28  ;;  %4812 = vmatmul.mubr.msk.bf16.vlgmr.msra.gmra.mrb[8].mxu0 %vm253_vm1, %v376_v25  ;;  %4832 = vmatmul.mubr.msk.bf16.vlgmr.msra.gmra.mrb[24].mxu1 %vm253_vm1, %v376_v25  ;;  %v8097_v25 = vmov 2  }
 0x1c6   :  { %4847 = vmatprep.subr.bf16.mxu0 %v5874_v28  ;;  %4879 = vmatprep.subr.bf16.mxu1 %v5874_v28  ;;  %v4797_v29 = vpop.f32.mrb[12].mxu1 }
 0x1c7   :  { %4848 = vmatpush3.bf16.msra.mxu0 %v5874_v28  ;;  %4880 = vmatpush3.bf16.msra.mxu1 %v5874_v28  ;;  %v328_v31 = vpop.f32.mrb[13].mxu1 }
 0x1c8   :  { %4849 = vmatprep.subr.bf16.mxu0 %v5883_v30  ;;  %4881 = vmatprep.subr.bf16.mxu1 %v5883_v30  ;;  %v4798_v32 = vpop.f32.mrb[14].mxu1 }
 0x1c9   :  { %v378_v33 = vpack.c.bf16 %v4798_v32, %v4797_v29  ;;  %v331_v34 = vpop.f32.mrb[15].mxu1 }
 0x1ca   :  { %v377_v35 = vpack.c.bf16 %v331_v34, %v328_v31 }
 0x1cb   :  { %4850 = vmatpush3.bf16.msra.mxu0 %v5883_v30  ;;  %4882 = vmatpush3.bf16.msra.mxu1 %v5883_v30  ;;  %v5897_v37 = vsel %vm253_vm1, %v378_v33, 1065369472 }
 0x1cc   :  { %v5892_v36 = vsel %vm253_vm1, %v377_v35, 1065369472  ;;  %4815 = vmatprep.mubr.msk.bf16.mxu0 %vm253_vm1, %v377_v35  ;;  %4835 = vmatprep.mubr.msk.bf16.mxu1 %vm253_vm1, %v377_v35  ;;  %8205 = vst [vmem:[#allocation22_spill] sm:$0xff] %v5897_v37 }
 0x1cd   :  { %8204 = vst [vmem:[#allocation21_spill] sm:$0xff] %v5892_v36  ;;  %4851 = vmatprep.subr.bf16.mxu0 %v5892_v36  ;;  %4883 = vmatprep.subr.bf16.mxu1 %v5892_v36 }
 0x1ce   :  { %v4801_v38 = vpop.f32.mrb[16].mxu1  ;;  %4816 = vmatmul.mubr.msk.bf16.gmra.mrb[12].mxu0 %vm253_vm1, %v378_v33  ;;  %4836 = vmatmul.mubr.msk.bf16.gmra.mrb[28].mxu1 %vm253_vm1, %v378_v33 }
 0x1cf   :  { %4852 = vmatpush3.bf16.msra.mxu0 %v5892_v36  ;;  %4884 = vmatpush3.bf16.msra.mxu1 %v5892_v36  ;;  %v344_v39 = vpop.f32.mrb[17].mxu1 }
 0x1d0   :  { %v4802_v40 = vpop.f32.mrb[18].mxu1  ;;  %4853 = vmatprep.subr.bf16.mxu0 %v5897_v37  ;;  %4885 = vmatprep.subr.bf16.mxu1 %v5897_v37 }
 0x1d1   :  { %v380_v41 = vpack.c.bf16 %v4802_v40, %v4801_v38  ;;  %v347_v42 = vpop.f32.mrb[19].mxu1 }
 0x1d2   :  { %v379_v43 = vpack.c.bf16 %v347_v42, %v344_v39 }
 0x1d3   :  { %4854 = vmatpush3.bf16.msra.mxu0 %v5897_v37  ;;  %4886 = vmatpush3.bf16.msra.mxu1 %v5897_v37  ;;  %v5915_v45 = vsel %vm253_vm1, %v380_v41, 1065369472 }
 0x1d4   :  { %v5910_v44 = vsel %vm253_vm1, %v379_v43, 1065369472  ;;  %4819 = vmatprep.mubr.msk.bf16.mxu0 %vm253_vm1, %v379_v43  ;;  %4839 = vmatprep.mubr.msk.bf16.mxu1 %vm253_vm1, %v379_v43  ;;  %8207 = vst [vmem:[#allocation24_spill] sm:$0xff] %v5915_v45 }
 0x1d5   :  { %8206 = vst [vmem:[#allocation23_spill] sm:$0xff] %v5910_v44  ;;  %4855 = vmatprep.subr.bf16.mxu0 %v5910_v44  ;;  %4887 = vmatprep.subr.bf16.mxu1 %v5910_v44 }
 0x1d6   :  { %v4805_v46 = vpop.f32.mrb[20].mxu1  ;;  %4820 = vmatmul.mubr.msk.bf16.gmra.mrb[16].mxu0 %vm253_vm1, %v380_v41  ;;  %4840 = vmatmul.mubr.msk.bf16.gmra.mrb[32].mxu1 %vm253_vm1, %v380_v41 }
 0x1d7   :  { %4856 = vmatpush3.bf16.msra.mxu0 %v5910_v44  ;;  %4888 = vmatpush3.bf16.msra.mxu1 %v5910_v44  ;;  %v360_v47 = vpop.f32.mrb[21].mxu1 }
 0x1d8   :  { %v4806_v49 = vpop.f32.mrb[22].mxu1  ;;  %4857 = vmatprep.subr.bf16.mxu0 %v5915_v45  ;;  %4889 = vmatprep.subr.bf16.mxu1 %v5915_v45 }
 0x1d9   :  { %v382_v50 = vpack.c.bf16 %v4806_v49, %v4805_v46  ;;  %v363_v53 = vpop.f32.mrb[23].mxu1 }
 0x1da   :  { %v381_v54 = vpack.c.bf16 %v363_v53, %v360_v47 }
 0x1db   :  { %4858 = vmatpush3.bf16.msra.mxu0 %v5915_v45  ;;  %4890 = vmatpush3.bf16.msra.mxu1 %v5915_v45  ;;  %v5933_v57 = vsel %vm253_vm1, %v382_v50, 1065369472 }
 0x1dc   :  { %v5928_v55 = vsel %vm253_vm1, %v381_v54, 1065369472  ;;  %4823 = vmatprep.mubr.msk.bf16.mxu0 %vm253_vm1, %v381_v54  ;;  %4843 = vmatprep.mubr.msk.bf16.mxu1 %vm253_vm1, %v381_v54  ;;  %8209 = vst [vmem:[#allocation26_spill] sm:$0xff] %v5933_v57 }
 0x1dd   :  { %8208 = vst [vmem:[#allocation25_spill] sm:$0xff] %v5928_v55  ;;  %4859 = vmatprep.subr.bf16.mxu0 %v5928_v55  ;;  %4891 = vmatprep.subr.bf16.mxu1 %v5928_v55 }
 0x1de   :  { %4824 = vmatmul.mubr.msk.bf16.gmra.mrb[20].mxu0 %vm253_vm1, %v382_v50  ;;  %4844 = vmatmul.mubr.msk.bf16.gmra.mrb[36].mxu1 %vm253_vm1, %v382_v50 }
 0x1df   :  { %4860 = vmatpush3.bf16.msra.mxu0 %v5928_v55  ;;  %4892 = vmatpush3.bf16.msra.mxu1 %v5928_v55 }
 0x1e0   :  { %4861 = vmatprep.subr.bf16.mxu0 %v5933_v57  ;;  %4893 = vmatprep.subr.bf16.mxu1 %v5933_v57 }
 0x1e3   :  { %4862 = vmatpush3.bf16.msra.mxu0 %v5933_v57  ;;  %4894 = vmatpush3.bf16.msra.mxu1 %v5933_v57 }
 0x1e4   :  { %4911 = vmatprep.subr.bf16.mxu0 %v5874_v28  ;;  %4943 = vmatprep.subr.bf16.mxu1 %v5874_v28 }
 0x298   :  { %v5949_v60 = vpop.f32.mrb[8].mxu0  ;;  %v4833_v62 = vpop.f32.mrb[24].mxu1 }
 0x299   :  { %1702 = vrot.lane.b32.xlu0 %v5949_v60, %s5605_s3  ;;  %1160 = vrot.lane.b32.xlu1 %v5949_v60, %s5606_s6  ;;  %v5955_v63 = vpop.f32.mrb[9].mxu0  ;;  %v567_v1 = vpop.f32.mrb[25].mxu1 }
 0x29a   :  { %v5957_v4 = vpop.f32.mrb[10].mxu0  ;;  %v4834_v6 = vpop.f32.mrb[26].mxu1 }
 0x29b   :  { %v5959_v7 = vpop.f32.mrb[11].mxu0  ;;  %v5961_v9 = vpop.f32.mrb[27].mxu1 }
 0x29d   :  { %2244 = vrot.lane.b32.xlu1 %v5949_v60, %s5607_s29  ;;  %674 = vperm.xlu0 %5134, %v4833_v62  }
 0x2a1   :  { %2329 = vperm.xlu1 %5137, %v4833_v62   ;;  %5135 = vset.pattern.permute.xlu0 %v8104_v10  ;;  %v5966_v11 = vpop.f32.mrb[12].mxu0  ;;  %v5968_v12 = vpop.f32.mrb[28].mxu1 }
 0x2a2   :  { %1245 = vperm.xlu0 %5135, %v4833_v62   ;;  %v5970_v17 = vpop.f32.mrb[13].mxu0  ;;  %v5972_v18 = vpop.f32.mrb[29].mxu1 }
 0x2a3   :  { %v5974_v21 = vpop.f32.mrb[14].mxu0  ;;  %v5976_v22 = vpop.f32.mrb[30].mxu1 }
 0x2a4   :  { %v5978_v23 = vpop.f32.mrb[15].mxu0  ;;  %v5980_v24 = vpop.f32.mrb[31].mxu1 }
 0x2a5   :  { %2240 = vrot.lane.b32.xlu1 %v5955_v63, %s5607_s29 }
 0x2a6   :  { %5136 = vset.pattern.permute.xlu0 %v8097_v25  ;;  %5142 = vset.pattern.permute.xlu1 %v8095_v58 }
 0x2a7   :  { %1787 = vperm.xlu0 %5136, %v4833_v62  }
 0x2a9   :  { %1162 = vrot.lane.b32.xlu1 %v5957_v4, %s5606_s6  ;;  %v5988_v26 = vpop.f32.mrb[16].mxu0  ;;  %v5990_v27 = vpop.f32.mrb[32].mxu1 }
 0x2aa   :  { %v5992_v29 = vpop.f32.mrb[17].mxu0  ;;  %v5994_v31 = vpop.f32.mrb[33].mxu1 }
 0x2ab   :  { %1156 = vrot.lane.b32.xlu0 %v5955_v63, %s5606_s6  ;;  %v5998_v32 = vpop.f32.mrb[18].mxu0  ;;  %v6000_v33 = vpop.f32.mrb[34].mxu1 }
 0x2ac   :  { %5138 = vset.pattern.permute.xlu0 %v8095_v58  ;;  %v6003_v34 = vpop.f32.mrb[19].mxu0  ;;  %v6005_v35 = vpop.f32.mrb[35].mxu1 }
 0x2ad   :  { %2246 = vrot.lane.b32.xlu1 %v5957_v4, %s5607_s29 }
 0x2af   :  { %1698 = vrot.lane.b32.xlu0 %v5955_v63, %s5605_s3 }
 0x2b1   :  { %679 = vperm.xlu1 %5142, %v4834_v6   ;;  %v6011_v38 = vpop.f32.mrb[20].mxu0  ;;  %v6013_v39 = vpop.f32.mrb[36].mxu1 }
 0x2b2   :  { %v6015_v40 = vpop.f32.mrb[21].mxu0  ;;  %v6017_v41 = vpop.f32.mrb[37].mxu1 }
 0x2b3   :  { %664 = vperm.xlu0 %5138, %v567_v1   ;;  %v6019_v42 = vpop.f32.mrb[22].mxu0  ;;  %v6021_v43 = vpop.f32.mrb[38].mxu1 }
 0x2b4   :  { %v6023_v46 = vpop.f32.mrb[23].mxu0  ;;  %v6025_v47 = vpop.f32.mrb[39].mxu1 }
 0x2b5   :  { %5143 = vset.pattern.permute.xlu1 %v8104_v10 }
 0x2b6   :  { %1249 = vperm.xlu1 %5143, %v4834_v6  }
 0x2b7   :  { %5139 = vset.pattern.permute.xlu0 %v8104_v10 }
 0x2b8   :  { %1237 = vperm.xlu0 %5139, %v567_v1  }
 0x2ba   :  { %5144 = vset.pattern.permute.xlu1 %v8097_v25 }
 0x2bb   :  { %1791 = vperm.xlu1 %5144, %v4834_v6  }
 0x2bc   :  { %5140 = vset.pattern.permute.xlu0 %v8097_v25 }
 0x2bd   :  { %1779 = vperm.xlu0 %5140, %v567_v1  }
 0x2bf   :  { %2242 = vrot.lane.b32.xlu1 %v5959_v7, %s5607_s29 }
 0x2c0   :  { %5145 = vset.pattern.permute.xlu1 %v8095_v58 }
 0x2c1   :  { %5141 = vset.pattern.permute.xlu0 %v8100_v59 }
 0x2c2   :  { %2321 = vperm.xlu0 %5141, %v567_v1  }
 0x2c3   :  { %669 = vperm.xlu1 %5145, %v5961_v9  }
 0x2c6   :  { %1704 = vrot.lane.b32.xlu0 %v5957_v4, %s5605_s3 }
 0x2c7   :  { %5146 = vset.pattern.permute.xlu1 %v8104_v10 }
 0x2c8   :  { %1241 = vperm.xlu1 %5146, %v5961_v9  }
 0x2ca   :  { %2333 = vperm.xlu0 %5141, %v4834_v6  }
 0x2cc   :  { %5147 = vset.pattern.permute.xlu1 %v8097_v25 }
 0x2cd   :  { %1783 = vperm.xlu1 %5147, %v5961_v9  }
 0x2ce   :  { %1158 = vrot.lane.b32.xlu0 %v5959_v7, %s5606_s6 }
 0x2cf   :  { %5153 = vset.pattern.permute.xlu0 %v8095_v58 }
 0x2d1   :  { %5148 = vset.pattern.permute.xlu1 %v8100_v59 }
 0x2d2   :  { %1700 = vrot.lane.b32.xlu0 %v5959_v7, %s5605_s3  ;;  %2325 = vperm.xlu1 %5148, %v5961_v9  }
 0x2d6   :  { %1168 = vrot.lane.b32.xlu0 %v5966_v11, %s5606_s6  ;;  %2252 = vrot.lane.b32.xlu1 %v5966_v11, %s5607_s29 }
 0x2d7   :  { %5149 = vset.pattern.permute.xlu1 %v8095_v58 }
 0x2da   :  { %1710 = vrot.lane.b32.xlu0 %v5966_v11, %s5605_s3  ;;  %694 = vperm.xlu1 %5149, %v5968_v12  }
 0x2de   :  { %1164 = vrot.lane.b32.xlu0 %v5970_v17, %s5606_s6  ;;  %5150 = vset.pattern.permute.xlu1 %v8104_v10 }
 0x2df   :  { %1261 = vperm.xlu1 %5150, %v5968_v12  }
 0x2e2   :  { %1706 = vrot.lane.b32.xlu0 %v5970_v17, %s5605_s3 }
 0x2e3   :  { %5151 = vset.pattern.permute.xlu1 %v8097_v25 }
 0x2e4   :  { %1803 = vperm.xlu1 %5151, %v5968_v12  }
 0x2e6   :  { %684 = vperm.xlu0 %5153, %v5972_v18  }
 0x2e8   :  { %5152 = vset.pattern.permute.xlu1 %v8100_v59 }
 0x2e9   :  { %2345 = vperm.xlu1 %5152, %v5968_v12  }
 0x2ea   :  { %5156 = vset.pattern.permute.xlu0 %v8100_v59 }
 0x2eb   :  { %2337 = vperm.xlu0 %5156, %v5972_v18  }
 0x2ed   :  { %2248 = vrot.lane.b32.xlu1 %v5970_v17, %s5607_s29 }
 0x2ee   :  { %5154 = vset.pattern.permute.xlu1 %v8104_v10 }
 0x2ef   :  { %1712 = vrot.lane.b32.xlu0 %v5974_v21, %s5605_s3 }
 0x2f0   :  { %5157 = vset.pattern.permute.xlu0 %v8095_v58 }
 0x2f1   :  { %1253 = vperm.xlu1 %5154, %v5972_v18  }
 0x2f3   :  { %699 = vperm.xlu0 %5157, %v5976_v22  }
 0x2f5   :  { %5155 = vset.pattern.permute.xlu1 %v8097_v25 }
 0x2f6   :  { %1795 = vperm.xlu1 %5155, %v5972_v18  }
 0x2f7   :  { %5160 = vset.pattern.permute.xlu0 %v8100_v59 }
 0x2f8   :  { %2349 = vperm.xlu0 %5160, %v5976_v22  }
 0x2fa   :  { %1170 = vrot.lane.b32.xlu1 %v5974_v21, %s5606_s6 }
 0x2fb   :  { %5158 = vset.pattern.permute.xlu1 %v8104_v10 }
 0x2fc   :  { %1708 = vrot.lane.b32.xlu0 %v5978_v23, %s5605_s3 }
 0x2fd   :  { %5162 = vset.pattern.permute.xlu0 %v8104_v10 }
 0x2fe   :  { %2254 = vrot.lane.b32.xlu1 %v5974_v21, %s5607_s29 }
 0x300   :  { %1257 = vperm.xlu0 %5162, %v5980_v24  }
 0x302   :  { %1265 = vperm.xlu1 %5158, %v5976_v22  }
 0x304   :  { %5163 = vset.pattern.permute.xlu0 %v8097_v25 }
 0x305   :  { %1799 = vperm.xlu0 %5163, %v5980_v24  }
 0x306   :  { %5159 = vset.pattern.permute.xlu1 %v8097_v25 }
 0x307   :  { %1807 = vperm.xlu1 %5159, %v5976_v22  }
 0x309   :  { %1176 = vrot.lane.b32.xlu0 %v5988_v26, %s5606_s6 }
 0x30a   :  { %5169 = vset.pattern.permute.xlu0 %v8095_v58 }
 0x30b   :  { %1166 = vrot.lane.b32.xlu1 %v5978_v23, %s5606_s6  ;;  %v6111_v49 = vpop.permute.xlu1 %1160  ;;  %v6114_v50 = vpop.permute.xlu0 %1702 }
 0x30c   :  { %5161 = vset.pattern.permute.xlu1 %v8095_v58  ;;  %8210 = vst [vmem:[#allocation27_spill] sm:$0xff] %v6114_v50 }
 0x30d   :  { %1718 = vrot.lane.b32.xlu0 %v5988_v26, %s5605_s3 }
 0x30f   :  { %2250 = vrot.lane.b32.xlu1 %v5978_v23, %s5607_s29  ;;  %v6118_v53 = vpop.permute.xlu1 %2244 }
 0x311   :  { %1172 = vrot.lane.b32.xlu0 %v5992_v29, %s5606_s6 }
 0x313   :  { %689 = vperm.xlu1 %5161, %v5980_v24  }
 0x315   :  { %1714 = vrot.lane.b32.xlu0 %v5992_v29, %s5605_s3 }
 0x317   :  { %5164 = vset.pattern.permute.xlu1 %v8100_v59 }
 0x318   :  { %2341 = vperm.xlu1 %5164, %v5980_v24  }
 0x319   :  { %704 = vperm.xlu0 %5169, %v5994_v31  }
 0x31c   :  { %v6120_v54 = vpop.permute.xlu0 %674  ;;  %2260 = vrot.lane.b32.xlu1 %v5988_v26, %s5607_s29 }
 0x31d   :  { %5172 = vset.pattern.permute.xlu0 %v8100_v59  ;;  %5165 = vset.pattern.permute.xlu1 %v8095_v58 }
 0x31e   :  { %2353 = vperm.xlu0 %5172, %v5994_v31  }
 0x320   :  { %v6127_v62 = vpop.permute.xlu1 %2329  ;;  %714 = vperm.xlu1 %5165, %v5990_v27  }
 0x321   :  { %8211 = vst [vmem:[#allocation28_spill] sm:$0xff] %v6127_v62  ;;  %v6130_v1 = vpop.permute.xlu0 %1245 }
 0x322   :  { %8212 = vst [vmem:[#allocation29_spill] sm:$0xff] %v6130_v1  ;;  %1720 = vrot.lane.b32.xlu0 %v5998_v32, %s5605_s3 }
 0x323   :  { %5173 = vset.pattern.permute.xlu0 %v8095_v58 }
 0x324   :  { %v6135_v6 = vpop.permute.xlu1 %2240  ;;  %5166 = vset.pattern.permute.xlu1 %v8104_v10 }
 0x325   :  { %1277 = vperm.xlu1 %5166, %v5990_v27  }
 0x326   :  { %v6139_v9 = vpop.permute.xlu0 %1787  ;;  %719 = vperm.xlu0 %5173, %v6000_v33  }
 0x327   :  { %8213 = vst [vmem:[#allocation30_spill] sm:$0xff] %v6139_v9 }
 0x328   :  { %v6142_v12 = vpop.permute.xlu1 %1162 }
 0x329   :  { %5167 = vset.pattern.permute.xlu1 %v8097_v25 }
 0x32a   :  { %v6145_v18 = vpop.permute.xlu0 %1156  ;;  %1819 = vperm.xlu1 %5167, %v5990_v27   ;;  %5176 = vset.pattern.permute.xlu0 %v8100_v59 }
 0x32b   :  { %2365 = vperm.xlu0 %5176, %v6000_v33  }
 0x32c   :  { %v6150_v22 = vpop.permute.xlu1 %2246 }
 0x32e   :  { %v6152_v24 = vpop.permute.xlu0 %1698  ;;  %5168 = vset.pattern.permute.xlu1 %v8100_v59 }
 0x32f   :  { %2361 = vperm.xlu1 %5168, %v5990_v27   ;;  %1716 = vrot.lane.b32.xlu0 %v6003_v34, %s5605_s3  ;;  %v8216_v27 = vmov 2  }
 0x330   :  { %v6158_v58 = vpop.permute.xlu1 %679  ;;  %5178 = vset.pattern.permute.xlu0 %v8104_v10 }
 0x332   :  { %v6161_v25 = vpop.permute.xlu0 %664 }
 0x333   :  { %2256 = vrot.lane.b32.xlu1 %v5992_v29, %s5607_s29  ;;  %1273 = vperm.xlu0 %5178, %v6005_v35  }
 0x334   :  { %5170 = vset.pattern.permute.xlu1 %v8104_v10  ;;  %v8219_v10 = vmov 0  }
 0x335   :  { %v6167_v20 = vpop.permute.xlu1 %1249 }
 0x336   :  { %8214 = vst [vmem:[#allocation31_spill] sm:$0xff] %v6167_v20 }
 0x337   :  { %v6169_v59 = vpop.permute.xlu0 %1237  ;;  %1269 = vperm.xlu1 %5170, %v5994_v31   ;;  %5179 = vset.pattern.permute.xlu0 %v8216_v27 }
 0x338   :  { %8215 = vst [vmem:[#allocation32_spill] sm:$0xff] %v6169_v59  ;;  %1815 = vperm.xlu0 %5179, %v6005_v35  }
 0x33a   :  { %v6174_v19 = vpop.permute.xlu1 %1791 }
 0x33b   :  { %8217 = vst [vmem:[#allocation33_spill] sm:$0xff] %v6174_v19  ;;  %5171 = vset.pattern.permute.xlu1 %v8216_v27 }
 0x33c   :  { %v6177_v16 = vpop.permute.xlu0 %1779  ;;  %1811 = vperm.xlu1 %5171, %v5994_v31   ;;  %1184 = vrot.lane.b32.xlu0 %v6011_v38, %s5606_s6 }
 0x33d   :  { %8218 = vst [vmem:[#allocation34_spill] sm:$0xff] %v6177_v16  ;;  %5185 = vset.pattern.permute.xlu0 %v8219_v10 }
 0x33e   :  { %v6183_v15 = vpop.permute.xlu1 %2242 }
 0x340   :  { %1178 = vrot.lane.b32.xlu1 %v5998_v32, %s5606_s6  ;;  %1180 = vrot.lane.b32.xlu0 %v6015_v40, %s5606_s6 }
 0x341   :  { %v6189_v14 = vpop.permute.xlu0 %2321  ;;  %5174 = vset.pattern.permute.xlu1 %v8221_v3 }
 0x342   :  { %8220 = vst [vmem:[#allocation35_spill] sm:$0xff] %v6189_v14  ;;  %v6192_v2 = vpop.permute.xlu1 %669 }
 0x344   :  { %2262 = vrot.lane.b32.xlu1 %v5998_v32, %s5607_s29  ;;  %1722 = vrot.lane.b32.xlu0 %v6015_v40, %s5605_s3 }
 0x345   :  { %v6198_v31 = vpop.permute.xlu0 %1704 }
 0x346   :  { %8222 = vst [vmem:[#allocation36_spill] sm:$0xff] %v6198_v31 }
 0x347   :  { %v6200_v13 = vpop.permute.xlu1 %1241 }
 0x348   :  { %8223 = vst [vmem:[#allocation37_spill] sm:$0xff] %v6200_v13  ;;  %1281 = vperm.xlu1 %5174, %v6000_v33   ;;  %724 = vperm.xlu0 %5185, %v6017_v41  }
 0x349   :  { %v6204_v5 = vpop.permute.xlu0 %2333 }
 0x34a   :  { %8224 = vst [vmem:[#allocation38_spill] sm:$0xff] %v6204_v5 }
 0x34c   :  { %v6206_v8 = vpop.permute.xlu1 %1783  ;;  %5175 = vset.pattern.permute.xlu1 %v8216_v27  ;;  %5188 = vset.pattern.permute.xlu0 %v8226_v0 }
 0x34d   :  { %8225 = vst [vmem:[#allocation39_spill] sm:$0xff] %v6206_v8  ;;  %v6210_v61 = vpop.permute.xlu0 %1158  ;;  %1823 = vperm.xlu1 %5175, %v6000_v33   ;;  %2369 = vperm.xlu0 %5188, %v6017_v41  }
 0x351   :  { %v6214_v48 = vpop.permute.xlu0 %1700  ;;  %v6216_v52 = vpop.permute.xlu1 %2325  ;;  %1174 = vrot.lane.b32.xlu1 %v6003_v34, %s5606_s6  ;;  %1728 = vrot.lane.b32.xlu0 %v6019_v42, %s5605_s3 }
 0x352   :  { %8227 = vst [vmem:[#allocation40_spill] sm:$0xff] %v6216_v52  ;;  %5189 = vset.pattern.permute.xlu0 %v8219_v10  ;;  %5177 = vset.pattern.permute.xlu1 %v8219_v10 }
 0x355   :  { %v6224_v51 = vpop.permute.xlu0 %1168  ;;  %v6226_v56 = vpop.permute.xlu1 %2252  ;;  %2258 = vrot.lane.b32.xlu1 %v6003_v34, %s5607_s29  ;;  %739 = vperm.xlu0 %5189, %v6021_v43  }
 0x359   :  { %v6231_v33 = vpop.permute.xlu0 %1710  ;;  %v6233_v62 = vpop.permute.xlu1 %694  ;;  %709 = vperm.xlu1 %5177, %v6005_v35   ;;  %5192 = vset.pattern.permute.xlu0 %v8226_v0 }
 0x35a   :  { %8228 = vst [vmem:[#allocation41_spill] sm:$0xff] %v6231_v33  ;;  %2381 = vperm.xlu0 %5192, %v6021_v43  }
 0x35d   :  { %v6238_v5 = vpop.permute.xlu0 %1164  ;;  %5180 = vset.pattern.permute.xlu1 %v8226_v0 }
 0x35e   :  { %v6241_v14 = vpop.permute.xlu1 %1261  ;;  %2357 = vperm.xlu1 %5180, %v6005_v35   ;;  %1724 = vrot.lane.b32.xlu0 %v6023_v46, %s5605_s3 }
 0x35f   :  { %8229 = vst [vmem:[#allocation42_spill] sm:$0xff] %v6241_v14  ;;  %5194 = vset.pattern.permute.xlu0 %v8221_v3 }
 0x361   :  { %v6247_v52 = vpop.permute.xlu0 %1706 }
 0x362   :  { %8230 = vst [vmem:[#allocation43_spill] sm:$0xff] %v6247_v52  ;;  %1726 = vrot.lane.b32.xlu1 %v6011_v38, %s5605_s3  ;;  %1289 = vperm.xlu0 %5194, %v6025_v47  }
 0x363   :  { %v6252_v9 = vpop.permute.xlu1 %1803  ;;  %5181 = vset.pattern.permute.xlu1 %v8219_v10 }
 0x364   :  { %8231 = vst [vmem:[#allocation44_spill] sm:$0xff] %v6252_v9 }
 0x365   :  { %v6255_v19 = vpop.permute.xlu0 %684 }
 0x366   :  { %2268 = vrot.lane.b32.xlu1 %v6011_v38, %s5607_s29  ;;  %5195 = vset.pattern.permute.xlu0 %v8216_v27 }
 0x367   :  { %1831 = vperm.xlu0 %5195, %v6025_v47  }
 0x368   :  { %v6261_v35 = vpop.permute.xlu1 %2345 }
 0x369   :  { %8232 = vst [vmem:[#allocation45_spill] sm:$0xff] %v6261_v35 }
 0x36a   :  { %v6263_v16 = vpop.permute.xlu0 %2337  ;;  %734 = vperm.xlu1 %5181, %v6013_v39  }
 0x36b   :  { %8233 = vst [vmem:[#allocation46_spill] sm:$0xff] %v6263_v16 }
 0x36c   :  { %v6266_v8 = vpop.permute.xlu1 %2248 }
 0x36e   :  { %v6268_v9 = vpop.permute.xlu0 %1712  ;;  %5182 = vset.pattern.permute.xlu1 %v8221_v3 }
 0x36f   :  { %8234 = vst [vmem:[#allocation47_spill] sm:$0xff] %v6268_v9  ;;  %1293 = vperm.xlu1 %5182, %v6013_v39  }
 0x370   :  { %v6272_v20 = vpop.permute.xlu1 %1253 }
 0x371   :  { %8235 = vst [vmem:[#allocation48_spill] sm:$0xff] %v6272_v20 }
 0x372   :  { %v6274_v13 = vpop.permute.xlu0 %699 }
 0x373   :  { %5183 = vset.pattern.permute.xlu1 %v8216_v27 }
 0x374   :  { %1835 = vperm.xlu1 %5183, %v6013_v39  }
 0x375   :  { %v6278_v35 = vpop.permute.xlu1 %1795 }
 0x376   :  { %8236 = vst [vmem:[#allocation49_spill] sm:$0xff] %v6278_v35 }
 0x377   :  { %v6280_v16 = vpop.permute.xlu0 %2349 }
 0x378   :  { %8237 = vst [vmem:[#allocation50_spill] sm:$0xff] %v6280_v16  ;;  %5184 = vset.pattern.permute.xlu1 %v8226_v0 }
 0x379   :  { %v6283_v14 = vpop.permute.xlu1 %1170  ;;  %2377 = vperm.xlu1 %5184, %v6013_v39  }
 0x37b   :  { %v6286_v1 = vpop.permute.xlu0 %1708 }
 0x37c   :  { %8238 = vst [vmem:[#allocation51_spill] sm:$0xff] %v6286_v1 }
 0x37d   :  { %v6288_v59 = vpop.permute.xlu1 %2254  ;;  %2264 = vrot.lane.b32.xlu1 %v6015_v40, %s5607_s29 }
 0x37e   :  { %5186 = vset.pattern.permute.xlu1 %v8221_v3 }
 0x37f   :  { %v6293_v20 = vpop.permute.xlu0 %1257 }
 0x380   :  { %8239 = vst [vmem:[#allocation52_spill] sm:$0xff] %v6293_v20 }
 0x381   :  { %v6295_v35 = vpop.permute.xlu1 %1265  ;;  %1285 = vperm.xlu1 %5186, %v6017_v41  }
 0x382   :  { %8240 = vst [vmem:[#allocation53_spill] sm:$0xff] %v6295_v35 }
 0x384   :  { %v6298_v16 = vpop.permute.xlu0 %1799 }
 0x385   :  { %8241 = vst [vmem:[#allocation54_spill] sm:$0xff] %v6298_v16  ;;  %5187 = vset.pattern.permute.xlu1 %v8216_v27  ;;  %630 = vxpose.xlu0.b32.start [1/16] (narrow) %v5955_v63, 8 }
 0x386   :  { %v6302_v39 = vpop.permute.xlu1 %1807  ;;  %1827 = vperm.xlu1 %5187, %v6017_v41  }
 0x387   :  { %8242 = vst [vmem:[#allocation55_spill] sm:$0xff] %v6302_v39 }
 0x388   :  { %v6305_v57 = vpop.permute.xlu0 %1176 }
 0x389   :  { %631 = vxpose.xlu0.b32.cont [2/16] (narrow) %v5959_v7, 8 }
 0x38a   :  { %v6308_v55 = vpop.permute.xlu1 %1166  ;;  %1186 = vrot.lane.b32.xlu1 %v6019_v42, %s5606_s6 }
 0x38b   :  { %5190 = vset.pattern.permute.xlu1 %v8221_v3 }
 0x38c   :  { %v6313_v16 = vpop.permute.xlu0 %1718 }
 0x38d   :  { %8243 = vst [vmem:[#allocation56_spill] sm:$0xff] %v6313_v16  ;;  %632 = vxpose.xlu0.b32.cont [3/16] (narrow) %v5949_v60, 8 }
 0x38e   :  { %v6316_v63 = vpop.permute.xlu1 %2250  ;;  %2270 = vrot.lane.b32.xlu1 %v6019_v42, %s5607_s29 }
 0x390   :  { %v6320_v41 = vpop.permute.xlu0 %1172 }
 0x391   :  { %633 = vxpose.xlu0.b32.cont [4/16] (narrow) %v5957_v4, 8 }
 0x392   :  { %v6323_v7 = vpop.permute.xlu1 %689  ;;  %1297 = vperm.xlu1 %5190, %v6021_v43  }
 0x394   :  { %v6326_v39 = vpop.permute.xlu0 %1714 }
 0x395   :  { %8244 = vst [vmem:[#allocation57_spill] sm:$0xff] %v6326_v39  ;;  %634 = vxpose.xlu0.b32.cont [5/16] (narrow) %v5970_v17, 8 }
 0x396   :  { %5191 = vset.pattern.permute.xlu1 %v8216_v27 }
 0x397   :  { %v6330_v3 = vpop.permute.xlu1 %2341  ;;  %1839 = vperm.xlu1 %5191, %v6021_v43  }
 0x398   :  { %8245 = vst [vmem:[#allocation58_spill] sm:$0xff] %v6330_v3  ;;  %v6333_v60 = vpop.permute.xlu0 %704 }
 0x399   :  { %635 = vxpose.xlu0.b32.cont [6/16] (narrow) %v5978_v23, 8 }
 0x39b   :  { %v6336_v35 = vpop.permute.xlu1 %2260  ;;  %1182 = vrot.lane.b32.xlu1 %v6023_v46, %s5606_s6 }
 0x39c   :  { %5193 = vset.pattern.permute.xlu1 %v8219_v10 }
 0x39d   :  { %v6341_v4 = vpop.permute.xlu0 %2353  ;;  %636 = vxpose.xlu0.b32.cont [7/16] (narrow) %v5966_v11, 8 }
 0x39e   :  { %8246 = vst [vmem:[#allocation59_spill] sm:$0xff] %v6341_v4 }
 0x39f   :  { %v6344_v17 = vpop.permute.xlu1 %714  ;;  %2266 = vrot.lane.b32.xlu1 %v6023_v46, %s5607_s29 }
 0x3a1   :  { %v6348_v43 = vpop.permute.xlu0 %1720  ;;  %637 = vxpose.xlu0.b32.cont [8/16] (narrow) %v5974_v21, 8 }
 0x3a2   :  { %8247 = vst [vmem:[#allocation60_spill] sm:$0xff] %v6348_v43 }
 0x3a3   :  { %729 = vperm.xlu1 %5193, %v6025_v47  }
 0x3a4   :  { %v6352_v23 = vpop.permute.xlu1 %1277 }
 0x3a5   :  { %8248 = vst [vmem:[#allocation61_spill] sm:$0xff] %v6352_v23  ;;  %638 = vxpose.xlu0.b32.cont [9/16] (narrow) %v5992_v29, 8  ;;  %v6355_v27 = vpop.permute.xlu0 %719 }
 0x3a7   :  { %5196 = vset.pattern.permute.xlu1 %v8226_v0 }
 0x3a8   :  { %2373 = vperm.xlu1 %5196, %v6025_v47  }
 0x3a9   :  { %v6359_v11 = vpop.permute.xlu1 %1819  ;;  %639 = vxpose.xlu0.b32.cont [10/16] (narrow) %v6003_v34, 8 }
 0x3aa   :  { %8249 = vst [vmem:[#allocation62_spill] sm:$0xff] %v6359_v11  ;;  %v6362_v10 = vpop.permute.xlu0 %2365 }
 0x3ab   :  { %8250 = vst [vmem:[#allocation63_spill] sm:$0xff] %v6362_v10 }
 0x3ad   :  { %640 = vxpose.xlu0.b32.cont [11/16] (narrow) %v5988_v26, 8 }
 0x3ae   :  { %v6365_v21 = vpop.permute.xlu1 %2361  ;;  %v6370_v29 = vpop.permute.xlu0 %1716 }
 0x3af   :  { %8251 = vst [vmem:[#allocation64_spill] sm:$0xff] %v6365_v21  ;;  %8252 = vst [vmem:[#allocation65_spill] sm:$0xff] %v6370_v29 }
 0x3b1   :  { %641 = vxpose.xlu0.b32.cont [12/16] (narrow) %v5998_v32, 8 }
 0x3b2   :  { %v6368_v4 = vpop.permute.xlu1 %2256  ;;  %v6375_v47 = vpop.permute.xlu0 %1273 }
 0x3b3   :  { %8254 = vst [vmem:[#allocation67_spill] sm:$0xff] %v6375_v47 }
 0x3b5   :  { %642 = vxpose.xlu0.b32.cont [13/16] (narrow) %v6015_v40, 8 }
 0x3b6   :  { %v6373_v0 = vpop.permute.xlu1 %1269 }
 0x3b7   :  { %8253 = vst [vmem:[#allocation66_spill] sm:$0xff] %v6373_v0  ;;  %v6381_v26 = vpop.permute.xlu0 %1815 }
 0x3b8   :  { %8256 = vst [vmem:[#allocation69_spill] sm:$0xff] %v6381_v26 }
 0x3b9   :  { %643 = vxpose.xlu0.b32.cont [14/16] (narrow) %v6023_v46, 8 }
 0x3bb   :  { %v6378_v34 = vpop.permute.xlu1 %1811  ;;  %v6388_v10 = vpop.permute.xlu0 %1184 }
 0x3bc   :  { %8255 = vst [vmem:[#allocation68_spill] sm:$0xff] %v6378_v34 }
 0x3bd   :  { %644 = vxpose.xlu0.b32.cont [15/16] (narrow) %v6011_v38, 8 }
 0x3bf   :  { %v6383_v21 = vpop.permute.xlu1 %1178  ;;  %v6392_v11 = vpop.permute.xlu0 %1180 }
 0x3c1   :  { %645 = vxpose.xlu0.b32.end [16/16] (narrow) %v6019_v42, 8 }
 0x3c3   :  { %v6386_v32 = vpop.permute.xlu1 %2262  ;;  %v6398_v34 = vpop.permute.xlu0 %1722 }
 0x3c4   :  { %8259 = vst [vmem:[#allocation72_spill] sm:$0xff] %v6398_v34 }
 0x3c7   :  { %v6390_v40 = vpop.permute.xlu1 %1281  ;;  %v6402_v26 = vpop.permute.xlu0 %724 }
 0x3c8   :  { %8257 = vst [vmem:[#allocation70_spill] sm:$0xff] %v6390_v40 }
 0x3cc   :  { %v6394_v3 = vpop.permute.xlu1 %1823  ;;  %v6406_v42 = vpop.permute.xlu0 %2369 }
 0x3cd   :  { %8258 = vst [vmem:[#allocation71_spill] sm:$0xff] %v6394_v3  ;;  %8260 = vst [vmem:[#allocation73_spill] sm:$0xff] %v6406_v42 }
 0x3d0   :  { %v6396_v46 = vpop.permute.xlu1 %1174  ;;  %v6412_v40 = vpop.permute.xlu0 %1728 }
 0x3d1   :  { %8263 = vst [vmem:[#allocation76_spill] sm:$0xff] %v6412_v40 }
 0x3d4   :  { %v6400_v38 = vpop.permute.xlu1 %2258  ;;  %v6416_v3 = vpop.permute.xlu0 %739 }
 0x3d8   :  { %v6404_v47 = vpop.permute.xlu1 %709 }
 0x3d9   :  { %v6422_v16 = vpop.permute.xlu0 %2381 }
 0x3da   :  { %8265 = vst [vmem:[#allocation78_spill] sm:$0xff] %v6422_v16 }
 0x3dd   :  { %v6408_v20 = vpop.permute.xlu1 %2357  ;;  %v6426_v29 = vpop.permute.xlu0 %1724 }
 0x3de   :  { %8261 = vst [vmem:[#allocation74_spill] sm:$0xff] %v6408_v20  ;;  %8267 = vst [vmem:[#allocation80_spill] sm:$0xff] %v6426_v29  ;;  %v742_v20 = vlaneseq }
 0x3e0   :  { %v743_v44 = vshrl.u32 %v742_v20, 7 }
 0x3e1   :  { %v6410_v23 = vpop.permute.xlu1 %1726 }
 0x3e2   :  { %8262 = vst [vmem:[#allocation75_spill] sm:$0xff] %v6410_v23  ;;  %v6430_v23 = vpop.permute.xlu0 %1289  ;;  %v6438_v9 = vsub.s32 0, %v743_v44 }
 0x3e3   :  { %8269 = vst [vmem:[#allocation82_spill] sm:$0xff] %v6430_v23 }
 0x3e4   :  { %8272 = vst [vmem:[#allocation85_spill] sm:$0xff] %v6438_v9 }
 0x3e5   :  { %v6414_v0 = vpop.permute.xlu1 %2268 }
 0x3e6   :  { %v6436_v37 = vpop.permute.xlu0 %1831 }
 0x3e7   :  { %8271 = vst [vmem:[#allocation84_spill] sm:$0xff] %v6436_v37 }
 0x3e9   :  { %v6418_v43 = vpop.permute.xlu1 %734 }
 0x3ee   :  { %v6420_v34 = vpop.permute.xlu1 %1293 }
 0x3ef   :  { %8264 = vst [vmem:[#allocation77_spill] sm:$0xff] %v6420_v34 }
 0x3f3   :  { %v6424_v45 = vpop.permute.xlu1 %1835 }
 0x3f4   :  { %8266 = vst [vmem:[#allocation79_spill] sm:$0xff] %v6424_v45 }
 0x3f8   :  { %v6428_v42 = vpop.permute.xlu1 %2377 }
 0x3f9   :  { %8268 = vst [vmem:[#allocation81_spill] sm:$0xff] %v6428_v42 }
 0x3fc   :  { %v6432_v40 = vpop.permute.xlu1 %2264 }
 0x400   :  { %v6434_v39 = vpop.permute.xlu1 %1285 }
 0x401   :  { %8270 = vst [vmem:[#allocation83_spill] sm:$0xff] %v6434_v39 }
 0x405   :  { %v6440_v34 = vpop.permute.xlu1 %1827  ;;  %v646_v16 = vpop.trf.xlu0 }
 0x406   :  { %8273 = vst [vmem:[#allocation86_spill] sm:$0xff] %v6440_v34  ;;  %v6443_v45 = vrot.slane %v646_v16, %v6438_v9 }
 0x408   :  { %v746_v42 = vadd.f32 %v6443_v45, %v6161_v25  ;;  %v747_v23 = vadd.f32 %v6443_v45, %v6192_v2  ;;  %v748_v20 = vadd.f32 %v6443_v45, %v6120_v54  ;;  %v749_v37 = vadd.f32 %v6443_v45, %v6158_v58  ;;  %v6462_v2 = vld [vmem:[%s8075_s1] sm:$0xff]  ;;  %v6467_v58 = vld [vmem:[%s8075_s1 + $0x8] sm:$0xff] }
 0x409   :  { %v6453_v44 = vpop.permute.xlu1 %1186  ;;  %v752_v34 = vadd.f32 %v6443_v45, %v6233_v62  ;;  %v753_v16 = vadd.f32 %v6443_v45, %v6274_v13  ;;  %8274 = vst [vmem:[#allocation87_spill] sm:$0xff] %v6467_v58  ;;  %v750_v30 = vadd.f32 %v6443_v45, %v6255_v19  ;;  %v751_v28 = vadd.f32 %v6443_v45, %v6323_v7  ;;  %v6489_v19 = vld [vmem:[%s8075_s1 + $0x18] sm:$0xff] }
 0x40a   :  { %v762_v39 = vmul.f32 0.2, %v746_v42  ;;  %v763_v9 = vmul.f32 0.2, %v747_v23  ;;  %v764_v25 = vmul.f32 0.2, %v748_v20 }
 0x40b   :  { %v765_v54 = vmul.f32 0.2, %v749_v37  ;;  %v768_v33 = vmul.f32 0.2, %v752_v34  ;;  %v769_v13 = vmul.f32 0.2, %v753_v16 }
 0x40c   :  { %v778_v29 = vmax.f32 %v746_v42, %v762_v39  ;;  %v779_v36 = vmax.f32 %v747_v23, %v763_v9  ;;  %v780_v31 = vmax.f32 %v748_v20, %v764_v25  ;;  %v6484_v9 = vld [vmem:[%s8075_s1 + $0x10] sm:$0xff]  ;;  %8276 = vst [vmem:[#allocation89_spill] sm:$0xff] %v6489_v19  ;;  %v766_v23 = vmul.f32 0.2, %v750_v30  ;;  %v6509_v25 = vld [vmem:[%s8075_s1 + $0x38] sm:$0xff] }
 0x40d   :  { %v6469_v62 = vpop.permute.xlu1 %2270  ;;  %v781_v50 = vmax.f32 %v749_v37, %v765_v54  ;;  %8275 = vst [vmem:[#allocation88_spill] sm:$0xff] %v6484_v9  ;;  %v785_v7 = vmax.f32 %v753_v16, %v769_v13  ;;  %v767_v37 = vmul.f32 0.2, %v751_v28  ;;  %v6504_v20 = vld [vmem:[%s8075_s1 + $0x30] sm:$0xff]  ;;  %8279 = vst [vmem:[#allocation92_spill] sm:$0xff] %v6509_v25 }
 0x40e   :  { %v6476_v1 = vadd.f32 %v778_v29, %v6462_v2  ;;  %v6479_v52 = vadd.f32 %v779_v36, %v6467_v58  ;;  %v784_v36 = vmax.f32 %v752_v34, %v768_v33  ;;  %v6496_v29 = vadd.f32 %v780_v31, %v6484_v9  ;;  %8278 = vst [vmem:[#allocation91_spill] sm:$0xff] %v6504_v20  ;;  %v6581_v9 = vld [vmem:[%s8075_s1 + $0x48] sm:$0xff] }
 0x40f   :  { %v6499_v42 = vadd.f32 %v781_v50, %v6489_v19  ;;  %v756_v33 = vadd.f32 %v6443_v45, %v6344_v17  ;;  %v757_v31 = vadd.f32 %v6443_v45, %v6355_v27  ;;  %v6521_v34 = vadd.f32 %v785_v7, %v6509_v25  ;;  %v6528_v17 = vld [vmem:[%s8075_s1 + $0x20] sm:$0xff]  ;;  %v6533_v27 = vld [vmem:[%s8075_s1 + $0x28] sm:$0xff] }
 0x410   :  { %810 = vmax.xlane.f32.xlu0 %v6476_v1  ;;  %812 = vmax.xlane.f32.xlu1 %v6479_v52  ;;  %v6518_v50 = vadd.f32 %v784_v36, %v6504_v20  ;;  %v782_v16 = vmax.f32 %v750_v30, %v766_v23  ;;  %v783_v54 = vmax.f32 %v751_v28, %v767_v37 }
 0x411   :  { %v6493_v39 = vpop.permute.xlu1 %1297  ;;  %8281 = vst [vmem:[#allocation94_spill] sm:$0xff] %v6528_v17  ;;  %8282 = vst [vmem:[#allocation95_spill] sm:$0xff] %v6533_v27  ;;  %v773_v36 = vmul.f32 0.2, %v757_v31  ;;  %v754_v7 = vadd.f32 %v6443_v45, %v6333_v60  ;;  %v755_v28 = vadd.f32 %v6443_v45, %v6404_v47  ;;  %v760_v37 = vadd.f32 %v6443_v45, %v6418_v43 }
 0x412   :  { %8277 = vst [vmem:[#allocation90_spill] sm:$0xff] %v6493_v39  ;;  %v772_v39 = vmul.f32 0.2, %v756_v33  ;;  %v6542_v30 = vadd.f32 %v782_v16, %v6528_v17  ;;  %v6545_v23 = vadd.f32 %v783_v54, %v6533_v27  ;;  %v6556_v16 = vld [vmem:[%s8075_s1 + $0x50] sm:$0xff]  ;;  %v6561_v54 = vld [vmem:[%s8075_s1 + $0x58] sm:$0xff]  ;;  %v6576_v17 = vld [vmem:[%s8075_s1 + $0x40] sm:$0xff] }
 0x413   :  { %v789_v47 = vmax.f32 %v757_v31, %v773_v36  ;;  %v770_v19 = vmul.f32 0.2, %v754_v7  ;;  %v771_v58 = vmul.f32 0.2, %v755_v28  ;;  %8283 = vst [vmem:[#allocation96_spill] sm:$0xff] %v6556_v16  ;;  %8284 = vst [vmem:[#allocation97_spill] sm:$0xff] %v6561_v54 }
 0x414   :  { %814 = vmax.xlane.f32.xlu0 %v6496_v29  ;;  %816 = vmax.xlane.f32.xlu1 %v6499_v42  ;;  %v788_v25 = vmax.f32 %v756_v33, %v772_v39  ;;  %v758_v39 = vadd.f32 %v6443_v45, %v6402_v26 }
 0x415   :  { %v6571_v36 = vadd.f32 %v789_v47, %v6561_v54  ;;  %v786_v27 = vmax.f32 %v754_v7, %v770_v19  ;;  %v787_v20 = vmax.f32 %v755_v28, %v771_v58  ;;  %v6595_v54 = vld [vmem:[%s8075_s1 + $0x70] sm:$0xff] }
 0x416   :  { %v6523_v13 = vpop.permute.xlu1 %1839  ;;  %v6568_v31 = vadd.f32 %v788_v25, %v6556_v16  ;;  %v774_v26 = vmul.f32 0.2, %v758_v39  ;;  %v6600_v16 = vld [vmem:[%s8075_s1 + $0x78] sm:$0xff] }
 0x417   :  { %8280 = vst [vmem:[#allocation93_spill] sm:$0xff] %v6523_v13  ;;  %v761_v13 = vadd.f32 %v6443_v45, %v6416_v3  ;;  %v776_v3 = vmul.f32 0.2, %v760_v37  ;;  %v6586_v47 = vadd.f32 %v786_v27, %v6576_v17  ;;  %v6589_v58 = vadd.f32 %v787_v20, %v6581_v9 }
 0x418   :  { %822 = vmax.xlane.f32.xlu0 %v6518_v50  ;;  %824 = vmax.xlane.f32.xlu1 %v6521_v34 }
 0x419   :  { %v777_v43 = vmul.f32 0.2, %v761_v13  ;;  %v792_v19 = vmax.f32 %v760_v37, %v776_v3  ;;  %v6613_v37 = vld [vmem:[%s8075_s1 + $0x68] sm:$0xff] }
 0x41a   :  { %v6551_v60 = vpop.permute.xlu1 %1182 }
 0x41b   :  { %v793_v7 = vmax.f32 %v761_v13, %v777_v43  ;;  %v6605_v27 = vadd.f32 %v792_v19, %v6595_v54  ;;  %v790_v13 = vmax.f32 %v758_v39, %v774_v26  ;;  %v6618_v43 = vld [vmem:[%s8075_s1 + $0x60] sm:$0xff] }
 0x41c   :  { %818 = vmax.xlane.f32.xlu0 %v6542_v30  ;;  %820 = vmax.xlane.f32.xlu1 %v6545_v23 }
 0x41d   :  { %v6626_v39 = vadd.f32 %v790_v13, %v6618_v43 }
 0x41e   :  { %v2267_v33 = vpop.permute.xlu1 %2266 }
 0x420   :  { %830 = vmax.xlane.f32.xlu0 %v6568_v31  ;;  %832 = vmax.xlane.f32.xlu1 %v6571_v36 }
 0x422   :  { %v730_v25 = vpop.permute.xlu1 %729 }
 0x423   :  { %v759_v28 = vadd.f32 %v6443_v45, %v730_v25  ;;  %v6608_v45 = vadd.f32 %v793_v7, %v6600_v16  ;;  %v8288_v7 = vld [vmem:[#allocation51_spill] sm:$0xff] }
 0x424   :  { %826 = vmax.xlane.f32.xlu0 %v6586_v47  ;;  %828 = vmax.xlane.f32.xlu1 %v6589_v58 }
 0x425   :  { %v775_v20 = vmul.f32 0.2, %v759_v28 }
 0x427   :  { %v791_v3 = vmax.f32 %v759_v28, %v775_v20  ;;  %v8289_v28 = vld [vmem:[#allocation19_spill] sm:$0xff] }
 0x428   :  { %838 = vmax.xlane.f32.xlu0 %v6605_v27  ;;  %840 = vmax.xlane.f32.xlu1 %v6608_v45 }
 0x429   :  { %v6623_v25 = vadd.f32 %v791_v3, %v6613_v37 }
 0x42c   :  { %834 = vmax.xlane.f32.xlu0 %v6626_v39  ;;  %836 = vmax.xlane.f32.xlu1 %v6623_v25 }
 0x459   :  { %2288 = vxpose.xlu0.b32.start [1/16] (narrow) %v6135_v6, 8 }
 0x45d   :  { %2289 = vxpose.xlu0.b32.cont [2/16] (narrow) %v6183_v15, 8 }
 0x45f   :  { %1204 = vxpose.xlu1.b32.start [1/16] (narrow) %v6145_v18, 8  ;;  %v8285_v18 = vld [vmem:[#allocation27_spill] sm:$0xff] }
 0x461   :  { %2290 = vxpose.xlu0.b32.cont [3/16] (narrow) %v6118_v53, 8 }
 0x463   :  { %1205 = vxpose.xlu1.b32.cont [2/16] (narrow) %v6210_v61, 8 }
 0x465   :  { %2291 = vxpose.xlu0.b32.cont [4/16] (narrow) %v6150_v22, 8 }
 0x467   :  { %1206 = vxpose.xlu1.b32.cont [3/16] (narrow) %v6111_v49, 8 }
 0x469   :  { %2292 = vxpose.xlu0.b32.cont [5/16] (narrow) %v6266_v8, 8 }
 0x46b   :  { %1207 = vxpose.xlu1.b32.cont [4/16] (narrow) %v6142_v12, 8 }
 0x46d   :  { %2293 = vxpose.xlu0.b32.cont [6/16] (narrow) %v6316_v63, 8 }
 0x46f   :  { %1208 = vxpose.xlu1.b32.cont [5/16] (narrow) %v6238_v5, 8 }
 0x471   :  { %2294 = vxpose.xlu0.b32.cont [7/16] (narrow) %v6226_v56, 8 }
 0x473   :  { %1209 = vxpose.xlu1.b32.cont [6/16] (narrow) %v6308_v55, 8 }
 0x475   :  { %2295 = vxpose.xlu0.b32.cont [8/16] (narrow) %v6288_v59, 8 }
 0x477   :  { %1210 = vxpose.xlu1.b32.cont [7/16] (narrow) %v6224_v51, 8  ;;  %v6660_v51 = vpop.permute.xlu1 %2373 }
 0x479   :  { %2296 = vxpose.xlu0.b32.cont [9/16] (narrow) %v6368_v4, 8  ;;  %v8286_v4 = vld [vmem:[#allocation36_spill] sm:$0xff] }
 0x47b   :  { %1211 = vxpose.xlu1.b32.cont [8/16] (narrow) %v6283_v14, 8 }
 0x47d   :  { %2297 = vxpose.xlu0.b32.cont [10/16] (narrow) %v6400_v38, 8 }
 0x47f   :  { %1212 = vxpose.xlu1.b32.cont [9/16] (narrow) %v6320_v41, 8 }
 0x481   :  { %2298 = vxpose.xlu0.b32.cont [11/16] (narrow) %v6336_v35, 8 }
 0x483   :  { %1213 = vxpose.xlu1.b32.cont [10/16] (narrow) %v6396_v46, 8 }
 0x485   :  { %2299 = vxpose.xlu0.b32.cont [12/16] (narrow) %v6386_v32, 8 }
 0x487   :  { %1214 = vxpose.xlu1.b32.cont [11/16] (narrow) %v6305_v57, 8 }
 0x489   :  { %2300 = vxpose.xlu0.b32.cont [13/16] (narrow) %v6432_v40, 8 }
 0x48b   :  { %1215 = vxpose.xlu1.b32.cont [12/16] (narrow) %v6383_v21, 8 }
 0x48d   :  { %2301 = vxpose.xlu0.b32.cont [14/16] (narrow) %v2267_v33, 8 }
 0x48f   :  { %1216 = vxpose.xlu1.b32.cont [13/16] (narrow) %v6392_v11, 8 }
 0x491   :  { %2302 = vxpose.xlu0.b32.cont [15/16] (narrow) %v6414_v0, 8 }
 0x493   :  { %1217 = vxpose.xlu1.b32.cont [14/16] (narrow) %v6551_v60, 8 }
 0x495   :  { %2303 = vxpose.xlu0.b32.end [16/16] (narrow) %v6469_v62, 8 }
 0x497   :  { %1218 = vxpose.xlu1.b32.cont [15/16] (narrow) %v6388_v10, 8 }
 0x49b   :  { %1219 = vxpose.xlu1.b32.end [16/16] (narrow) %v6453_v44, 8 }
 0x49d   :  { %v811_v56 = vpop.xlane.xlu0 %810  ;;  %v813_v61 = vpop.xlane.xlu1 %812 }
 0x49e   :  { %v842_v5 = vsub.f32 %v6476_v1, %v811_v56  ;;  %v843_v8 = vsub.f32 %v6479_v52, %v813_v61  ;;  %v8290_v56 = vld [vmem:[#allocation20_spill] sm:$0xff] }
 0x49f   :  { %1746 = vxpose.xlu1.b32.start [1/16] (narrow) %v6152_v24, 8 }
 0x4a0   :  { %v858_v14 = vmul.f32 1.442695, %v842_v5  ;;  %v860_v15 = vmul.f32 1.442695, %v843_v8  ;;  %v8291_v5 = vld [vmem:[#allocation41_spill] sm:$0xff] }
 0x4a1   :  { %v815_v55 = vpop.xlane.xlu0 %814  ;;  %v817_v57 = vpop.xlane.xlu1 %816 }
 0x4a2   :  { %5203 = vpow2.f32 %v858_v14  ;;  %v844_v59 = vsub.f32 %v6496_v29, %v815_v55  ;;  %v845_v10 = vsub.f32 %v6499_v42, %v817_v57  ;;  %v8287_v29 = vld [vmem:[#allocation43_spill] sm:$0xff] }
 0x4a3   :  { %5205 = vpow2.f32 %v860_v15  ;;  %1747 = vxpose.xlu1.b32.cont [2/16] (narrow) %v6214_v48, 8 }
 0x4a4   :  { %v862_v49 = vmul.f32 1.442695, %v844_v59  ;;  %v864_v53 = vmul.f32 1.442695, %v845_v10  ;;  %v8292_v10 = vld [vmem:[#allocation21_spill] sm:$0xff] }
 0x4a5   :  { %v823_v6 = vpop.xlane.xlu0 %822  ;;  %v825_v1 = vpop.xlane.xlu1 %824 }
 0x4a6   :  { %5207 = vpow2.f32 %v862_v49  ;;  %v848_v52 = vsub.f32 %v6518_v50, %v823_v6  ;;  %v849_v12 = vsub.f32 %v6521_v34, %v825_v1 }
 0x4a7   :  { %5209 = vpow2.f32 %v864_v53  ;;  %1748 = vxpose.xlu1.b32.cont [3/16] (narrow) %v8285_v18, 8  ;;  %v8294_v18 = vld [vmem:[#allocation22_spill] sm:$0xff] }
 0x4a8   :  { %v870_v22 = vmul.f32 1.442695, %v848_v52  ;;  %v872_v24 = vmul.f32 1.442695, %v849_v12 }
 0x4a9   :  { %v819_v35 = vpop.xlane.xlu0 %818  ;;  %v821_v63 = vpop.xlane.xlu1 %820 }
 0x4aa   :  { %v846_v41 = vsub.f32 %v6542_v30, %v819_v35  ;;  %v847_v48 = vsub.f32 %v6545_v23, %v821_v63  ;;  %5211 = vpow2.f32 %v870_v22  ;;  %v8296_v35 = vld [vmem:[#allocation23_spill] sm:$0xff] }
 0x4ab   :  { %1749 = vxpose.xlu1.b32.cont [4/16] (narrow) %v8286_v4, 8  ;;  %5213 = vpow2.f32 %v872_v24 }
 0x4ac   :  { %v5204_v11 = vpop.eup %5203  ;;  %v866_v21 = vmul.f32 1.442695, %v846_v41  ;;  %v868_v0 = vmul.f32 1.442695, %v847_v48  ;;  %v8297_v41 = vld [vmem:[#allocation65_spill] sm:$0xff] }
 0x4ad   :  { %v5206_v32 = vpop.eup %5205  ;;  %v831_v40 = vpop.xlane.xlu0 %830 }
 0x4ae   :  { %v833_v46 = vpop.xlane.xlu1 %832  ;;  %5215 = vpow2.f32 %v866_v21  ;;  %v852_v38 = vsub.f32 %v6568_v31, %v831_v40  ;;  %v890_v62 = vpack.c.bf16 %v5206_v32, %v5204_v11  ;;  %v8298_v11 = vld [vmem:[#allocation24_spill] sm:$0xff] }
 0x4af   :  { %v853_v44 = vsub.f32 %v6571_v36, %v833_v46  ;;  %5217 = vpow2.f32 %v868_v0  ;;  %1750 = vxpose.xlu1.b32.cont [5/16] (narrow) %v8287_v29, 8  ;;  %v8299_v0 = vld [vmem:[#allocation56_spill] sm:$0xff]  ;;  %v8300_v46 = vld [vmem:[#allocation25_spill] sm:$0xff]  ;;  %v8302_v29 = vld [vmem:[#allocation26_spill] sm:$0xff] }
 0x4b0   :  { %v5208_v42 = vpop.eup %5207  ;;  %v878_v50 = vmul.f32 1.442695, %v852_v38  ;;  %4863 = vmatprep.mubr.bf16.mxu0 %v890_v62 }
 0x4b1   :  { %v5210_v34 = vpop.eup %5209  ;;  %v880_v30 = vmul.f32 1.442695, %v853_v44  ;;  %v827_v23 = vpop.xlane.xlu0 %826  ;;  %v8301_v44 = vld [vmem:[#allocation60_spill] sm:$0xff] }
 0x4b2   :  { %v829_v60 = vpop.xlane.xlu1 %828  ;;  %v850_v33 = vsub.f32 %v6586_v47, %v827_v23  ;;  %v891_v19 = vpack.c.bf16 %v5210_v34, %v5208_v42  ;;  %5219 = vpow2.f32 %v878_v50  ;;  %v8303_v42 = vld [vmem:[#allocation72_spill] sm:$0xff]  ;;  %v8305_v34 = vld [vmem:[#allocation75_spill] sm:$0xff] }
 0x4b3   :  { %v851_v26 = vsub.f32 %v6589_v58, %v829_v60  ;;  %1751 = vxpose.xlu1.b32.cont [6/16] (narrow) %v8288_v7, 8  ;;  %5221 = vpow2.f32 %v880_v30  ;;  %v8304_v50 = vld [vmem:[#allocation80_spill] sm:$0xff]  ;;  %v8307_v60 = vld [vmem:[#allocation85_spill] sm:$0xff] }
 0x4b4   :  { %v874_v31 = vmul.f32 1.442695, %v850_v33  ;;  %4864 = vmatmul.mubr.bf16.vlgmr.msra.gmra.mrb[24].mxu0 %v891_v19  ;;  %v5212_v3 = vpop.eup %5211  ;;  %v8306_v30 = vld [vmem:[#allocation76_spill] sm:$0xff]  ;;  %v8309_v7 = vld [vmem:[#allocation29_spill] sm:$0xff] }
 0x4b5   :  { %v876_v36 = vmul.f32 1.442695, %v851_v26  ;;  %4912 = vmatpush3.bf16.msra.mxu0 %v8289_v28  ;;  %v839_v20 = vpop.xlane.xlu0 %838  ;;  %v5214_v61 = vpop.eup %5213  ;;  %v8308_v26 = vld [vmem:[#allocation32_spill] sm:$0xff] }
 0x4b6   :  { %v841_v13 = vpop.xlane.xlu1 %840  ;;  %5223 = vpow2.f32 %v874_v31  ;;  %4913 = vmatprep.subr.bf16.mxu0 %v8290_v56  ;;  %v856_v47 = vsub.f32 %v6605_v27, %v839_v20  ;;  %v893_v52 = vpack.c.bf16 %v5214_v61, %v5212_v3 }
 0x4b7   :  { %v857_v58 = vsub.f32 %v6608_v45, %v841_v13  ;;  %5225 = vpow2.f32 %v876_v36  ;;  %1752 = vxpose.xlu1.b32.cont [7/16] (narrow) %v8291_v5, 8  ;;  %v8293_v45 = vld [vmem:[#allocation47_spill] sm:$0xff]  ;;  %v8310_v13 = vld [vmem:[#allocation48_spill] sm:$0xff] }
 0x4b8   :  { %v5216_v8 = vpop.eup %5215  ;;  %v886_v14 = vmul.f32 1.442695, %v856_v47 }
 0x4b9   :  { %v5218_v15 = vpop.eup %5217  ;;  %v888_v55 = vmul.f32 1.442695, %v857_v58  ;;  %4914 = vmatpush3.bf16.msra.mxu0 %v8290_v56  ;;  %v835_v57 = vpop.xlane.xlu0 %834 }
 0x4ba   :  { %v837_v59 = vpop.xlane.xlu1 %836  ;;  %4915 = vmatprep.subr.bf16.mxu0 %v8292_v10  ;;  %v854_v49 = vsub.f32 %v6626_v39, %v835_v57  ;;  %v892_v53 = vpack.c.bf16 %v5218_v15, %v5216_v8  ;;  %5227 = vpow2.f32 %v886_v14  ;;  %v8295_v39 = vld [vmem:[#allocation57_spill] sm:$0xff]  ;;  %v8311_v8 = vld [vmem:[#allocation42_spill] sm:$0xff]  ;;  %v8312_v15 = vld [vmem:[#allocation88_spill] sm:$0xff] }
 0x4bb   :  { %v855_v27 = vsub.f32 %v6623_v25, %v837_v59  ;;  %1753 = vxpose.xlu1.b32.cont [8/16] (narrow) %v8293_v45, 8  ;;  %5229 = vpow2.f32 %v888_v55 }
 0x4bc   :  { %v882_v6 = vmul.f32 1.442695, %v854_v49  ;;  %4867 = vmatprep.mubr.bf16.mxu0 %v892_v53  ;;  %v5220_v12 = vpop.eup %5219  ;;  %v8313_v49 = vld [vmem:[#allocation66_spill] sm:$0xff] }
 0x4bd   :  { %v884_v1 = vmul.f32 1.442695, %v855_v27  ;;  %4916 = vmatpush3.bf16.msra.mxu0 %v8292_v10  ;;  %v5222_v22 = vpop.eup %5221  ;;  %v8314_v53 = vld [vmem:[#allocation94_spill] sm:$0xff] }
 0x4be   :  { %5231 = vpow2.f32 %v882_v6  ;;  %4868 = vmatmul.mubr.bf16.gmra.mrb[28].mxu0 %v893_v52  ;;  %4917 = vmatprep.subr.bf16.mxu0 %v8294_v18  ;;  %v895_v48 = vpack.c.bf16 %v5222_v22, %v5220_v12  ;;  %v8315_v52 = vld [vmem:[#allocation61_spill] sm:$0xff] }
 0x4bf   :  { %5233 = vpow2.f32 %v884_v1  ;;  %1754 = vxpose.xlu1.b32.cont [9/16] (narrow) %v8295_v39, 8  ;;  %v8316_v22 = vld [vmem:[#allocation37_spill] sm:$0xff] }
 0x4c0   :  { %v5224_v25 = vpop.eup %5223 }
 0x4c1   :  { %v5226_v24 = vpop.eup %5225  ;;  %4918 = vmatpush3.bf16.msra.mxu0 %v8294_v18 }
 0x4c2   :  { %4919 = vmatprep.subr.bf16.mxu0 %v8296_v35  ;;  %v894_v63 = vpack.c.bf16 %v5226_v24, %v5224_v25  ;;  %v8317_v25 = vld [vmem:[#allocation83_spill] sm:$0xff] }
 0x4c3   :  { %1755 = vxpose.xlu1.b32.cont [10/16] (narrow) %v8297_v41, 8 }
 0x4c4   :  { %4871 = vmatprep.mubr.bf16.mxu0 %v894_v63  ;;  %v5228_v4 = vpop.eup %5227  ;;  %v8318_v63 = vld [vmem:[#allocation91_spill] sm:$0xff] }
 0x4c5   :  { %4920 = vmatpush3.bf16.msra.mxu0 %v8296_v35  ;;  %v5230_v21 = vpop.eup %5229 }
 0x4c6   :  { %4872 = vmatmul.mubr.bf16.gmra.mrb[32].mxu0 %v895_v48  ;;  %4921 = vmatprep.subr.bf16.mxu0 %v8298_v11  ;;  %v897_v62 = vpack.c.bf16 %v5230_v21, %v5228_v4 }
 0x4c7   :  { %1756 = vxpose.xlu1.b32.cont [11/16] (narrow) %v8299_v0, 8 }
 0x4c8   :  { %v5232_v32 = vpop.eup %5231 }
 0x4c9   :  { %v5234_v40 = vpop.eup %5233  ;;  %4922 = vmatpush3.bf16.msra.mxu0 %v8298_v11 }
 0x4ca   :  { %4923 = vmatprep.subr.bf16.mxu0 %v8300_v46  ;;  %v896_v38 = vpack.c.bf16 %v5234_v40, %v5232_v32 }
 0x4cb   :  { %1757 = vxpose.xlu1.b32.cont [12/16] (narrow) %v8301_v44, 8 }
 0x4cc   :  { %4875 = vmatprep.mubr.bf16.mxu0 %v896_v38  ;;  %v8319_v38 = vld [vmem:[#allocation31_spill] sm:$0xff] }
 0x4cd   :  { %4924 = vmatpush3.bf16.msra.mxu0 %v8300_v46  ;;  %v8342_v46 = vld [vmem:[#allocation49_spill] sm:$0xff] }
 0x4ce   :  { %4876 = vmatmul.mubr.bf16.gmra.mrb[36].mxu0 %v897_v62  ;;  %4925 = vmatprep.subr.bf16.mxu0 %v8302_v29  ;;  %v8320_v62 = vld [vmem:[#allocation77_spill] sm:$0xff] }
 0x4cf   :  { %1758 = vxpose.xlu1.b32.cont [13/16] (narrow) %v8303_v42, 8 }
 0x4d1   :  { %4926 = vmatpush3.bf16.msra.mxu0 %v8302_v29 }
 0x4d3   :  { %1759 = vxpose.xlu1.b32.cont [14/16] (narrow) %v8304_v50, 8 }
 0x4d7   :  { %1760 = vxpose.xlu1.b32.cont [15/16] (narrow) %v8305_v34, 8 }
 0x4db   :  { %1761 = vxpose.xlu1.b32.end [16/16] (narrow) %v8306_v30, 8  ;;  %v8321_v30 = vld [vmem:[#allocation96_spill] sm:$0xff] }
 0x4df   :  { %v1220_v23 = vpop.trf.xlu1 }
 0x4e0   :  { %v6711_v33 = vrot.slane %v1220_v23, %v8307_v60 }
 0x4e2   :  { %v1304_v19 = vadd.f32 %v6711_v33, %v8308_v26  ;;  %v1306_v31 = vadd.f32 %v6711_v33, %v8309_v7  ;;  %v1308_v3 = vadd.f32 %v6711_v33, %v8310_v13  ;;  %v1310_v14 = vadd.f32 %v6711_v33, %v8311_v8  ;;  %v8322_v7 = vld [vmem:[#allocation52_spill] sm:$0xff] }
 0x4e3   :  { %v1312_v27 = vadd.f32 %v6711_v33, %v8313_v49  ;;  %v1314_v12 = vadd.f32 %v6711_v33, %v8315_v52  ;;  %v1305_v39 = vadd.f32 %v6711_v33, %v8316_v22  ;;  %v1316_v24 = vadd.f32 %v6711_v33, %v8317_v25  ;;  %v8327_v52 = vld [vmem:[#allocation95_spill] sm:$0xff]  ;;  %v8328_v25 = vld [vmem:[#allocation70_spill] sm:$0xff] }
 0x4e4   :  { %v1320_v36 = vmul.f32 0.2, %v1304_v19  ;;  %v1322_v20 = vmul.f32 0.2, %v1306_v31  ;;  %v1324_v5 = vmul.f32 0.2, %v1308_v3  ;;  %v1307_v44 = vadd.f32 %v6711_v33, %v8319_v38 }
 0x4e5   :  { %v1326_v59 = vmul.f32 0.2, %v1310_v14  ;;  %v1328_v1 = vmul.f32 0.2, %v1312_v27  ;;  %v1330_v4 = vmul.f32 0.2, %v1314_v12  ;;  %v1318_v42 = vadd.f32 %v6711_v33, %v8320_v62 }
 0x4e6   :  { %v1336_v47 = vmax.f32 %v1304_v19, %v1320_v36  ;;  %v1338_v61 = vmax.f32 %v1306_v31, %v1322_v20  ;;  %v1340_v57 = vmax.f32 %v1308_v3, %v1324_v5  ;;  %v1321_v21 = vmul.f32 0.2, %v1305_v39  ;;  %v8323_v36 = vld [vmem:[#allocation87_spill] sm:$0xff]  ;;  %v8324_v5 = vld [vmem:[#allocation53_spill] sm:$0xff] }
 0x4e7   :  { %v1342_v6 = vmax.f32 %v1310_v14, %v1326_v59  ;;  %v1344_v48 = vmax.f32 %v1312_v27, %v1328_v1  ;;  %v1332_v0 = vmul.f32 0.2, %v1316_v24  ;;  %v1346_v40 = vmax.f32 %v1314_v12, %v1330_v4  ;;  %v8325_v14 = vld [vmem:[#allocation67_spill] sm:$0xff]  ;;  %v8326_v59 = vld [vmem:[#allocation89_spill] sm:$0xff] }
 0x4e8   :  { %v6720_v58 = vadd.f32 %v1336_v47, %v6462_v2  ;;  %v6726_v55 = vadd.f32 %v1338_v61, %v8312_v15  ;;  %v6732_v45 = vadd.f32 %v1340_v57, %v8314_v53  ;;  %v1337_v50 = vmax.f32 %v1305_v39, %v1321_v21 }
 0x4e9   :  { %v6742_v41 = vadd.f32 %v1342_v6, %v8318_v63  ;;  %v6746_v32 = vadd.f32 %v1344_v48, %v6576_v17  ;;  %v1348_v34 = vmax.f32 %v1316_v24, %v1332_v0  ;;  %v6754_v23 = vadd.f32 %v1346_v40, %v8321_v30  ;;  %v8329_v48 = vld [vmem:[#allocation92_spill] sm:$0xff]  ;;  %v8330_v40 = vld [vmem:[#allocation82_spill] sm:$0xff] }
 0x4ea   :  { %1368 = vmax.xlane.f32.xlu0 %v6720_v58  ;;  %v1323_v26 = vmul.f32 0.2, %v1307_v44  ;;  %v1334_v19 = vmul.f32 0.2, %v1318_v42  ;;  %v1309_v31 = vadd.f32 %v6711_v33, %v8322_v7  ;;  %v6760_v20 = vadd.f32 %v1337_v50, %v8323_v36  ;;  %v8331_v50 = vld [vmem:[#allocation90_spill] sm:$0xff] }
 0x4eb   :  { %v6763_v13 = vadd.f32 %v1348_v34, %v6618_v43  ;;  %v1311_v8 = vadd.f32 %v6711_v33, %v8324_v5  ;;  %v1313_v57 = vadd.f32 %v6711_v33, %v8325_v14  ;;  %v1315_v24 = vadd.f32 %v6711_v33, %v8328_v25  ;;  %v8335_v25 = vld [vmem:[#allocation33_spill] sm:$0xff] }
 0x4ec   :  { %v1339_v3 = vmax.f32 %v1307_v44, %v1323_v26  ;;  %v1350_v47 = vmax.f32 %v1318_v42, %v1334_v19  ;;  %v1325_v61 = vmul.f32 0.2, %v1309_v31  ;;  %v1317_v38 = vadd.f32 %v6711_v33, %v8330_v40  ;;  %v8332_v26 = vld [vmem:[#allocation97_spill] sm:$0xff]  ;;  %v8337_v40 = vld [vmem:[#allocation40_spill] sm:$0xff] }
 0x4ed   :  { %v1327_v1 = vmul.f32 0.2, %v1311_v8  ;;  %v1329_v39 = vmul.f32 0.2, %v1313_v57  ;;  %v1331_v0 = vmul.f32 0.2, %v1315_v24  ;;  %v1319_v34 = vadd.f32 %v6711_v33, %v8331_v50  ;;  %v2304_v33 = vpop.trf.xlu0 }
 0x4ee   :  { %1372 = vmax.xlane.f32.xlu0 %v6726_v55  ;;  %v6772_v49 = vadd.f32 %v1339_v3, %v8326_v59  ;;  %v6775_v27 = vadd.f32 %v1350_v47, %v6595_v54  ;;  %v1341_v6 = vmax.f32 %v1309_v31, %v1325_v61  ;;  %v1333_v42 = vmul.f32 0.2, %v1317_v38 }
 0x4ef   :  { %v1343_v22 = vmax.f32 %v1311_v8, %v1327_v1  ;;  %v1345_v21 = vmax.f32 %v1313_v57, %v1329_v39  ;;  %v1347_v62 = vmax.f32 %v1315_v24, %v1331_v0  ;;  %v1335_v31 = vmul.f32 0.2, %v1319_v34 }
 0x4f0   :  { %v6780_v12 = vadd.f32 %v1341_v6, %v8327_v52  ;;  %v1349_v7 = vmax.f32 %v1317_v38, %v1333_v42  ;;  %v8156_v61 = vmov 32   ;;  %v6812_v8 = vrot.slane %v2304_v33, %v8307_v60  ;;  %v8333_v6 = vld [vmem:[#allocation39_spill] sm:$0xff] }
 0x4f1   :  { %v6786_v4 = vadd.f32 %v1343_v22, %v8329_v48  ;;  %v6792_v44 = vadd.f32 %v1345_v21, %v6581_v9  ;;  %v6798_v19 = vadd.f32 %v1347_v62, %v8332_v26  ;;  %v1351_v47 = vmax.f32 %v1319_v34, %v1335_v31  ;;  %5198 = vset.pattern.permute.xlu0 %v8156_v61  ;;  %v8334_v22 = vld [vmem:[#allocation34_spill] sm:$0xff]  ;;  %v8338_v62 = vld [vmem:[#allocation35_spill] sm:$0xff] }
 0x4f2   :  { %1376 = vmax.xlane.f32.xlu0 %v6732_v45  ;;  %v6802_v3 = vadd.f32 %v1349_v7, %v6613_v37  ;;  %v8336_v21 = vld [vmem:[#allocation30_spill] sm:$0xff]  ;;  %v2389_v38 = vadd.f32 %v6812_v8, %v8337_v40  ;;  %v2388_v42 = vadd.f32 %v6812_v8, %v8338_v62 }
 0x4f3   :  { %v6808_v5 = vadd.f32 %v1351_v47, %v6600_v16 }
 0x4f6   :  { %1380 = vmax.xlane.f32.xlu0 %v6742_v41 }
 0x4f9   :  { %5197 = vset.pattern.permute.xlu1 %v8156_v61  ;;  %v8340_v61 = vld [vmem:[#allocation28_spill] sm:$0xff] }
 0x4fa   :  { %1384 = vmax.xlane.f32.xlu0 %v6746_v32 }
 0x4fe   :  { %1388 = vmax.xlane.f32.xlu0 %v6754_v23 }
 0x502   :  { %1370 = vmax.xlane.f32.xlu1 %v6760_v20  ;;  %1392 = vmax.xlane.f32.xlu0 %v6763_v13 }
 0x506   :  { %1374 = vmax.xlane.f32.xlu1 %v6772_v49  ;;  %1396 = vmax.xlane.f32.xlu0 %v6775_v27 }
 0x50a   :  { %1378 = vmax.xlane.f32.xlu1 %v6780_v12 }
 0x50e   :  { %1382 = vmax.xlane.f32.xlu1 %v6786_v4 }
 0x512   :  { %1386 = vmax.xlane.f32.xlu1 %v6792_v44 }
 0x516   :  { %1390 = vmax.xlane.f32.xlu1 %v6798_v19 }
 0x51a   :  { %1394 = vmax.xlane.f32.xlu1 %v6802_v3 }
 0x51e   :  { %1398 = vmax.xlane.f32.xlu1 %v6808_v5 }
 0x51f   :  { %v1762_v14 = vpop.trf.xlu1 }
 0x520   :  { %v6815_v57 = vrot.slane %v1762_v14, %v8307_v60  ;;  %v2405_v14 = vmul.f32 0.2, %v2389_v38 }
 0x522   :  { %v1847_v1 = vadd.f32 %v6815_v57, %v8333_v6  ;;  %v1846_v39 = vadd.f32 %v6815_v57, %v8334_v22  ;;  %v1849_v24 = vadd.f32 %v6815_v57, %v8335_v25  ;;  %v1848_v0 = vadd.f32 %v6815_v57, %v8336_v21  ;;  %v8339_v22 = vld [vmem:[#allocation38_spill] sm:$0xff] }
 0x523   :  { %v2404_v6 = vmul.f32 0.2, %v2388_v42  ;;  %v2391_v25 = vadd.f32 %v6812_v8, %v8339_v22  ;;  %v2390_v21 = vadd.f32 %v6812_v8, %v8340_v61 }
 0x524   :  { %v1863_v50 = vmul.f32 0.2, %v1847_v1  ;;  %v1862_v34 = vmul.f32 0.2, %v1846_v39  ;;  %v1865_v7 = vmul.f32 0.2, %v1849_v24 }
 0x525   :  { %v1864_v31 = vmul.f32 0.2, %v1848_v0 }
 0x526   :  { %v1879_v47 = vmax.f32 %v1847_v1, %v1863_v50  ;;  %v1878_v33 = vmax.f32 %v1846_v39, %v1862_v34  ;;  %v1881_v62 = vmax.f32 %v1849_v24, %v1865_v7  ;;  %v2421_v1 = vmax.f32 %v2389_v38, %v2405_v14  ;;  %v8345_v14 = vld [vmem:[#allocation55_spill] sm:$0xff] }
 0x527   :  { %v1880_v29 = vmax.f32 %v1848_v0, %v1864_v31  ;;  %v2420_v39 = vmax.f32 %v2388_v42, %v2404_v6  ;;  %v2407_v50 = vmul.f32 0.2, %v2391_v25  ;;  %v2406_v34 = vmul.f32 0.2, %v2390_v21 }
 0x528   :  { %v6834_v60 = vadd.f32 %v1879_v47, %v8323_v36  ;;  %v6837_v40 = vadd.f32 %v1878_v33, %v6462_v2  ;;  %v6842_v22 = vadd.f32 %v1881_v62, %v8326_v59  ;;  %v8341_v47 = vld [vmem:[#allocation54_spill] sm:$0xff]  ;;  %v1850_v24 = vadd.f32 %v6815_v57, %v8342_v46  ;;  %v8346_v62 = vld [vmem:[#allocation44_spill] sm:$0xff] }
 0x529   :  { %v6845_v61 = vadd.f32 %v1880_v29, %v8312_v15  ;;  %v1851_v33 = vadd.f32 %v6815_v57, %v8341_v47  ;;  %v6854_v0 = vadd.f32 %v2421_v1, %v8323_v36  ;;  %v6857_v38 = vadd.f32 %v2420_v39, %v6462_v2  ;;  %v8350_v1 = vld [vmem:[#allocation46_spill] sm:$0xff] }
 0x52a   :  { %1912 = vmax.xlane.f32.xlu1 %v6834_v60  ;;  %1910 = vmax.xlane.f32.xlu0 %v6837_v40  ;;  %v2423_v42 = vmax.f32 %v2391_v25, %v2407_v50  ;;  %v2422_v7 = vmax.f32 %v2390_v21, %v2406_v34  ;;  %v1866_v31 = vmul.f32 0.2, %v1850_v24  ;;  %v1853_v6 = vadd.f32 %v6815_v57, %v8345_v14  ;;  %v8349_v25 = vld [vmem:[#allocation58_spill] sm:$0xff] }
 0x52b   :  { %8343 = vst [vmem:[#allocation27_spill] sm:$0xff] %v6854_v0  ;;  %8344 = vst [vmem:[#allocation36_spill] sm:$0xff] %v6857_v38  ;;  %v1867_v29 = vmul.f32 0.2, %v1851_v33  ;;  %v1852_v46 = vadd.f32 %v6815_v57, %v8346_v62  ;;  %v2393_v21 = vadd.f32 %v6812_v8, %v8349_v25  ;;  %v2392_v39 = vadd.f32 %v6812_v8, %v8350_v1 }
 0x52c   :  { %v6866_v36 = vadd.f32 %v2423_v42, %v8326_v59  ;;  %v6869_v2 = vadd.f32 %v2422_v7, %v8312_v15  ;;  %v1882_v34 = vmax.f32 %v1850_v24, %v1866_v31  ;;  %v1869_v47 = vmul.f32 0.2, %v1853_v6  ;;  %v8351_v42 = vld [vmem:[#allocation50_spill] sm:$0xff]  ;;  %v8352_v7 = vld [vmem:[#allocation45_spill] sm:$0xff] }
 0x52d   :  { %v1883_v50 = vmax.f32 %v1851_v33, %v1867_v29  ;;  %v1868_v14 = vmul.f32 0.2, %v1852_v46  ;;  %v2409_v62 = vmul.f32 0.2, %v2393_v21  ;;  %v2408_v59 = vmul.f32 0.2, %v2392_v39 }
 0x52e   :  { %1916 = vmax.xlane.f32.xlu1 %v6842_v22  ;;  %1914 = vmax.xlane.f32.xlu0 %v6845_v61  ;;  %8347 = vst [vmem:[#allocation43_spill] sm:$0xff] %v6866_v36  ;;  %8348 = vst [vmem:[#allocation51_spill] sm:$0xff] %v6869_v2  ;;  %v2395_v15 = vadd.f32 %v6812_v8, %v8351_v42  ;;  %v6885_v33 = vadd.f32 %v1882_v34, %v8314_v53 }
 0x52f   :  { %v6882_v25 = vadd.f32 %v1883_v50, %v8327_v52  ;;  %v1885_v24 = vmax.f32 %v1853_v6, %v1869_v47  ;;  %v1884_v29 = vmax.f32 %v1852_v46, %v1868_v14  ;;  %v2425_v31 = vmax.f32 %v2393_v21, %v2409_v62  ;;  %v8353_v50 = vld [vmem:[#allocation69_spill] sm:$0xff] }
 0x530   :  { %v2424_v1 = vmax.f32 %v2392_v39, %v2408_v59  ;;  %v1855_v34 = vadd.f32 %v6815_v57, %v8353_v50  ;;  %v8357_v59 = vld [vmem:[#allocation71_spill] sm:$0xff] }
 0x531   :  { %v6890_v42 = vadd.f32 %v1885_v24, %v8329_v48  ;;  %v6902_v46 = vadd.f32 %v2425_v31, %v8327_v52  ;;  %v1857_v24 = vadd.f32 %v6815_v57, %v8357_v59 }
 0x532   :  { %2454 = vmax.xlane.f32.xlu1 %v6854_v0  ;;  %2452 = vmax.xlane.f32.xlu0 %v6857_v38  ;;  %v2394_v0 = vadd.f32 %v6812_v8, %v8352_v7  ;;  %v6893_v7 = vadd.f32 %v1884_v29, %v8318_v63  ;;  %v8354_v38 = vld [vmem:[#allocation68_spill] sm:$0xff]  ;;  %v6905_v21 = vadd.f32 %v2424_v1, %v8314_v53  ;;  %v1871_v14 = vmul.f32 0.2, %v1855_v34  ;;  %v8358_v29 = vld [vmem:[#allocation62_spill] sm:$0xff] }
 0x533   :  { %v1854_v6 = vadd.f32 %v6815_v57, %v8354_v38  ;;  %8355 = vst [vmem:[#allocation19_spill] sm:$0xff] %v6902_v46  ;;  %v1856_v38 = vadd.f32 %v6815_v57, %v8358_v29  ;;  %v1873_v50 = vmul.f32 0.2, %v1857_v24 }
 0x534   :  { %8356 = vst [vmem:[#allocation20_spill] sm:$0xff] %v6905_v21  ;;  %v1887_v31 = vmax.f32 %v1855_v34, %v1871_v14 }
 0x535   :  { %v1870_v62 = vmul.f32 0.2, %v1854_v6  ;;  %v1872_v59 = vmul.f32 0.2, %v1856_v38 }
 0x536   :  { %2458 = vmax.xlane.f32.xlu1 %v6866_v36  ;;  %2456 = vmax.xlane.f32.xlu0 %v6869_v2  ;;  %v2411_v36 = vmul.f32 0.2, %v2395_v15  ;;  %v2410_v2 = vmul.f32 0.2, %v2394_v0 }
 0x537   :  { %v1886_v1 = vmax.f32 %v1854_v6, %v1870_v62  ;;  %v1889_v6 = vmax.f32 %v1857_v24, %v1873_v50  ;;  %v1888_v14 = vmax.f32 %v1856_v38, %v1872_v59 }
 0x538   :  { %v2427_v39 = vmax.f32 %v2395_v15, %v2411_v36  ;;  %v2426_v47 = vmax.f32 %v2394_v0, %v2410_v2  ;;  %v8361_v36 = vld [vmem:[#allocation74_spill] sm:$0xff]  ;;  %v8362_v2 = vld [vmem:[#allocation59_spill] sm:$0xff] }
 0x539   :  { %v2397_v0 = vadd.f32 %v6812_v8, %v8361_v36  ;;  %v2396_v15 = vadd.f32 %v6812_v8, %v8362_v2  ;;  %v6930_v36 = vadd.f32 %v1887_v31, %v6581_v9  ;;  %v6933_v34 = vadd.f32 %v1886_v1, %v6576_v17  ;;  %v8365_v31 = vld [vmem:[#allocation84_spill] sm:$0xff] }
 0x53a   :  { %1920 = vmax.xlane.f32.xlu1 %v6882_v25  ;;  %1918 = vmax.xlane.f32.xlu0 %v6885_v33  ;;  %v6914_v52 = vadd.f32 %v2427_v39, %v8329_v48  ;;  %v6917_v53 = vadd.f32 %v2426_v47, %v8318_v63  ;;  %v8363_v39 = vld [vmem:[#allocation63_spill] sm:$0xff]  ;;  %v8364_v47 = vld [vmem:[#allocation64_spill] sm:$0xff]  ;;  %v1859_v1 = vadd.f32 %v6815_v57, %v8365_v31 }
 0x53b   :  { %v2413_v29 = vmul.f32 0.2, %v2397_v0  ;;  %v2412_v48 = vmul.f32 0.2, %v2396_v15  ;;  %v2399_v63 = vadd.f32 %v6812_v8, %v8363_v39  ;;  %v6938_v39 = vadd.f32 %v1889_v6, %v8332_v26 }
 0x53c   :  { %8359 = vst [vmem:[#allocation41_spill] sm:$0xff] %v6914_v52  ;;  %8360 = vst [vmem:[#allocation21_spill] sm:$0xff] %v6917_v53  ;;  %v1875_v59 = vmul.f32 0.2, %v1859_v1 }
 0x53d   :  { %v2429_v62 = vmax.f32 %v2397_v0, %v2413_v29  ;;  %v2428_v2 = vmax.f32 %v2396_v15, %v2412_v48  ;;  %v8367_v48 = vld [vmem:[#allocation93_spill] sm:$0xff] }
 0x53e   :  { %1924 = vmax.xlane.f32.xlu1 %v6890_v42  ;;  %1922 = vmax.xlane.f32.xlu0 %v6893_v7  ;;  %v1861_v6 = vadd.f32 %v6815_v57, %v8367_v48 }
 0x53f   :  { %v6950_v38 = vadd.f32 %v2429_v62, %v6581_v9  ;;  %v6953_v0 = vadd.f32 %v2428_v2, %v6576_v17 }
 0x540   :  { %v1877_v2 = vmul.f32 0.2, %v1861_v6 }
 0x542   :  { %2462 = vmax.xlane.f32.xlu1 %v6902_v46  ;;  %2460 = vmax.xlane.f32.xlu0 %v6905_v21  ;;  %v2398_v46 = vadd.f32 %v6812_v8, %v8364_v47  ;;  %v6941_v47 = vadd.f32 %v1888_v14, %v8321_v30  ;;  %v8366_v21 = vld [vmem:[#allocation86_spill] sm:$0xff]  ;;  %v8368_v14 = vld [vmem:[#allocation79_spill] sm:$0xff] }
 0x543   :  { %v1858_v24 = vadd.f32 %v6815_v57, %v8366_v21  ;;  %v1860_v21 = vadd.f32 %v6815_v57, %v8368_v14 }
 0x545   :  { %v1874_v29 = vmul.f32 0.2, %v1858_v24  ;;  %v1876_v57 = vmul.f32 0.2, %v1860_v21 }
 0x546   :  { %2466 = vmax.xlane.f32.xlu1 %v6914_v52  ;;  %2464 = vmax.xlane.f32.xlu0 %v6917_v53  ;;  %v2415_v52 = vmul.f32 0.2, %v2399_v63  ;;  %v2414_v53 = vmul.f32 0.2, %v2398_v46 }
 0x547   :  { %v1890_v62 = vmax.f32 %v1858_v24, %v1874_v29  ;;  %v1893_v24 = vmax.f32 %v1861_v6, %v1877_v2 }
 0x548   :  { %v2431_v15 = vmax.f32 %v2399_v63, %v2415_v52  ;;  %v2430_v50 = vmax.f32 %v2398_v46, %v2414_v53  ;;  %v2401_v46 = vadd.f32 %v6812_v8, %v6660_v51  ;;  %v8369_v52 = vld [vmem:[#allocation73_spill] sm:$0xff]  ;;  %v1891_v63 = vmax.f32 %v1859_v1, %v1875_v59 }
 0x549   :  { %v2400_v53 = vadd.f32 %v6812_v8, %v8369_v52  ;;  %v6981_v1 = vadd.f32 %v1890_v62, %v6618_v43  ;;  %v1892_v59 = vmax.f32 %v1860_v21, %v1876_v57  ;;  %v6986_v52 = vadd.f32 %v1893_v24, %v6600_v16 }
 0x54a   :  { %1928 = vmax.xlane.f32.xlu1 %v6930_v36  ;;  %1926 = vmax.xlane.f32.xlu0 %v6933_v34  ;;  %v6962_v9 = vadd.f32 %v2431_v15, %v8332_v26  ;;  %v6965_v17 = vadd.f32 %v2430_v50, %v8321_v30  ;;  %v2417_v31 = vmul.f32 0.2, %v2401_v46  ;;  %v8370_v15 = vld [vmem:[#allocation78_spill] sm:$0xff]  ;;  %v8371_v50 = vld [vmem:[#allocation81_spill] sm:$0xff]  ;;  %v6978_v51 = vadd.f32 %v1891_v63, %v6613_v37 }
 0x54b   :  { %v2416_v26 = vmul.f32 0.2, %v2400_v53  ;;  %v2403_v30 = vadd.f32 %v6812_v8, %v8370_v15  ;;  %v2402_v48 = vadd.f32 %v6812_v8, %v8371_v50  ;;  %v6989_v15 = vadd.f32 %v1892_v59, %v6595_v54 }
 0x54c   :  { %v2433_v29 = vmax.f32 %v2401_v46, %v2417_v31 }
 0x54d   :  { %v2432_v14 = vmax.f32 %v2400_v53, %v2416_v26  ;;  %v2419_v8 = vmul.f32 0.2, %v2403_v30  ;;  %v2418_v63 = vmul.f32 0.2, %v2402_v48 }
 0x54e   :  { %1932 = vmax.xlane.f32.xlu1 %v6938_v39  ;;  %1930 = vmax.xlane.f32.xlu0 %v6941_v47  ;;  %v6994_v6 = vadd.f32 %v2433_v29, %v6613_v37 }
 0x54f   :  { %v6997_v21 = vadd.f32 %v2432_v14, %v6618_v43  ;;  %v2435_v46 = vmax.f32 %v2403_v30, %v2419_v8  ;;  %v2434_v53 = vmax.f32 %v2402_v48, %v2418_v63 }
 0x551   :  { %v7002_v62 = vadd.f32 %v2435_v46, %v6600_v16  ;;  %v7005_v2 = vadd.f32 %v2434_v53, %v6595_v54 }
 0x552   :  { %2470 = vmax.xlane.f32.xlu1 %v6950_v38  ;;  %2468 = vmax.xlane.f32.xlu0 %v6953_v0 }
 0x556   :  { %2474 = vmax.xlane.f32.xlu1 %v6962_v9  ;;  %2472 = vmax.xlane.f32.xlu0 %v6965_v17 }
 0x55a   :  { %1936 = vmax.xlane.f32.xlu1 %v6978_v51  ;;  %1934 = vmax.xlane.f32.xlu0 %v6981_v1 }
 0x55e   :  { %1940 = vmax.xlane.f32.xlu1 %v6986_v52  ;;  %1938 = vmax.xlane.f32.xlu0 %v6989_v15 }
 0x562   :  { %2478 = vmax.xlane.f32.xlu1 %v6994_v6  ;;  %2476 = vmax.xlane.f32.xlu0 %v6997_v21 }
 0x566   :  { %2482 = vmax.xlane.f32.xlu1 %v7002_v62  ;;  %2480 = vmax.xlane.f32.xlu0 %v7005_v2 }
 0x577   :  { %v1369_v37 = vpop.xlane.xlu0 %1368 }
 0x578   :  { %v1400_v24 = vsub.f32 %v6720_v58, %v1369_v37 }
 0x57a   :  { %v1416_v63 = vmul.f32 1.442695, %v1400_v24 }
 0x57b   :  { %v1373_v57 = vpop.xlane.xlu0 %1372 }
 0x57c   :  { %v1402_v14 = vsub.f32 %v6726_v55, %v1373_v57 }
 0x57f   :  { %v1377_v43 = vpop.xlane.xlu0 %1376 }
 0x580   :  { %v1404_v53 = vsub.f32 %v6732_v45, %v1377_v43 }
 0x582   :  { %v1424_v24 = vmul.f32 1.442695, %v1404_v53 }
 0x583   :  { %v1381_v59 = vpop.xlane.xlu0 %1380 }
 0x587   :  { %v7009_v31 = vpop.f32.mrb[24].mxu0  ;;  %v1385_v58 = vpop.xlane.xlu0 %1384 }
 0x588   :  { %v997_v26 = vmax.f32 %v7009_v31, 1e-09  ;;  %v7012_v30 = vpop.f32.mrb[25].mxu0 }
 0x589   :  { %8372 = vst [vmem:[#allocation47_spill] sm:$0xff] %v7012_v30  ;;  %v995_v50 = vmax.f32 %v7012_v30, 1e-09  ;;  %v7015_v16 = vpop.f32.mrb[26].mxu0  ;;  %v1420_v30 = vmul.f32 1.442695, %v1402_v14 }
 0x58a   :  { %8373 = vst [vmem:[#allocation22_spill] sm:$0xff] %v7015_v16  ;;  %5235 = vrcp.f32 %v997_v26  ;;  %v998_v54 = vmax.f32 %v7015_v16, 1e-09  ;;  %v7018_v48 = vpop.f32.mrb[27].mxu0 }
 0x58b   :  { %8374 = vst [vmem:[#allocation57_spill] sm:$0xff] %v7018_v48  ;;  %5237 = vrcp.f32 %v995_v50  ;;  %v996_v29 = vmax.f32 %v7018_v48, 1e-09  ;;  %v1389_v53 = vpop.xlane.xlu0 %1388 }
 0x58c   :  { %5239 = vrcp.f32 %v998_v54 }
 0x58d   :  { %5241 = vrcp.f32 %v996_v29 }
 0x58e   :  { %5243 = vpow2.f32 %v1416_v63  ;;  %v1406_v63 = vsub.f32 %v6742_v41, %v1381_v59 }
 0x58f   :  { %v1371_v8 = vpop.xlane.xlu1 %1370 }
 0x590   :  { %v1401_v46 = vsub.f32 %v6760_v20, %v1371_v8 }
 0x591   :  { %v7025_v26 = vpop.f32.mrb[28].mxu0 }
 0x592   :  { %8375 = vst [vmem:[#allocation23_spill] sm:$0xff] %v7025_v26  ;;  %v1418_v16 = vmul.f32 1.442695, %v1401_v46  ;;  %v1001_v50 = vmax.f32 %v7025_v26, 1e-09  ;;  %v7028_v37 = vpop.f32.mrb[29].mxu0 }
 0x593   :  { %v7030_v48 = vpop.f32.mrb[30].mxu0  ;;  %v1375_v55 = vpop.xlane.xlu1 %1374  ;;  %v999_v29 = vmax.f32 %v7028_v37, 1e-09 }
 0x594   :  { %v5236_v54 = vpop.eup %5235  ;;  %8376 = vst [vmem:[#allocation65_spill] sm:$0xff] %v7030_v48  ;;  %5245 = vpow2.f32 %v1418_v16  ;;  %v1002_v45 = vmax.f32 %v7030_v48, 1e-09  ;;  %v7033_v20 = vpop.f32.mrb[31].mxu0  ;;  %v1403_v43 = vsub.f32 %v6772_v49, %v1375_v55  ;;  %v1428_v55 = vmul.f32 1.442695, %v1406_v63 }
 0x595   :  { %v5238_v57 = vpop.eup %5237  ;;  %1039 = vperm.xlu1 %5197, %v5236_v54   ;;  %5247 = vrcp.f32 %v1001_v50  ;;  %v1000_v46 = vmax.f32 %v7033_v20, 1e-09  ;;  %v1410_v63 = vsub.f32 %v6754_v23, %v1389_v53 }
 0x596   :  { %1029 = vperm.xlu0 %5198, %v5238_v57   ;;  %5249 = vpow2.f32 %v1420_v30  ;;  %v1422_v14 = vmul.f32 1.442695, %v1403_v43  ;;  %v5240_v8 = vpop.eup %5239  ;;  %v1408_v30 = vsub.f32 %v6746_v32, %v1385_v58 }
 0x597   :  { %5251 = vrcp.f32 %v1002_v45  ;;  %v1379_v16 = vpop.xlane.xlu1 %1378  ;;  %v5242_v54 = vpop.eup %5241 }
 0x598   :  { %5253 = vpow2.f32 %v1424_v24  ;;  %v1405_v48 = vsub.f32 %v6780_v12, %v1379_v16  ;;  %v5244_v43 = vpop.eup %5243 }
 0x599   :  { %v7040_v26 = vpop.f32.mrb[32].mxu0  ;;  %1044 = vperm.xlu1 %5197, %v5240_v8   ;;  %5255 = vrcp.f32 %v999_v29  ;;  %v1393_v29 = vpop.xlane.xlu0 %1392 }
 0x59a   :  { %v1005_v49 = vmax.f32 %v7040_v26, 1e-09  ;;  %v7043_v50 = vpop.f32.mrb[33].mxu0  ;;  %5257 = vpow2.f32 %v1422_v14  ;;  %v1426_v41 = vmul.f32 1.442695, %v1405_v48  ;;  %v1412_v23 = vsub.f32 %v6763_v13, %v1393_v29 }
 0x59b   :  { %v7046_v59 = vpop.f32.mrb[34].mxu0  ;;  %5259 = vrcp.f32 %v1000_v46  ;;  %v1383_v24 = vpop.xlane.xlu1 %1382  ;;  %v1003_v32 = vmax.f32 %v7043_v50, 1e-09  ;;  %v1432_v48 = vmul.f32 1.442695, %v1408_v30 }
 0x59c   :  { %8377 = vst [vmem:[#allocation24_spill] sm:$0xff] %v7046_v59  ;;  %v1006_v57 = vmax.f32 %v7046_v59, 1e-09  ;;  %v7049_v12 = vpop.f32.mrb[35].mxu0  ;;  %5261 = vpow2.f32 %v1426_v41  ;;  %v1407_v45 = vsub.f32 %v6786_v4, %v1383_v24 }
 0x59d   :  { %1034 = vperm.xlu1 %5197, %v5242_v54   ;;  %5263 = vrcp.f32 %v1005_v49  ;;  %v1004_v46 = vmax.f32 %v7049_v12, 1e-09 }
 0x59e   :  { %v5246_v58 = vpop.eup %5245  ;;  %5265 = vrcp.f32 %v1006_v57  ;;  %v1430_v14 = vmul.f32 1.442695, %v1407_v45 }
 0x59f   :  { %v5248_v8 = vpop.eup %5247  ;;  %5267 = vpow2.f32 %v1428_v55  ;;  %v1387_v16 = vpop.xlane.xlu1 %1386  ;;  %v1448_v41 = vpack.c.bf16 %v5246_v58, %v5244_v43 }
 0x5a0   :  { %v5250_v59 = vpop.eup %5249  ;;  %5269 = vpow2.f32 %v1430_v14  ;;  %v1409_v4 = vsub.f32 %v6792_v44, %v1387_v16  ;;  %v1436_v44 = vmul.f32 1.442695, %v1410_v63 }
 0x5a1   :  { %v7056_v49 = vpop.f32.mrb[36].mxu0  ;;  %1059 = vperm.xlu1 %5197, %v5248_v8   ;;  %v5252_v54 = vpop.eup %5251  ;;  %5271 = vrcp.f32 %v1003_v32  ;;  %4895 = vmatprep.mubr.bf16.mxu1 %v1448_v41 }
 0x5a2   :  { %v1009_v30 = vmax.f32 %v7056_v49, 1e-09  ;;  %v7059_v57 = vpop.f32.mrb[37].mxu0  ;;  %v5254_v55 = vpop.eup %5253  ;;  %5273 = vpow2.f32 %v1432_v48  ;;  %v1434_v53 = vmul.f32 1.442695, %v1409_v4  ;;  %1064 = vperm.xlu0 %5198, %v5252_v54  }
 0x5a3   :  { %v7062_v24 = vpop.f32.mrb[38].mxu0  ;;  %v5256_v45 = vpop.eup %5255  ;;  %5275 = vrcp.f32 %v1004_v46  ;;  %v1007_v13 = vmax.f32 %v7059_v57, 1e-09  ;;  %v1440_v4 = vmul.f32 1.442695, %v1412_v23 }
 0x5a4   :  { %8378 = vst [vmem:[#allocation56_spill] sm:$0xff] %v7062_v24  ;;  %v1010_v43 = vmax.f32 %v7062_v24, 1e-09  ;;  %v7065_v58 = vpop.f32.mrb[39].mxu0  ;;  %v1391_v32 = vpop.xlane.xlu1 %1390  ;;  %5277 = vpow2.f32 %v1434_v53 }
 0x5a5   :  { %v5258_v14 = vpop.eup %5257  ;;  %v1397_v8 = vpop.xlane.xlu0 %1396  ;;  %v1411_v16 = vsub.f32 %v6798_v19, %v1391_v32  ;;  %1049 = vperm.xlu1 %5197, %v5256_v45   ;;  %5279 = vrcp.f32 %v1009_v30  ;;  %v1008_v24 = vmax.f32 %v7065_v58, 1e-09 }
 0x5a6   :  { %v5260_v48 = vpop.eup %5259  ;;  %v1449_v29 = vpack.c.bf16 %v5258_v14, %v5250_v59  ;;  %5281 = vrcp.f32 %v1010_v43  ;;  %v1414_v54 = vsub.f32 %v6775_v27, %v1397_v8 }
 0x5a7   :  { %v5262_v41 = vpop.eup %5261  ;;  %v1438_v63 = vmul.f32 1.442695, %v1411_v16  ;;  %1054 = vperm.xlu0 %5198, %v5260_v48   ;;  %5283 = vpow2.f32 %v1436_v44 }
 0x5a8   :  { %v5264_v46 = vpop.eup %5263  ;;  %4896 = vmatmul.mubr.bf16.vlgmr.msra.gmra.mrb[40].mxu1 %v1449_v29  ;;  %v1395_v53 = vpop.xlane.xlu1 %1394  ;;  %v1450_v19 = vpack.c.bf16 %v5262_v41, %v5254_v55  ;;  %v1444_v43 = vmul.f32 1.442695, %v1414_v54 }
 0x5a9   :  { %v5266_v45 = vpop.eup %5265  ;;  %5285 = vpow2.f32 %v1438_v63  ;;  %4944 = vmatpush3.bf16.msra.mxu1 %v8289_v28  ;;  %v1413_v59 = vsub.f32 %v6802_v3, %v1395_v53  ;;  %1079 = vperm.xlu1 %5197, %v5264_v46  }
 0x5aa   :  { %v5268_v30 = vpop.eup %5267  ;;  %5287 = vrcp.f32 %v1007_v13  ;;  %4945 = vmatprep.subr.bf16.mxu1 %v8290_v56  ;;  %4899 = vmatprep.mubr.bf16.mxu1 %v1450_v19 }
 0x5ab   :  { %v5270_v23 = vpop.eup %5269  ;;  %5289 = vpow2.f32 %v1440_v4  ;;  %v1442_v27 = vmul.f32 1.442695, %v1413_v59  ;;  %1084 = vperm.xlu0 %5198, %v5266_v45  }
 0x5ac   :  { %v5272_v44 = vpop.eup %5271  ;;  %5291 = vrcp.f32 %v1008_v24  ;;  %v1399_v55 = vpop.xlane.xlu1 %1398  ;;  %v1451_v32 = vpack.c.bf16 %v5270_v23, %v5268_v30 }
 0x5ad   :  { %v5274_v14 = vpop.eup %5273  ;;  %5293 = vpow2.f32 %v1442_v27  ;;  %4946 = vmatpush3.bf16.msra.mxu1 %v8290_v56  ;;  %v1415_v28 = vsub.f32 %v6808_v5, %v1399_v55  ;;  %1069 = vperm.xlu1 %5197, %v5272_v44  }
 0x5ae   :  { %v5276_v3 = vpop.eup %5275  ;;  %4947 = vmatprep.subr.bf16.mxu1 %v8292_v10  ;;  %5295 = vpow2.f32 %v1444_v43 }
 0x5af   :  { %v5278_v8 = vpop.eup %5277  ;;  %v1446_v16 = vmul.f32 1.442695, %v1415_v28  ;;  %1074 = vperm.xlu0 %5198, %v5276_v3   ;;  %v8380_v3 = vld [vmem:[#allocation36_spill] sm:$0xff] }
 0x5b0   :  { %v5280_v48 = vpop.eup %5279  ;;  %4900 = vmatmul.mubr.bf16.gmra.mrb[44].mxu1 %v1451_v32  ;;  %v1452_v13 = vpack.c.bf16 %v5278_v8, %v5274_v14 }
 0x5b1   :  { %v5282_v24 = vpop.eup %5281  ;;  %5297 = vpow2.f32 %v1446_v16  ;;  %4948 = vmatpush3.bf16.msra.mxu1 %v8292_v10  ;;  %1099 = vperm.xlu1 %5197, %v5280_v48   ;;  %v8381_v16 = vld [vmem:[#allocation27_spill] sm:$0xff] }
 0x5b2   :  { %v5284_v29 = vpop.eup %5283  ;;  %4949 = vmatprep.subr.bf16.mxu1 %v8294_v18  ;;  %4903 = vmatprep.mubr.bf16.mxu1 %v1452_v13 }
 0x5b3   :  { %v5286_v56 = vpop.eup %5285  ;;  %1104 = vperm.xlu0 %5198, %v5282_v24  }
 0x5b4   :  { %v5288_v5 = vpop.eup %5287  ;;  %v1453_v41 = vpack.c.bf16 %v5286_v56, %v5284_v29  ;;  %v8383_v29 = vld [vmem:[#allocation51_spill] sm:$0xff] }
 0x5b5   :  { %v5290_v4 = vpop.eup %5289  ;;  %4950 = vmatpush3.bf16.msra.mxu1 %v8294_v18  ;;  %1089 = vperm.xlu1 %5197, %v5288_v5   ;;  %v8384_v5 = vld [vmem:[#allocation43_spill] sm:$0xff] }
 0x5b6   :  { %v5292_v63 = vpop.eup %5291  ;;  %4951 = vmatprep.subr.bf16.mxu1 %v8296_v35 }
 0x5b7   :  { %v5294_v46 = vpop.eup %5293  ;;  %1094 = vperm.xlu0 %5198, %v5292_v63   ;;  %v1911_v54 = vpop.xlane.xlu0 %1910 }
 0x5b8   :  { %v1913_v10 = vpop.xlane.xlu1 %1912  ;;  %4904 = vmatmul.mubr.bf16.gmra.mrb[48].mxu1 %v1453_v41  ;;  %v1942_v53 = vsub.f32 %v6837_v40, %v1911_v54  ;;  %v1454_v45 = vpack.c.bf16 %v5294_v46, %v5290_v4  ;;  %v5296_v59 = vpop.eup %5295 }
 0x5b9   :  { %v1943_v19 = vsub.f32 %v6834_v60, %v1913_v10  ;;  %4952 = vmatpush3.bf16.msra.mxu1 %v8296_v35  ;;  %v8379_v60 = vld [vmem:[#allocation25_spill] sm:$0xff] }
 0x5ba   :  { %4953 = vmatprep.subr.bf16.mxu1 %v8298_v11  ;;  %v1958_v18 = vmul.f32 1.442695, %v1942_v53  ;;  %4907 = vmatprep.mubr.bf16.mxu1 %v1454_v45 }
 0x5bb   :  { %v1960_v30 = vmul.f32 1.442695, %v1943_v19  ;;  %v5298_v23 = vpop.eup %5297  ;;  %v1915_v27 = vpop.xlane.xlu0 %1914 }
 0x5bc   :  { %v1917_v44 = vpop.xlane.xlu1 %1916  ;;  %5299 = vpow2.f32 %v1958_v18  ;;  %v1944_v43 = vsub.f32 %v6845_v61, %v1915_v27  ;;  %v1455_v40 = vpack.c.bf16 %v5298_v23, %v5296_v59 }
 0x5bd   :  { %v1945_v55 = vsub.f32 %v6842_v22, %v1917_v44  ;;  %5301 = vpow2.f32 %v1960_v30  ;;  %4954 = vmatpush3.bf16.msra.mxu1 %v8298_v11  ;;  %v8382_v22 = vld [vmem:[#allocation26_spill] sm:$0xff] }
 0x5be   :  { %4955 = vmatprep.subr.bf16.mxu1 %v8379_v60  ;;  %v1962_v35 = vmul.f32 1.442695, %v1944_v43 }
 0x5bf   :  { %v1964_v32 = vmul.f32 1.442695, %v1945_v55  ;;  %v2453_v14 = vpop.xlane.xlu0 %2452 }
 0x5c0   :  { %v2455_v28 = vpop.xlane.xlu1 %2454  ;;  %5303 = vpow2.f32 %v1962_v35  ;;  %4908 = vmatmul.mubr.bf16.gmra.mrb[52].mxu1 %v1455_v40  ;;  %v2484_v8 = vsub.f32 %v8380_v3, %v2453_v14  ;;  %v8385_v3 = vld [vmem:[#allocation20_spill] sm:$0xff] }
 0x5c1   :  { %v2485_v48 = vsub.f32 %v8381_v16, %v2455_v28  ;;  %5305 = vpow2.f32 %v1964_v32  ;;  %4956 = vmatpush3.bf16.msra.mxu1 %v8379_v60  ;;  %v8386_v16 = vld [vmem:[#allocation19_spill] sm:$0xff] }
 0x5c2   :  { %4957 = vmatprep.subr.bf16.mxu1 %v8382_v22  ;;  %v2500_v61 = vmul.f32 1.442695, %v2484_v8 }
 0x5c3   :  { %v2502_v13 = vmul.f32 1.442695, %v2485_v48  ;;  %v2457_v11 = vpop.xlane.xlu0 %2456 }
 0x5c4   :  { %v2459_v24 = vpop.xlane.xlu1 %2458  ;;  %5307 = vpow2.f32 %v2500_v61  ;;  %v2486_v56 = vsub.f32 %v8383_v29, %v2457_v11  ;;  %v8387_v29 = vld [vmem:[#allocation21_spill] sm:$0xff] }
 0x5c5   :  { %v2487_v41 = vsub.f32 %v8384_v5, %v2459_v24  ;;  %5309 = vpow2.f32 %v2502_v13  ;;  %4958 = vmatpush3.bf16.msra.mxu1 %v8382_v22  ;;  %v8388_v5 = vld [vmem:[#allocation41_spill] sm:$0xff] }
 0x5c6   :  { %v5300_v4 = vpop.eup %5299  ;;  %v2504_v63 = vmul.f32 1.442695, %v2486_v56 }
 0x5c7   :  { %v2506_v46 = vmul.f32 1.442695, %v2487_v41  ;;  %v5302_v54 = vpop.eup %5301  ;;  %v1919_v10 = vpop.xlane.xlu0 %1918 }
 0x5c8   :  { %v1921_v53 = vpop.xlane.xlu1 %1920  ;;  %5311 = vpow2.f32 %v2504_v63  ;;  %v1946_v19 = vsub.f32 %v6885_v33, %v1919_v10  ;;  %v1990_v59 = vpack.c.bf16 %v5302_v54, %v5300_v4 }
 0x5c9   :  { %v1947_v45 = vsub.f32 %v6882_v25, %v1921_v53  ;;  %5313 = vpow2.f32 %v2506_v46 }
 0x5ca   :  { %v5304_v18 = vpop.eup %5303  ;;  %v1966_v30 = vmul.f32 1.442695, %v1946_v19  ;;  %4927 = vmatprep.mubr.bf16.mxu0 %v1990_v59 }
 0x5cb   :  { %v1968_v23 = vmul.f32 1.442695, %v1947_v45  ;;  %v5306_v27 = vpop.eup %5305  ;;  %v1923_v44 = vpop.xlane.xlu0 %1922 }
 0x5cc   :  { %v1925_v43 = vpop.xlane.xlu1 %1924  ;;  %5315 = vpow2.f32 %v1966_v30  ;;  %v1948_v55 = vsub.f32 %v6893_v7, %v1923_v44  ;;  %v1991_v60 = vpack.c.bf16 %v5306_v27, %v5304_v18 }
 0x5cd   :  { %v1949_v40 = vsub.f32 %v6890_v42, %v1925_v43  ;;  %5317 = vpow2.f32 %v1968_v23 }
 0x5ce   :  { %v5308_v35 = vpop.eup %5307  ;;  %v1970_v33 = vmul.f32 1.442695, %v1948_v55  ;;  %4928 = vmatmul.mubr.bf16.vlgmr.msra.gmra.mrb[40].mxu0 %v1991_v60 }
 0x5cf   :  { %v1972_v32 = vmul.f32 1.442695, %v1949_v40  ;;  %v5310_v25 = vpop.eup %5309  ;;  %v2461_v14 = vpop.xlane.xlu0 %2460 }
 0x5d0   :  { %v2463_v28 = vpop.xlane.xlu1 %2462  ;;  %5319 = vpow2.f32 %v1970_v33  ;;  %v2488_v8 = vsub.f32 %v8385_v3, %v2461_v14  ;;  %v2532_v22 = vpack.c.bf16 %v5310_v25, %v5308_v35 }
 0x5d1   :  { %v2489_v48 = vsub.f32 %v8386_v16, %v2463_v28  ;;  %5321 = vpow2.f32 %v1972_v32 }
 0x5d2   :  { %v5312_v61 = vpop.eup %5311  ;;  %v2508_v7 = vmul.f32 1.442695, %v2488_v8  ;;  %4959 = vmatprep.mubr.bf16.mxu1 %v2532_v22 }
 0x5d3   :  { %v2510_v13 = vmul.f32 1.442695, %v2489_v48  ;;  %v5314_v42 = vpop.eup %5313  ;;  %v2465_v11 = vpop.xlane.xlu0 %2464 }
 0x5d4   :  { %v2467_v24 = vpop.xlane.xlu1 %2466  ;;  %5323 = vpow2.f32 %v2508_v7  ;;  %v2490_v56 = vsub.f32 %v8387_v29, %v2465_v11  ;;  %v2533_v4 = vpack.c.bf16 %v5314_v42, %v5312_v61 }
 0x5d5   :  { %v2491_v41 = vsub.f32 %v8388_v5, %v2467_v24  ;;  %5325 = vpow2.f32 %v2510_v13 }
 0x5d6   :  { %v5316_v63 = vpop.eup %5315  ;;  %v2512_v46 = vmul.f32 1.442695, %v2490_v56  ;;  %4960 = vmatmul.mubr.bf16.vlgmr.msra.gmra.mrb[56].mxu1 %v2533_v4 }
 0x5d7   :  { %v2514_v54 = vmul.f32 1.442695, %v2491_v41  ;;  %v5318_v10 = vpop.eup %5317  ;;  %v1927_v53 = vpop.xlane.xlu0 %1926 }
 0x5d8   :  { %v1929_v19 = vpop.xlane.xlu1 %1928  ;;  %5327 = vpow2.f32 %v2512_v46  ;;  %v1950_v45 = vsub.f32 %v6933_v34, %v1927_v53  ;;  %v1992_v18 = vpack.c.bf16 %v5318_v10, %v5316_v63 }
 0x5d9   :  { %v1951_v59 = vsub.f32 %v6930_v36, %v1929_v19  ;;  %5329 = vpow2.f32 %v2514_v54 }
 0x5da   :  { %v5320_v30 = vpop.eup %5319  ;;  %v1974_v23 = vmul.f32 1.442695, %v1950_v45  ;;  %4931 = vmatprep.mubr.bf16.mxu0 %v1992_v18 }
 0x5db   :  { %v1976_v27 = vmul.f32 1.442695, %v1951_v59  ;;  %v5322_v44 = vpop.eup %5321  ;;  %v1931_v43 = vpop.xlane.xlu0 %1930 }
 0x5dc   :  { %v1933_v55 = vpop.xlane.xlu1 %1932  ;;  %5331 = vpow2.f32 %v1974_v23  ;;  %v1952_v40 = vsub.f32 %v6941_v47, %v1931_v43  ;;  %v1993_v35 = vpack.c.bf16 %v5322_v44, %v5320_v30 }
 0x5dd   :  { %v1953_v60 = vsub.f32 %v6938_v39, %v1933_v55  ;;  %5333 = vpow2.f32 %v1976_v27 }
 0x5de   :  { %v5324_v33 = vpop.eup %5323  ;;  %v1978_v34 = vmul.f32 1.442695, %v1952_v40  ;;  %4932 = vmatmul.mubr.bf16.gmra.mrb[44].mxu0 %v1993_v35 }
 0x5df   :  { %v1980_v32 = vmul.f32 1.442695, %v1953_v60  ;;  %v5326_v36 = vpop.eup %5325  ;;  %v2469_v25 = vpop.xlane.xlu0 %2468 }
 0x5e0   :  { %v2471_v14 = vpop.xlane.xlu1 %2470  ;;  %5335 = vpow2.f32 %v1978_v34  ;;  %v2492_v28 = vsub.f32 %v6953_v0, %v2469_v25  ;;  %v2534_v8 = vpack.c.bf16 %v5326_v36, %v5324_v33 }
 0x5e1   :  { %v2493_v3 = vsub.f32 %v6950_v38, %v2471_v14  ;;  %5337 = vpow2.f32 %v1980_v32 }
 0x5e2   :  { %v5328_v16 = vpop.eup %5327  ;;  %v2516_v47 = vmul.f32 1.442695, %v2492_v28  ;;  %4963 = vmatprep.mubr.bf16.mxu1 %v2534_v8 }
 0x5e3   :  { %v2518_v48 = vmul.f32 1.442695, %v2493_v3  ;;  %v5330_v39 = vpop.eup %5329  ;;  %v2473_v22 = vpop.xlane.xlu0 %2472 }
 0x5e4   :  { %v2475_v61 = vpop.xlane.xlu1 %2474  ;;  %5339 = vpow2.f32 %v2516_v47  ;;  %v2494_v7 = vsub.f32 %v6965_v17, %v2473_v22  ;;  %v2535_v42 = vpack.c.bf16 %v5330_v39, %v5328_v16 }
 0x5e5   :  { %v2495_v13 = vsub.f32 %v6962_v9, %v2475_v61  ;;  %5341 = vpow2.f32 %v2518_v48 }
 0x5e6   :  { %v5332_v11 = vpop.eup %5331  ;;  %v2520_v0 = vmul.f32 1.442695, %v2494_v7  ;;  %4964 = vmatmul.mubr.bf16.gmra.mrb[60].mxu1 %v2535_v42 }
 0x5e7   :  { %v2522_v24 = vmul.f32 1.442695, %v2495_v13  ;;  %v5334_v38 = vpop.eup %5333  ;;  %v1935_v29 = vpop.xlane.xlu0 %1934  ;;  %v8389_v13 = vld [vmem:[#allocation47_spill] sm:$0xff] }
 0x5e8   :  { %v1937_v56 = vpop.xlane.xlu1 %1936  ;;  %5343 = vpow2.f32 %v2520_v0  ;;  %v1954_v5 = vsub.f32 %v6981_v1, %v1935_v29  ;;  %v1994_v4 = vpack.c.bf16 %v5334_v38, %v5332_v11  ;;  %v8390_v0 = vld [vmem:[#allocation22_spill] sm:$0xff]  ;;  %v8391_v29 = vld [vmem:[#allocation57_spill] sm:$0xff] }
 0x5e9   :  { %v1955_v41 = vsub.f32 %v6978_v51, %v1937_v56  ;;  %5345 = vpow2.f32 %v2522_v24 }
 0x5ea   :  { %v5336_v63 = vpop.eup %5335  ;;  %v1982_v17 = vmul.f32 1.442695, %v1954_v5  ;;  %4935 = vmatprep.mubr.bf16.mxu0 %v1994_v4 }
 0x5eb   :  { %v1984_v46 = vmul.f32 1.442695, %v1955_v41  ;;  %v5338_v9 = vpop.eup %5337  ;;  %v1939_v54 = vpop.xlane.xlu0 %1938  ;;  %v8392_v41 = vld [vmem:[#allocation23_spill] sm:$0xff] }
 0x5ec   :  { %v1941_v10 = vpop.xlane.xlu1 %1940  ;;  %5347 = vpow2.f32 %v1982_v17  ;;  %v1956_v53 = vsub.f32 %v6989_v15, %v1939_v54  ;;  %v1995_v45 = vpack.c.bf16 %v5338_v9, %v5336_v63  ;;  %v8393_v63 = vld [vmem:[#allocation65_spill] sm:$0xff] }
 0x5ed   :  { %v1957_v19 = vsub.f32 %v6986_v52, %v1941_v10  ;;  %5349 = vpow2.f32 %v1984_v46 }
 0x5ee   :  { %v5340_v59 = vpop.eup %5339  ;;  %v1986_v1 = vmul.f32 1.442695, %v1956_v53  ;;  %4936 = vmatmul.mubr.bf16.gmra.mrb[48].mxu0 %v1995_v45 }
 0x5ef   :  { %v1988_v18 = vmul.f32 1.442695, %v1957_v19  ;;  %v5342_v51 = vpop.eup %5341  ;;  %v2477_v30 = vpop.xlane.xlu0 %2476 }
 0x5f0   :  { %v2479_v23 = vpop.xlane.xlu1 %2478  ;;  %5351 = vpow2.f32 %v1986_v1  ;;  %v2496_v27 = vsub.f32 %v6997_v21, %v2477_v30  ;;  %v2536_v43 = vpack.c.bf16 %v5342_v51, %v5340_v59  ;;  %v8394_v59 = vld [vmem:[#allocation24_spill] sm:$0xff] }
 0x5f1   :  { %v2497_v44 = vsub.f32 %v6994_v6, %v2479_v23  ;;  %5353 = vpow2.f32 %v1988_v18 }
 0x5f2   :  { %v5344_v55 = vpop.eup %5343  ;;  %v2524_v15 = vmul.f32 1.442695, %v2496_v27  ;;  %4967 = vmatprep.mubr.bf16.mxu1 %v2536_v43  ;;  %v8395_v27 = vld [vmem:[#allocation56_spill] sm:$0xff] }
 0x5f3   :  { %v2526_v40 = vmul.f32 1.442695, %v2497_v44  ;;  %v5346_v52 = vpop.eup %5345  ;;  %v2481_v60 = vpop.xlane.xlu0 %2480 }
 0x5f4   :  { %v2483_v35 = vpop.xlane.xlu1 %2482  ;;  %5355 = vpow2.f32 %v2524_v15  ;;  %v2498_v33 = vsub.f32 %v7005_v2, %v2481_v60  ;;  %v2537_v32 = vpack.c.bf16 %v5346_v52, %v5344_v55 }
 0x5f5   :  { %v2499_v34 = vsub.f32 %v7002_v62, %v2483_v35  ;;  %5357 = vpow2.f32 %v2526_v40 }
 0x5f6   :  { %v5348_v36 = vpop.eup %5347  ;;  %v2528_v21 = vmul.f32 1.442695, %v2498_v33  ;;  %4968 = vmatmul.mubr.bf16.gmra.mrb[64].mxu1 %v2537_v32 }
 0x5f7   :  { %v2530_v25 = vmul.f32 1.442695, %v2499_v34  ;;  %v5350_v6 = vpop.eup %5349 }
 0x5f8   :  { %5359 = vpow2.f32 %v2528_v21  ;;  %v1996_v14 = vpack.c.bf16 %v5350_v6, %v5348_v36 }
 0x5f9   :  { %5361 = vpow2.f32 %v2530_v25 }
 0x5fa   :  { %v5352_v28 = vpop.eup %5351  ;;  %4939 = vmatprep.mubr.bf16.mxu0 %v1996_v14 }
 0x5fb   :  { %v5354_v3 = vpop.eup %5353 }
 0x5fc   :  { %v1997_v8 = vpack.c.bf16 %v5354_v3, %v5352_v28 }
 0x5fe   :  { %v5356_v16 = vpop.eup %5355  ;;  %4940 = vmatmul.mubr.bf16.gmra.mrb[52].mxu0 %v1997_v8 }
 0x5ff   :  { %v5358_v47 = vpop.eup %5357 }
 0x600   :  { %v2538_v2 = vpack.c.bf16 %v5358_v47, %v5356_v16 }
 0x602   :  { %v5360_v48 = vpop.eup %5359  ;;  %4971 = vmatprep.mubr.bf16.mxu1 %v2538_v2 }
 0x603   :  { %v5362_v62 = vpop.eup %5361 }
 0x604   :  { %v2539_v39 = vpack.c.bf16 %v5362_v62, %v5360_v48 }
 0x606   :  { %4972 = vmatmul.mubr.bf16.gmra.mrb[68].mxu1 %v2539_v39 }
 0x614   :  { %v1040_v22 = vpop.permute.xlu1 %1039 }
 0x615   :  { %v1109_v61 = vmul.f32 %v7009_v31, %v1040_v22  ;;  %v1030_v7 = vpop.permute.xlu0 %1029 }
 0x616   :  { %v1107_v42 = vmul.f32 %v1030_v7, %v8389_v13 }
 0x617   :  { %1126 = vst.msk [vmem:[#allocation2 + $0x10] sm:$0xff] %vm1123_vm2, %v1109_v61 }
 0x618   :  { %1124 = vst.msk [vmem:[#allocation2] sm:$0xff] %vm1123_vm2, %v1107_v42  ;;  %v1045_v11 = vpop.permute.xlu1 %1044 }
 0x619   :  { %v1110_v24 = vmul.f32 %v8390_v0, %v1045_v11 }
 0x61b   :  { %1127 = vst.msk [vmem:[#allocation2 + $0x18] sm:$0xff] %vm1123_vm2, %v1110_v24 }
 0x61c   :  { %v1035_v38 = vpop.permute.xlu1 %1034 }
 0x61d   :  { %v1108_v56 = vmul.f32 %v1035_v38, %v8391_v29 }
 0x61f   :  { %1125 = vst.msk [vmem:[#allocation2 + $0x8] sm:$0xff] %vm1123_vm2, %v1108_v56 }
 0x620   :  { %v1060_v5 = vpop.permute.xlu1 %1059 }
 0x621   :  { %v1113_v31 = vmul.f32 %v8392_v41, %v1060_v5  ;;  %v1065_v4 = vpop.permute.xlu0 %1064 }
 0x622   :  { %v1114_v17 = vmul.f32 %v8393_v63, %v1065_v4 }
 0x623   :  { %1130 = vst.msk [vmem:[#allocation2 + $0x30] sm:$0xff] %vm1123_vm2, %v1113_v31 }
 0x624   :  { %v1050_v46 = vpop.permute.xlu1 %1049  ;;  %1131 = vst.msk [vmem:[#allocation2 + $0x38] sm:$0xff] %vm1123_vm2, %v1114_v17 }
 0x625   :  { %v1111_v9 = vmul.f32 %v1050_v46, %v7028_v37 }
 0x626   :  { %v1055_v54 = vpop.permute.xlu0 %1054 }
 0x627   :  { %v1112_v10 = vmul.f32 %v1055_v54, %v7033_v20  ;;  %1128 = vst.msk [vmem:[#allocation2 + $0x20] sm:$0xff] %vm1123_vm2, %v1111_v9 }
 0x628   :  { %v1080_v53 = vpop.permute.xlu1 %1079 }
 0x629   :  { %1129 = vst.msk [vmem:[#allocation2 + $0x28] sm:$0xff] %vm1123_vm2, %v1112_v10  ;;  %v1117_v19 = vmul.f32 %v7040_v26, %v1080_v53 }
 0x62a   :  { %v1085_v45 = vpop.permute.xlu0 %1084 }
 0x62b   :  { %v1118_v1 = vmul.f32 %v8394_v59, %v1085_v45  ;;  %1134 = vst.msk [vmem:[#allocation2 + $0x50] sm:$0xff] %vm1123_vm2, %v1117_v19 }
 0x62c   :  { %v1070_v18 = vpop.permute.xlu1 %1069 }
 0x62d   :  { %1135 = vst.msk [vmem:[#allocation2 + $0x58] sm:$0xff] %vm1123_vm2, %v1118_v1  ;;  %v1115_v37 = vmul.f32 %v1070_v18, %v7043_v50 }
 0x62e   :  { %v1075_v51 = vpop.permute.xlu0 %1074 }
 0x62f   :  { %v1116_v20 = vmul.f32 %v1075_v51, %v7049_v12  ;;  %1132 = vst.msk [vmem:[#allocation2 + $0x40] sm:$0xff] %vm1123_vm2, %v1115_v37 }
 0x630   :  { %v1100_v30 = vpop.permute.xlu1 %1099 }
 0x631   :  { %1133 = vst.msk [vmem:[#allocation2 + $0x48] sm:$0xff] %vm1123_vm2, %v1116_v20  ;;  %v1121_v26 = vmul.f32 %v7056_v49, %v1100_v30 }
 0x632   :  { %v1105_v23 = vpop.permute.xlu0 %1104 }
 0x633   :  { %v1122_v44 = vmul.f32 %v8395_v27, %v1105_v23  ;;  %1138 = vst.msk [vmem:[#allocation2 + $0x70] sm:$0xff] %vm1123_vm2, %v1121_v26 }
 0x634   :  { %v1090_v43 = vpop.permute.xlu1 %1089 }
 0x635   :  { %1139 = vst.msk [vmem:[#allocation2 + $0x78] sm:$0xff] %vm1123_vm2, %v1122_v44  ;;  %v1119_v50 = vmul.f32 %v1090_v43, %v7059_v57 }
 0x636   :  { %v1095_v55 = vpop.permute.xlu0 %1094 }
 0x637   :  { %v1120_v12 = vmul.f32 %v1095_v55, %v7065_v58  ;;  %1136 = vst.msk [vmem:[#allocation2 + $0x60] sm:$0xff] %vm1123_vm2, %v1119_v50 }
 0x639   :  { %1137 = vst.msk [vmem:[#allocation2 + $0x68] sm:$0xff] %vm1123_vm2, %v1120_v12 }
 0x67b   :  { %v7152_v15 = vpop.f32.mrb[40].mxu1 }
 0x67c   :  { %v1555_v49 = vmax.f32 %v7152_v15, 1e-09  ;;  %v7155_v40 = vpop.f32.mrb[41].mxu1 }
 0x67d   :  { %v7157_v52 = vpop.f32.mrb[42].mxu1  ;;  %v1553_v48 = vmax.f32 %v7155_v40, 1e-09 }
 0x67e   :  { %5363 = vrcp.f32 %v1555_v49  ;;  %v7159_v60 = vpop.f32.mrb[43].mxu1  ;;  %v1556_v0 = vmax.f32 %v7157_v52, 1e-09 }
 0x67f   :  { %v1554_v56 = vmax.f32 %v7159_v60, 1e-09 }
 0x683   :  { %v7161_v35 = vpop.f32.mrb[44].mxu1 }
 0x684   :  { %v7163_v57 = vpop.f32.mrb[45].mxu1  ;;  %v1559_v17 = vmax.f32 %v7161_v35, 1e-09 }
 0x685   :  { %v7165_v58 = vpop.f32.mrb[46].mxu1  ;;  %v1557_v51 = vmax.f32 %v7163_v57, 1e-09 }
 0x686   :  { %v7167_v33 = vpop.f32.mrb[47].mxu1  ;;  %v1560_v13 = vmax.f32 %v7165_v58, 1e-09 }
 0x687   :  { %v1558_v10 = vmax.f32 %v7167_v33, 1e-09 }
 0x688   :  { %v5364_v34 = vpop.eup %5363 }
 0x689   :  { %1597 = vperm.xlu1 %5197, %v5364_v34  }
 0x68b   :  { %v7169_v32 = vpop.f32.mrb[48].mxu1 }
 0x68c   :  { %v7171_v36 = vpop.f32.mrb[49].mxu1  ;;  %v1563_v49 = vmax.f32 %v7169_v32, 1e-09 }
 0x68d   :  { %v7173_v21 = vpop.f32.mrb[50].mxu1 }
 0x68e   :  { %v7175_v25 = vpop.f32.mrb[51].mxu1  ;;  %v1564_v26 = vmax.f32 %v7173_v21, 1e-09 }
 0x693   :  { %v7177_v6 = vpop.f32.mrb[52].mxu1 }
 0x694   :  { %v7179_v14 = vpop.f32.mrb[53].mxu1 }
 0x695   :  { %v7181_v28 = vpop.f32.mrb[54].mxu1 }
 0x696   :  { %v7183_v3 = vpop.f32.mrb[55].mxu1 }
 0x6a1   :  { %v7185_v8 = vpop.f32.mrb[40].mxu0 }
 0x6a2   :  { %v2097_v16 = vmax.f32 %v7185_v8, 1e-09  ;;  %v7188_v47 = vpop.f32.mrb[41].mxu0 }
 0x6a3   :  { %v7190_v2 = vpop.f32.mrb[42].mxu0  ;;  %v2095_v61 = vmax.f32 %v7188_v47, 1e-09 }
 0x6a4   :  { %5365 = vrcp.f32 %v2097_v16  ;;  %v2098_v62 = vmax.f32 %v7190_v2, 1e-09  ;;  %v7194_v39 = vpop.f32.mrb[43].mxu0 }
 0x6a5   :  { %v2096_v22 = vmax.f32 %v7194_v39, 1e-09 }
 0x6a6   :  { %5367 = vrcp.f32 %v2098_v62  ;;  %v1562_v62 = vmax.f32 %v7175_v25, 1e-09 }
 0x6a7   :  { %5369 = vrcp.f32 %v1553_v48 }
 0x6a8   :  { %5371 = vrcp.f32 %v2096_v22 }
 0x6a9   :  { %v7198_v7 = vpop.f32.mrb[56].mxu1  ;;  %5373 = vrcp.f32 %v2095_v61 }
 0x6aa   :  { %v7201_v42 = vpop.f32.mrb[57].mxu1  ;;  %5375 = vrcp.f32 %v1560_v13 }
 0x6ab   :  { %v7203_v11 = vpop.f32.mrb[58].mxu1  ;;  %5377 = vrcp.f32 %v1556_v0 }
 0x6ac   :  { %v7206_v24 = vpop.f32.mrb[59].mxu1  ;;  %5379 = vrcp.f32 %v1554_v56 }
 0x6ae   :  { %v5366_v38 = vpop.eup %5365 }
 0x6af   :  { %2139 = vperm.xlu1 %5197, %v5366_v38  }
 0x6b0   :  { %v5368_v29 = vpop.eup %5367 }
 0x6b1   :  { %v7209_v5 = vpop.f32.mrb[44].mxu0  ;;  %2144 = vperm.xlu0 %5198, %v5368_v29   ;;  %v5370_v41 = vpop.eup %5369 }
 0x6b2   :  { %v7211_v31 = vpop.f32.mrb[45].mxu0  ;;  %v5372_v63 = vpop.eup %5371  ;;  %v2101_v19 = vmax.f32 %v7209_v5, 1e-09 }
 0x6b3   :  { %1587 = vperm.xlu1 %5197, %v5370_v41   ;;  %v7213_v4 = vpop.f32.mrb[46].mxu0  ;;  %v5374_v54 = vpop.eup %5373  ;;  %v2099_v27 = vmax.f32 %v7211_v31, 1e-09 }
 0x6b4   :  { %v2102_v46 = vmax.f32 %v7213_v4, 1e-09  ;;  %v7217_v9 = vpop.f32.mrb[47].mxu0  ;;  %v5376_v53 = vpop.eup %5375 }
 0x6b5   :  { %2134 = vperm.xlu0 %5198, %v5372_v63   ;;  %v5378_v59 = vpop.eup %5377  ;;  %v2100_v1 = vmax.f32 %v7217_v9, 1e-09  ;;  %v1561_v63 = vmax.f32 %v7171_v36, 1e-09 }
 0x6b6   :  { %5381 = vrcp.f32 %v2102_v46  ;;  %v5380_v30 = vpop.eup %5379 }
 0x6b7   :  { %2129 = vperm.xlu1 %5197, %v5374_v54   ;;  %5383 = vrcp.f32 %v1559_v17  ;;  %v1568_v54 = vmax.f32 %v7181_v28, 1e-09 }
 0x6b8   :  { %5385 = vrcp.f32 %v1558_v10 }
 0x6b9   :  { %v7221_v45 = vpop.f32.mrb[60].mxu1  ;;  %1622 = vperm.xlu0 %5198, %v5376_v53   ;;  %5387 = vrcp.f32 %v2101_v19 }
 0x6ba   :  { %v7224_v18 = vpop.f32.mrb[61].mxu1  ;;  %5389 = vrcp.f32 %v2100_v1  ;;  %v1566_v1 = vmax.f32 %v7183_v3, 1e-09 }
 0x6bb   :  { %v7226_v37 = vpop.f32.mrb[62].mxu1  ;;  %1602 = vperm.xlu1 %5197, %v5378_v59   ;;  %5391 = vrcp.f32 %v1557_v51 }
 0x6bc   :  { %v7229_v20 = vpop.f32.mrb[63].mxu1  ;;  %5393 = vrcp.f32 %v1564_v26 }
 0x6bd   :  { %5395 = vrcp.f32 %v2099_v27 }
 0x6bf   :  { %1592 = vperm.xlu1 %5197, %v5380_v30  }
 0x6c0   :  { %v5382_v23 = vpop.eup %5381 }
 0x6c1   :  { %v7233_v44 = vpop.f32.mrb[48].mxu0  ;;  %2164 = vperm.xlu0 %5198, %v5382_v23   ;;  %v5384_v43 = vpop.eup %5383  ;;  %v1567_v23 = vmax.f32 %v7177_v6, 1e-09 }
 0x6c2   :  { %v7235_v50 = vpop.f32.mrb[49].mxu0  ;;  %v5386_v12 = vpop.eup %5385  ;;  %v2105_v61 = vmax.f32 %v7233_v44, 1e-09 }
 0x6c3   :  { %1617 = vperm.xlu1 %5197, %v5384_v43   ;;  %v7237_v55 = vpop.f32.mrb[50].mxu0  ;;  %v5388_v48 = vpop.eup %5387  ;;  %v2103_v53 = vmax.f32 %v7235_v50, 1e-09 }
 0x6c4   :  { %v2106_v34 = vmax.f32 %v7237_v55, 1e-09  ;;  %v7241_v16 = vpop.f32.mrb[51].mxu0  ;;  %v5390_v22 = vpop.eup %5389 }
 0x6c5   :  { %1612 = vperm.xlu0 %5198, %v5386_v12   ;;  %v5392_v0 = vpop.eup %5391  ;;  %v2104_v38 = vmax.f32 %v7241_v16, 1e-09 }
 0x6c6   :  { %5397 = vrcp.f32 %v2106_v34  ;;  %v5394_v41 = vpop.eup %5393  ;;  %v1565_v34 = vmax.f32 %v7179_v14, 1e-09 }
 0x6c7   :  { %2159 = vperm.xlu1 %5197, %v5388_v48   ;;  %5399 = vrcp.f32 %v1563_v49  ;;  %v5396_v46 = vpop.eup %5395 }
 0x6c8   :  { %5401 = vrcp.f32 %v1562_v62 }
 0x6c9   :  { %v7245_v13 = vpop.f32.mrb[64].mxu1  ;;  %2154 = vperm.xlu0 %5198, %v5390_v22   ;;  %5403 = vrcp.f32 %v2105_v61  ;;  %v2640_v22 = vmax.f32 %v7203_v11, 1e-09 }
 0x6ca   :  { %v7248_v29 = vpop.f32.mrb[65].mxu1  ;;  %5405 = vrcp.f32 %v2104_v38 }
 0x6cb   :  { %v7250_v56 = vpop.f32.mrb[66].mxu1  ;;  %1607 = vperm.xlu1 %5197, %v5392_v0   ;;  %5407 = vrcp.f32 %v1561_v63 }
 0x6cc   :  { %v7253_v17 = vpop.f32.mrb[67].mxu1  ;;  %5409 = vrcp.f32 %v1568_v54  ;;  %v2638_v54 = vmax.f32 %v7206_v24, 1e-09 }
 0x6cd   :  { %1642 = vperm.xlu0 %5198, %v5394_v41   ;;  %5411 = vrcp.f32 %v2103_v53  ;;  %v2639_v53 = vmax.f32 %v7198_v7, 1e-09 }
 0x6ce   :  { %5413 = vrcp.f32 %v1566_v1  ;;  %v2644_v1 = vmax.f32 %v7226_v37, 1e-09 }
 0x6cf   :  { %2149 = vperm.xlu1 %5197, %v5396_v46   ;;  %5415 = vrcp.f32 %v1567_v23  ;;  %v2637_v23 = vmax.f32 %v7201_v42, 1e-09 }
 0x6d0   :  { %v5398_v10 = vpop.eup %5397 }
 0x6d1   :  { %v7257_v19 = vpop.f32.mrb[52].mxu0  ;;  %2184 = vperm.xlu0 %5198, %v5398_v10   ;;  %v5400_v59 = vpop.eup %5399 }
 0x6d2   :  { %v7260_v51 = vpop.f32.mrb[53].mxu0  ;;  %v5402_v26 = vpop.eup %5401 }
 0x6d3   :  { %1637 = vperm.xlu1 %5197, %v5400_v59   ;;  %v7262_v30 = vpop.f32.mrb[54].mxu0  ;;  %v5404_v43 = vpop.eup %5403  ;;  %v2107_v41 = vmax.f32 %v7260_v51, 1e-09 }
 0x6d4   :  { %v7265_v27 = vpop.f32.mrb[55].mxu0  ;;  %v5406_v49 = vpop.eup %5405 }
 0x6d5   :  { %1632 = vperm.xlu0 %5198, %v5402_v26   ;;  %v2108_v12 = vmax.f32 %v7265_v27, 1e-09  ;;  %v5408_v62 = vpop.eup %5407 }
 0x6d6   :  { %v5410_v38 = vpop.eup %5409 }
 0x6d7   :  { %2179 = vperm.xlu1 %5197, %v5404_v43   ;;  %5417 = vrcp.f32 %v2108_v12  ;;  %v5412_v46 = vpop.eup %5411  ;;  %v2642_v12 = vmax.f32 %v7229_v20, 1e-09 }
 0x6d8   :  { %5419 = vrcp.f32 %v1565_v34  ;;  %v5414_v10 = vpop.eup %5413  ;;  %v2643_v34 = vmax.f32 %v7221_v45, 1e-09 }
 0x6d9   :  { %v7269_v48 = vpop.f32.mrb[68].mxu1  ;;  %2174 = vperm.xlu0 %5198, %v5406_v49   ;;  %5421 = vrcp.f32 %v2640_v22  ;;  %v5416_v59 = vpop.eup %5415  ;;  %v2648_v22 = vmax.f32 %v7250_v56, 1e-09 }
 0x6da   :  { %v7272_v61 = vpop.f32.mrb[69].mxu1  ;;  %5423 = vrcp.f32 %v2107_v41  ;;  %v2641_v41 = vmax.f32 %v7224_v18, 1e-09 }
 0x6db   :  { %v7274_v0 = vpop.f32.mrb[70].mxu1  ;;  %1627 = vperm.xlu1 %5197, %v5408_v62   ;;  %5425 = vrcp.f32 %v2638_v54  ;;  %v2646_v54 = vmax.f32 %v7253_v17, 1e-09 }
 0x6dc   :  { %v7277_v63 = vpop.f32.mrb[71].mxu1  ;;  %5427 = vrcp.f32 %v2639_v53  ;;  %v2647_v53 = vmax.f32 %v7245_v13, 1e-09 }
 0x6dd   :  { %1662 = vperm.xlu0 %5198, %v5410_v38   ;;  %5429 = vrcp.f32 %v2644_v1  ;;  %v2110_v1 = vmax.f32 %v7262_v30, 1e-09 }
 0x6de   :  { %5431 = vrcp.f32 %v2637_v23  ;;  %v2645_v23 = vmax.f32 %v7248_v29, 1e-09 }
 0x6df   :  { %2169 = vperm.xlu1 %5197, %v5412_v46   ;;  %5433 = vrcp.f32 %v2642_v12  ;;  %v2650_v12 = vmax.f32 %v7277_v63, 1e-09 }
 0x6e0   :  { %5435 = vrcp.f32 %v2643_v34  ;;  %v2109_v34 = vmax.f32 %v7257_v19, 1e-09 }
 0x6e1   :  { %1652 = vperm.xlu0 %5198, %v5414_v10   ;;  %v5418_v26 = vpop.eup %5417  ;;  %5437 = vrcp.f32 %v2648_v22  ;;  %v2652_v22 = vmax.f32 %v7274_v0, 1e-09 }
 0x6e2   :  { %v5420_v43 = vpop.eup %5419  ;;  %5439 = vrcp.f32 %v2641_v41  ;;  %v2949_v41 = vld [vmem:[%s8076_s9 + $0x8] sm:$0xff] }
 0x6e3   :  { %1657 = vperm.xlu1 %5197, %v5416_v59   ;;  %v5422_v49 = vpop.eup %5421  ;;  %5441 = vrcp.f32 %v2646_v54 }
 0x6e4   :  { %v5424_v62 = vpop.eup %5423  ;;  %5443 = vrcp.f32 %v2647_v53 }
 0x6e5   :  { %2194 = vperm.xlu0 %5198, %v5418_v26   ;;  %v5426_v38 = vpop.eup %5425  ;;  %5445 = vrcp.f32 %v2110_v1  ;;  %v2651_v1 = vmax.f32 %v7269_v48, 1e-09 }
 0x6e6   :  { %v5428_v46 = vpop.eup %5427  ;;  %5447 = vrcp.f32 %v2645_v23 }
 0x6e7   :  { %1647 = vperm.xlu1 %5197, %v5420_v43   ;;  %v5430_v10 = vpop.eup %5429  ;;  %5449 = vrcp.f32 %v2650_v12 }
 0x6e8   :  { %v5432_v59 = vpop.eup %5431  ;;  %5451 = vrcp.f32 %v2109_v34 }
 0x6e9   :  { %2686 = vperm.xlu0 %5198, %v5422_v49   ;;  %v5434_v26 = vpop.eup %5433  ;;  %5453 = vrcp.f32 %v2652_v22  ;;  %v2951_v22 = vld [vmem:[%s8076_s9 + $0x18] sm:$0xff] }
 0x6ea   :  { %v5436_v43 = vpop.eup %5435 }
 0x6eb   :  { %2189 = vperm.xlu1 %5197, %v5424_v62   ;;  %v5438_v49 = vpop.eup %5437 }
 0x6ec   :  { %v5440_v62 = vpop.eup %5439 }
 0x6ed   :  { %2676 = vperm.xlu0 %5198, %v5426_v38   ;;  %v2948_v38 = vld [vmem:[%s8076_s9] sm:$0xff]  ;;  %v5442_v54 = vpop.eup %5441 }
 0x6ee   :  { %v5444_v53 = vpop.eup %5443 }
 0x6ef   :  { %2681 = vperm.xlu1 %5197, %v5428_v46   ;;  %v2952_v46 = vpack.c.bf16 %v2949_v41, %v2948_v38 }
 0x6f1   :  { %2706 = vperm.xlu0 %5198, %v5430_v10   ;;  %v2649_v10 = vmax.f32 %v7272_v61, 1e-09  ;;  %4975 = vmatprep.subr.bf16.mxu0 %v2952_v46 }
 0x6f2   :  { %4976 = vmatpush3.bf16.msra.mxu0 %v2952_v46  ;;  %v8396_v46 = vmov 0  }
 0x6f3   :  { %2671 = vperm.xlu1 %5197, %v5432_v59   ;;  %v5446_v59 = vpop.eup %5445  ;;  %5455 = vrcp.f32 %v2649_v10 }
 0x6f4   :  { %5457 = vrcp.f32 %v2651_v1 }
 0x6f5   :  { %2696 = vperm.xlu0 %5198, %v5434_v26   ;;  %v5448_v26 = vpop.eup %5447 }
 0x6f6   :  { %v5450_v23 = vpop.eup %5449 }
 0x6f7   :  { %2701 = vperm.xlu1 %5197, %v5436_v43   ;;  %v5452_v43 = vpop.eup %5451 }
 0x6f8   :  { %v5454_v12 = vpop.eup %5453 }
 0x6f9   :  { %2726 = vperm.xlu0 %5198, %v5438_v49  }
 0x6fb   :  { %2691 = vperm.xlu1 %5197, %v5440_v62   ;;  %v2950_v62 = vld [vmem:[%s8076_s9 + $0x10] sm:$0xff] }
 0x6fc   :  { %v2953_v41 = vpack.c.bf16 %v2951_v22, %v2950_v62 }
 0x6fd   :  { %2716 = vperm.xlu0 %5198, %v5442_v54   ;;  %v5456_v38 = vpop.eup %5455 }
 0x6fe   :  { %4977 = vmatprep.subr.bf16.mxu0 %v2953_v41  ;;  %v5458_v54 = vpop.eup %5457 }
 0x6ff   :  { %2721 = vperm.xlu1 %5197, %v5444_v53   ;;  %4978 = vmatpush3.bf16.msra.mxu0 %v2953_v41 }
 0x701   :  { %2204 = vperm.xlu0 %5198, %v5446_v59  }
 0x703   :  { %2711 = vperm.xlu1 %5197, %v5448_v26   ;;  %v3226_v26 = vld [vmem:[%s8077_s11] sm:$0xff] }
 0x705   :  { %2736 = vperm.xlu0 %5198, %v5450_v23   ;;  %v3227_v23 = vld [vmem:[%s8077_s11 + $0x8] sm:$0xff] }
 0x707   :  { %2199 = vperm.xlu1 %5197, %v5452_v43  }
 0x708   :  { %v1598_v49 = vpop.permute.xlu1 %1597 }
 0x709   :  { %v1667_v34 = vmul.f32 %v7152_v15, %v1598_v49  ;;  %2746 = vperm.xlu0 %5198, %v5454_v12   ;;  %v7321_v12 = vpack.c.bf16 %v3227_v23, %v3226_v26  ;;  %v3108_v49 = vld [vmem:[%s8078_s10 + $0x8] sm:$0xff] }
 0x70b   :  { %1684 = vst.msk [vmem:[#allocation2 + $0x10] sm:$0xff] %vm1681_vm3, %v1667_v34  ;;  %2731 = vperm.xlu1 %5197, %v5456_v38   ;;  %5015 = vmatprep.subr.bf16.mxu0 %v7321_v12 }
 0x70d   :  { %5200 = vset.pattern.permute.xlu0 %v8396_v46 }
 0x70f   :  { %2741 = vperm.xlu1 %5197, %v5458_v54  }
 0x713   :  { %5199 = vset.pattern.permute.xlu1 %v8396_v46 }
 0x72e   :  { %v2140_v15 = vpop.permute.xlu1 %2139 }
 0x72f   :  { %v2209_v10 = vmul.f32 %v7185_v8, %v2140_v15  ;;  %v3107_v8 = vld [vmem:[%s8078_s10] sm:$0xff] }
 0x730   :  { %v2145_v53 = vpop.permute.xlu0 %2144 }
 0x731   :  { %2226 = vst.msk [vmem:[#allocation2 + $0x10] sm:$0xff] %vm2223_vm4, %v2209_v10  ;;  %v2210_v54 = vmul.f32 %v7190_v2, %v2145_v53 }
 0x732   :  { %v1588_v59 = vpop.permute.xlu1 %1587 }
 0x733   :  { %v1665_v1 = vmul.f32 %v1588_v59, %v7155_v40  ;;  %v3111_v40 = vpack.c.bf16 %v3108_v49, %v3107_v8 }
 0x734   :  { %v2135_v43 = vpop.permute.xlu0 %2134 }
 0x735   :  { %1682 = vst.msk [vmem:[#allocation2] sm:$0xff] %vm1681_vm3, %v1665_v1  ;;  %4995 = vmatprep.subr.bf16.mxu1 %v3111_v40  ;;  %v2208_v10 = vmul.f32 %v2135_v43, %v7194_v39 }
 0x736   :  { %v2130_v34 = vpop.permute.xlu1 %2129  ;;  %4996 = vmatpush3.bf16.msra.mxu1 %v3111_v40 }
 0x737   :  { %v2207_v62 = vmul.f32 %v2130_v34, %v7188_v47 }
 0x738   :  { %v1623_v22 = vpop.permute.xlu0 %1622 }
 0x739   :  { %2224 = vst.msk [vmem:[#allocation2] sm:$0xff] %vm2223_vm4, %v2207_v62  ;;  %v1672_v38 = vmul.f32 %v7165_v58, %v1623_v22 }
 0x73a   :  { %v1603_v41 = vpop.permute.xlu1 %1602 }
 0x73b   :  { %1689 = vst.msk [vmem:[#allocation2 + $0x38] sm:$0xff] %vm1681_vm3, %v1672_v38  ;;  %v1668_v46 = vmul.f32 %v7157_v52, %v1603_v41 }
 0x73d   :  { %1685 = vst.msk [vmem:[#allocation2 + $0x18] sm:$0xff] %vm1681_vm3, %v1668_v46 }
 0x73e   :  { %2227 = vst.msk [vmem:[#allocation2 + $0x18] sm:$0xff] %vm2223_vm4, %v2210_v54  ;;  %v1593_v15 = vpop.permute.xlu1 %1592 }
 0x73f   :  { %v1666_v47 = vmul.f32 %v1593_v15, %v7159_v60 }
 0x740   :  { %v2165_v59 = vpop.permute.xlu0 %2164 }
 0x741   :  { %1683 = vst.msk [vmem:[#allocation2 + $0x8] sm:$0xff] %vm1681_vm3, %v1666_v47  ;;  %v2214_v58 = vmul.f32 %v7213_v4, %v2165_v59 }
 0x742   :  { %2225 = vst.msk [vmem:[#allocation2 + $0x8] sm:$0xff] %vm2223_vm4, %v2208_v10  ;;  %v1618_v1 = vpop.permute.xlu1 %1617 }
 0x743   :  { %2231 = vst.msk [vmem:[#allocation2 + $0x38] sm:$0xff] %vm2223_vm4, %v2214_v58  ;;  %v1671_v52 = vmul.f32 %v7161_v35, %v1618_v1 }
 0x744   :  { %v1613_v2 = vpop.permute.xlu0 %1612 }
 0x745   :  { %1688 = vst.msk [vmem:[#allocation2 + $0x30] sm:$0xff] %vm1681_vm3, %v1671_v52  ;;  %v1670_v53 = vmul.f32 %v1613_v2, %v7167_v33 }
 0x746   :  { %v2160_v60 = vpop.permute.xlu1 %2159 }
 0x747   :  { %1687 = vst.msk [vmem:[#allocation2 + $0x28] sm:$0xff] %vm1681_vm3, %v1670_v53  ;;  %v2213_v39 = vmul.f32 %v7209_v5, %v2160_v60 }
 0x748   :  { %v2155_v26 = vpop.permute.xlu0 %2154 }
 0x749   :  { %2230 = vst.msk [vmem:[#allocation2 + $0x30] sm:$0xff] %vm2223_vm4, %v2213_v39  ;;  %v2212_v4 = vmul.f32 %v2155_v26, %v7217_v9 }
 0x74a   :  { %v1608_v23 = vpop.permute.xlu1 %1607 }
 0x74b   :  { %2229 = vst.msk [vmem:[#allocation2 + $0x28] sm:$0xff] %vm2223_vm4, %v2212_v4  ;;  %v1669_v35 = vmul.f32 %v1608_v23, %v7163_v57 }
 0x74c   :  { %v1643_v43 = vpop.permute.xlu0 %1642 }
 0x74d   :  { %1686 = vst.msk [vmem:[#allocation2 + $0x20] sm:$0xff] %vm1681_vm3, %v1669_v35  ;;  %v1676_v33 = vmul.f32 %v7173_v21, %v1643_v43 }
 0x74e   :  { %v2150_v8 = vpop.permute.xlu1 %2149 }
 0x74f   :  { %1693 = vst.msk [vmem:[#allocation2 + $0x58] sm:$0xff] %vm1681_vm3, %v1676_v33  ;;  %v2211_v5 = vmul.f32 %v2150_v8, %v7211_v31 }
 0x750   :  { %v2185_v49 = vpop.permute.xlu0 %2184 }
 0x751   :  { %2228 = vst.msk [vmem:[#allocation2 + $0x20] sm:$0xff] %vm2223_vm4, %v2211_v5  ;;  %v2218_v9 = vmul.f32 %v7237_v55, %v2185_v49 }
 0x752   :  { %v1638_v40 = vpop.permute.xlu1 %1637 }
 0x753   :  { %2235 = vst.msk [vmem:[#allocation2 + $0x58] sm:$0xff] %vm2223_vm4, %v2218_v9  ;;  %v1675_v57 = vmul.f32 %v7169_v32, %v1638_v40 }
 0x754   :  { %v1633_v34 = vpop.permute.xlu0 %1632 }
 0x755   :  { %1692 = vst.msk [vmem:[#allocation2 + $0x50] sm:$0xff] %vm1681_vm3, %v1675_v57  ;;  %v1674_v21 = vmul.f32 %v1633_v34, %v7175_v25 }
 0x756   :  { %v2180_v62 = vpop.permute.xlu1 %2179 }
 0x757   :  { %1691 = vst.msk [vmem:[#allocation2 + $0x48] sm:$0xff] %vm1681_vm3, %v1674_v21  ;;  %v2217_v31 = vmul.f32 %v7233_v44, %v2180_v62 }
 0x758   :  { %v2175_v22 = vpop.permute.xlu0 %2174 }
 0x759   :  { %2234 = vst.msk [vmem:[#allocation2 + $0x50] sm:$0xff] %vm2223_vm4, %v2217_v31  ;;  %v2216_v55 = vmul.f32 %v2175_v22, %v7241_v16 }
 0x75a   :  { %v1628_v38 = vpop.permute.xlu1 %1627 }
 0x75b   :  { %2233 = vst.msk [vmem:[#allocation2 + $0x48] sm:$0xff] %vm2223_vm4, %v2216_v55  ;;  %v1673_v32 = vmul.f32 %v1628_v38, %v7171_v36 }
 0x75c   :  { %v1663_v41 = vpop.permute.xlu0 %1662 }
 0x75d   :  { %1690 = vst.msk [vmem:[#allocation2 + $0x40] sm:$0xff] %vm1681_vm3, %v1673_v32  ;;  %v1680_v25 = vmul.f32 %v7181_v28, %v1663_v41 }
 0x75e   :  { %v2170_v46 = vpop.permute.xlu1 %2169 }
 0x75f   :  { %1697 = vst.msk [vmem:[#allocation2 + $0x78] sm:$0xff] %vm1681_vm3, %v1680_v25  ;;  %v2215_v44 = vmul.f32 %v2170_v46, %v7235_v50 }
 0x760   :  { %v1653_v54 = vpop.permute.xlu0 %1652 }
 0x761   :  { %2232 = vst.msk [vmem:[#allocation2 + $0x40] sm:$0xff] %vm2223_vm4, %v2215_v44  ;;  %v1678_v16 = vmul.f32 %v1653_v54, %v7183_v3 }
 0x762   :  { %v1658_v15 = vpop.permute.xlu1 %1657 }
 0x763   :  { %1695 = vst.msk [vmem:[#allocation2 + $0x68] sm:$0xff] %vm1681_vm3, %v1678_v16  ;;  %v1679_v36 = vmul.f32 %v7177_v6, %v1658_v15 }
 0x764   :  { %v2195_v47 = vpop.permute.xlu0 %2194 }
 0x765   :  { %1696 = vst.msk [vmem:[#allocation2 + $0x70] sm:$0xff] %vm1681_vm3, %v1679_v36  ;;  %v2220_v28 = vmul.f32 %v2195_v47, %v7265_v27 }
 0x766   :  { %v1648_v10 = vpop.permute.xlu1 %1647 }
 0x767   :  { %2237 = vst.msk [vmem:[#allocation2 + $0x68] sm:$0xff] %vm2223_vm4, %v2220_v28  ;;  %v1677_v50 = vmul.f32 %v1648_v10, %v7179_v14 }
 0x768   :  { %v2687_v59 = vpop.permute.xlu0 %2686 }
 0x769   :  { %1694 = vst.msk [vmem:[#allocation2 + $0x60] sm:$0xff] %vm1681_vm3, %v1677_v50  ;;  %v2752_v3 = vmul.f32 %v7203_v11, %v2687_v59  ;;  %v7393_v11 = vld [vmem:[%s8079_s7] ss:$0 sm:$0xff] }
 0x76a   :  { %v2190_v58 = vpop.permute.xlu1 %2189 }
 0x76b   :  { %2769 = vst.msk [vmem:[#allocation2 + $0x18] sm:$0xff] %vm2765_vm5, %v2752_v3  ;;  %v2219_v6 = vmul.f32 %v2190_v58, %v7260_v51 }
 0x76c   :  { %v2677_v1 = vpop.permute.xlu0 %2676 }
 0x76d   :  { %2236 = vst.msk [vmem:[#allocation2 + $0x60] sm:$0xff] %vm2223_vm4, %v2219_v6  ;;  %v2750_v27 = vmul.f32 %v2677_v1, %v7206_v24 }
 0x76e   :  { %v2682_v52 = vpop.permute.xlu1 %2681 }
 0x76f   :  { %2767 = vst.msk [vmem:[#allocation2 + $0x8] sm:$0xff] %vm2765_vm5, %v2750_v27  ;;  %v2751_v14 = vmul.f32 %v7198_v7, %v2682_v52  ;;  %v7402_v7 = vld [vmem:[%s8080_s8] ss:$0 sm:$0xff] }
 0x770   :  { %v2707_v2 = vpop.permute.xlu0 %2706 }
 0x771   :  { %2768 = vst.msk [vmem:[#allocation2 + $0x10] sm:$0xff] %vm2765_vm5, %v2751_v14  ;;  %v2756_v51 = vmul.f32 %v7226_v37, %v2707_v2 }
 0x772   :  { %v2672_v53 = vpop.permute.xlu1 %2671  ;;  %v2785_v60 = vld [vmem:[#allocation2 + $0x18] sm:$0xff] }
 0x773   :  { %2773 = vst.msk [vmem:[#allocation2 + $0x38] sm:$0xff] %vm2765_vm5, %v2756_v51  ;;  %v2749_v24 = vmul.f32 %v2672_v53, %v7201_v42  ;;  %v2808_v39 = vmul.f32 %v7393_v11, %v2785_v60 }
 0x774   :  { %v2697_v26 = vpop.permute.xlu0 %2696 }
 0x775   :  { %2766 = vst.msk [vmem:[#allocation2] sm:$0xff] %vm2765_vm5, %v2749_v24  ;;  %v2754_v4 = vmul.f32 %v2697_v26, %v7229_v20  ;;  %v7408_v35 = vadd.f32 %v7402_v7, %v2808_v39 }
 0x776   :  { %v2702_v23 = vpop.permute.xlu1 %2701  ;;  %v2783_v37 = vld [vmem:[#allocation2 + $0x8] sm:$0xff] }
 0x777   :  { %2771 = vst.msk [vmem:[#allocation2 + $0x28] sm:$0xff] %vm2765_vm5, %v2754_v4  ;;  %v2755_v42 = vmul.f32 %v7221_v45, %v2702_v23  ;;  %v2806_v43 = vmul.f32 %v7393_v11, %v2783_v37  ;;  %v2866_v40 = vmul.f32 1.442695, %v7408_v35  ;;  %vm2847_vm7 = vcmp.gt.f32.partialorder %v7408_v35, 0.0 }
 0x778   :  { %v2727_v33 = vpop.permute.xlu0 %2726  ;;  %v2784_v8 = vld [vmem:[#allocation2 + $0x10] sm:$0xff] }
 0x779   :  { %2772 = vst.msk [vmem:[#allocation2 + $0x30] sm:$0xff] %vm2765_vm5, %v2755_v42  ;;  %v2760_v5 = vmul.f32 %v7250_v56, %v2727_v33  ;;  %v7416_v49 = vadd.f32 %v7402_v7, %v2806_v43  ;;  %v2807_v20 = vmul.f32 %v7393_v11, %v2784_v8 }
 0x77a   :  { %v2692_v9 = vpop.permute.xlu1 %2691  ;;  %v2789_v57 = vld [vmem:[#allocation2 + $0x38] sm:$0xff] }
 0x77b   :  { %2777 = vst.msk [vmem:[#allocation2 + $0x58] sm:$0xff] %vm2765_vm5, %v2760_v5  ;;  %v2753_v45 = vmul.f32 %v2692_v9, %v7224_v18  ;;  %v2862_v34 = vmul.f32 1.442695, %v7416_v49  ;;  %v7424_v21 = vadd.f32 %v7402_v7, %v2807_v20  ;;  %v2812_v31 = vmul.f32 %v7393_v11, %v2789_v57 }
 0x77c   :  { %v2717_v62 = vpop.permute.xlu0 %2716  ;;  %v2782_v56 = vld [vmem:[#allocation2] sm:$0xff]  ;;  %vm2845_vm8 = vcmp.gt.f32.partialorder %v7416_v49, 0.0 }
 0x77d   :  { %2770 = vst.msk [vmem:[#allocation2 + $0x20] sm:$0xff] %vm2765_vm5, %v2753_v45  ;;  %v2758_v22 = vmul.f32 %v2717_v62, %v7253_v17  ;;  %v2805_v55 = vmul.f32 %v7393_v11, %v2782_v56  ;;  %5459 = vpow2.f32 %v2862_v34  ;;  %v2864_v32 = vmul.f32 1.442695, %v7424_v21 }
 0x77e   :  { %v2722_v38 = vpop.permute.xlu1 %2721  ;;  %5461 = vpow2.f32 %v2866_v40  ;;  %v2787_v18 = vld [vmem:[#allocation2 + $0x28] sm:$0xff]  ;;  %v7432_v41 = vadd.f32 %v7402_v7, %v2812_v31  ;;  %vm2846_vm6 = vcmp.gt.f32.partialorder %v7424_v21, 0.0 }
 0x77f   :  { %2775 = vst.msk [vmem:[#allocation2 + $0x48] sm:$0xff] %vm2765_vm5, %v2758_v22  ;;  %v2759_v25 = vmul.f32 %v7245_v13, %v2722_v38  ;;  %v7437_v46 = vadd.f32 %v7402_v7, %v2805_v55  ;;  %v2810_v17 = vmul.f32 %v7393_v11, %v2787_v18  ;;  %5463 = vpow2.f32 %v2864_v32 }
 0x780   :  { %v2205_v44 = vpop.permute.xlu0 %2204  ;;  %v2788_v54 = vld [vmem:[#allocation2 + $0x30] sm:$0xff]  ;;  %v2874_v28 = vmul.f32 1.442695, %v7432_v41  ;;  %vm2851_vm12 = vcmp.gt.f32.partialorder %v7432_v41, 0.0 }
 0x781   :  { %2776 = vst.msk [vmem:[#allocation2 + $0x50] sm:$0xff] %vm2765_vm5, %v2759_v25  ;;  %v2222_v16 = vmul.f32 %v7262_v30, %v2205_v44  ;;  %v2860_v15 = vmul.f32 1.442695, %v7437_v46  ;;  %v7444_v36 = vadd.f32 %v7402_v7, %v2810_v17  ;;  %v2811_v13 = vmul.f32 %v7393_v11, %v2788_v54  ;;  %v3228_v25 = vld [vmem:[%s8077_s11 + $0x10] sm:$0xff]  ;;  %v8397_v44 = vld [vmem:[#allocation6_spill] sm:$0xff] }
 0x782   :  { %v2712_v47 = vpop.permute.xlu1 %2711  ;;  %v2793_v10 = vld [vmem:[#allocation2 + $0x58] sm:$0xff]  ;;  %vm2844_vm9 = vcmp.gt.f32.partialorder %v7437_v46, 0.0 }
 0x783   :  { %2239 = vst.msk [vmem:[#allocation2 + $0x78] sm:$0xff] %vm2223_vm4, %v2222_v16  ;;  %v2757_v50 = vmul.f32 %v2712_v47, %v7248_v29  ;;  %5465 = vpow2.f32 %v2860_v15  ;;  %v2870_v59 = vmul.f32 1.442695, %v7444_v36  ;;  %v7452_v58 = vadd.f32 %v7402_v7, %v2811_v13  ;;  %v8399_v15 = vld [vmem:[#allocation5_spill] sm:$0xff] }
 0x784   :  { %v2737_v3 = vpop.permute.xlu0 %2736  ;;  %v2786_v30 = vld [vmem:[#allocation2 + $0x20] sm:$0xff]  ;;  %v2816_v6 = vmul.f32 %v7393_v11, %v2793_v10  ;;  %vm2849_vm11 = vcmp.gt.f32.partialorder %v7444_v36, 0.0 }
 0x785   :  { %2774 = vst.msk [vmem:[#allocation2 + $0x40] sm:$0xff] %vm2765_vm5, %v2757_v50  ;;  %v2762_v1 = vmul.f32 %v2737_v3, %v7277_v63  ;;  %v2809_v27 = vmul.f32 %v7393_v11, %v2786_v30  ;;  %5467 = vpow2.f32 %v2870_v59  ;;  %v2872_v29 = vmul.f32 1.442695, %v7452_v58  ;;  %v8400_v10 = vld [vmem:[#allocation3_spill] sm:$0xff] }
 0x786   :  { %v2200_v52 = vpop.permute.xlu1 %2199  ;;  %5469 = vpow2.f32 %v2874_v28  ;;  %v2791_v14 = vld [vmem:[#allocation2 + $0x48] sm:$0xff]  ;;  %v7460_v2 = vadd.f32 %v7402_v7, %v2816_v6  ;;  %vm2850_vm10 = vcmp.gt.f32.partialorder %v7452_v58, 0.0 }
 0x787   :  { %v5460_v51 = vpop.eup %5459  ;;  %2779 = vst.msk [vmem:[#allocation2 + $0x68] sm:$0xff] %vm2765_vm5, %v2762_v1  ;;  %v2221_v53 = vmul.f32 %v7257_v19, %v2200_v52  ;;  %v7465_v60 = vadd.f32 %v7402_v7, %v2809_v27  ;;  %v2814_v63 = vmul.f32 %v7393_v11, %v2791_v14  ;;  %5471 = vpow2.f32 %v2872_v29 }
 0x788   :  { %v5462_v24 = vpop.eup %5461  ;;  %v2747_v39 = vpop.permute.xlu0 %2746  ;;  %v2792_v26 = vld [vmem:[#allocation2 + $0x50] sm:$0xff]  ;;  %v2882_v19 = vmul.f32 1.442695, %v7460_v2  ;;  %v4508_v33 = vadd.f32 -1.0, %v5460_v51  ;;  %vm2855_vm3 = vcmp.gt.f32.partialorder %v7460_v2, 0.0 }
 0x789   :  { %2238 = vst.msk [vmem:[#allocation2 + $0x70] sm:$0xff] %vm2223_vm4, %v2221_v53  ;;  %v2764_v4 = vmul.f32 %v7274_v0, %v2747_v39  ;;  %v2868_v23 = vmul.f32 1.442695, %v7465_v60  ;;  %v7472_v37 = vadd.f32 %v7402_v7, %v2814_v63  ;;  %v5464_v42 = vpop.eup %5463  ;;  %v2815_v8 = vmul.f32 %v7393_v11, %v2792_v26 }
 0x78a   :  { %v2732_v43 = vpop.permute.xlu1 %2731  ;;  %v4509_v20 = vadd.f32 -1.0, %v5464_v42  ;;  %v4510_v9 = vadd.f32 -1.0, %v5462_v24  ;;  %v2909_v31 = vsel %vm2845_vm8, %v7416_v49, %v4508_v33  ;;  %v3229_v49 = vld [vmem:[%s8077_s11 + $0x18] sm:$0xff]  ;;  %vm2848_vm13 = vcmp.gt.f32.partialorder %v7465_v60, 0.0 }
 0x78b   :  { %2781 = vst.msk [vmem:[#allocation2 + $0x78] sm:$0xff] %vm2765_vm5, %v2764_v4  ;;  %v2761_v5 = vmul.f32 %v2732_v43, %v7272_v61  ;;  %5473 = vpow2.f32 %v2868_v23  ;;  %v2878_v40 = vmul.f32 1.442695, %v7472_v37  ;;  %v7482_v57 = vadd.f32 %v7402_v7, %v2815_v8 }
 0x78c   :  { %v2790_v0 = vld [vmem:[#allocation2 + $0x40] sm:$0xff]  ;;  %v2910_v61 = vsel %vm2846_vm6, %v7424_v21, %v4509_v20  ;;  %5475 = vpow2.f32 %v2882_v19  ;;  %v2911_v38 = vsel %vm2847_vm7, %v7408_v35, %v4510_v9  ;;  %v8398_v35 = vld [vmem:[#allocation4_spill] sm:$0xff]  ;;  %v7513_v47 = vadd.f32 %v2909_v31, %v8399_v15 }
 0x78d   :  { %v5466_v45 = vpop.eup %5465  ;;  %2778 = vst.msk [vmem:[#allocation2 + $0x60] sm:$0xff] %vm2765_vm5, %v2761_v5  ;;  %v2813_v34 = vmul.f32 %v7393_v11, %v2790_v0  ;;  %5477 = vpow2.f32 %v2878_v40  ;;  %v2880_v21 = vmul.f32 1.442695, %v7482_v57  ;;  %v7506_v54 = vadd.f32 %v2910_v61, %v8397_v44  ;;  %v8402_v20 = vld [vmem:[#allocation8_spill] sm:$0xff] }
 0x78e   :  { %v2742_v62 = vpop.permute.xlu1 %2741  ;;  %v4507_v56 = vadd.f32 -1.0, %v5466_v45  ;;  %v2795_v18 = vld [vmem:[#allocation2 + $0x68] sm:$0xff]  ;;  %v7517_v50 = vadd.f32 %v2911_v38, %v8400_v10  ;;  %v3231_v30 = vpack.c.bf16 %v3229_v49, %v3228_v25  ;;  %v8404_v45 = vld [vmem:[#allocation11_spill] sm:$0xff]  ;;  %vm2853_vm14 = vcmp.gt.f32.partialorder %v7472_v37, 0.0  ;;  %v8408_v10 = vld [vmem:[#allocation14_spill] sm:$0xff] }
 0x78f   :  { %v5468_v22 = vpop.eup %5467  ;;  %v2763_v55 = vmul.f32 %v7269_v48, %v2742_v62  ;;  %v7495_v32 = vadd.f32 %v7402_v7, %v2813_v34  ;;  %5479 = vpow2.f32 %v2880_v21  ;;  %vm2854_vm15 = vcmp.gt.f32.partialorder %v7482_v57, 0.0 }
 0x790   :  { %v5470_v17 = vpop.eup %5469  ;;  %v2908_v48 = vsel %vm2844_vm9, %v7437_v46, %v4507_v56  ;;  %v4512_v59 = vadd.f32 -1.0, %v5468_v22  ;;  %v2818_v46 = vmul.f32 %v7393_v11, %v2795_v18  ;;  %v2941_v52 = vpack.c.bf16 %v7517_v50, %v7506_v54 }
 0x791   :  { %2780 = vst.msk [vmem:[#allocation2 + $0x70] sm:$0xff] %vm2765_vm5, %v2763_v55  ;;  %v7510_v16 = vadd.f32 %v2908_v48, %v8398_v35  ;;  %v2876_v13 = vmul.f32 1.442695, %v7495_v32  ;;  %v5472_v28 = vpop.eup %5471  ;;  %v4514_v27 = vadd.f32 -1.0, %v5470_v17  ;;  %vm2852_vm4 = vcmp.gt.f32.partialorder %v7495_v32, 0.0  ;;  %v8405_v48 = vld [vmem:[#allocation13_spill] sm:$0xff] }
 0x792   :  { %v2797_v3 = vld [vmem:[#allocation2 + $0x78] sm:$0xff]  ;;  %v4513_v1 = vadd.f32 -1.0, %v5472_v28  ;;  %v7526_v14 = vadd.f32 %v7402_v7, %v2818_v46  ;;  %v2913_v26 = vsel %vm2849_vm11, %v7444_v36, %v4512_v59  ;;  %v8401_v36 = vld [vmem:[#allocation7_spill] sm:$0xff]  ;;  %v8406_v35 = vld [vmem:[#allocation9_spill] sm:$0xff] }
 0x793   :  { %v2940_v6 = vpack.c.bf16 %v7513_v47, %v7510_v16  ;;  %5481 = vpow2.f32 %v2876_v13  ;;  %v2820_v51 = vmul.f32 %v7393_v11, %v2797_v3  ;;  %v2915_v19 = vsel %vm2851_vm12, %v7432_v41, %v4514_v27  ;;  %v8403_v41 = vld [vmem:[#allocation12_spill] sm:$0xff]  ;;  %v8407_v13 = vld [vmem:[#allocation10_spill] sm:$0xff] }
 0x794   :  { %v2794_v29 = vld [vmem:[#allocation2 + $0x60] sm:$0xff]  ;;  %v2914_v63 = vsel %vm2850_vm10, %v7452_v58, %v4513_v1  ;;  %v2886_v4 = vmul.f32 1.442695, %v7526_v14  ;;  %v7552_v0 = vadd.f32 %v2913_v26, %v8403_v41  ;;  %v7555_v61 = vadd.f32 %v2915_v19, %v8404_v45  ;;  %v8412_v19 = vld [vmem:[#allocation18_spill] sm:$0xff] }
 0x795   :  { %v5474_v53 = vpop.eup %5473  ;;  %4979 = vmatprep.mubr.msk.bf16.mxu0 %vm253_vm1, %v2940_v6  ;;  %v2817_v24 = vmul.f32 %v7393_v11, %v2794_v29  ;;  %v7541_v58 = vadd.f32 %v7402_v7, %v2820_v51  ;;  %v7546_v8 = vadd.f32 %v2914_v63, %v8401_v36  ;;  %vm2857_vm5 = vcmp.gt.f32.partialorder %v7526_v14, 0.0  ;;  %v8410_v51 = vld [vmem:[#allocation16_spill] sm:$0xff] }
 0x796   :  { %4980 = vmatmul.mubr.msk.bf16.vlgmr.msra.gmra.mrb[56].mxu0 %vm253_vm1, %v2941_v52  ;;  %v4511_v39 = vadd.f32 -1.0, %v5474_v53  ;;  %v5476_v23 = vpop.eup %5475  ;;  %5483 = vpow2.f32 %v2886_v4  ;;  %v8409_v52 = vld [vmem:[#allocation15_spill] sm:$0xff]  ;;  %v8411_v4 = vld [vmem:[#allocation17_spill] sm:$0xff] }
 0x797   :  { %v2840_v42 = vadd.f32 %v7402_v7, %v2817_v24  ;;  %5016 = vmatpush3.bf16.msra.mxu0 %v7321_v12  ;;  %v5478_v43 = vpop.eup %5477  ;;  %v4518_v31 = vadd.f32 -1.0, %v5476_v23  ;;  %v2943_v22 = vpack.c.bf16 %v7555_v61, %v7546_v8  ;;  %vm2859_vm7 = vcmp.gt.f32.partialorder %v7541_v58, 0.0 }
 0x798   :  { %v2912_v33 = vsel %vm2848_vm13, %v7465_v60, %v4511_v39  ;;  %v2796_v5 = vld [vmem:[#allocation2 + $0x70] sm:$0xff]  ;;  %5017 = vmatprep.subr.bf16.mxu0 %v3231_v30  ;;  %v4516_v12 = vadd.f32 -1.0, %v5478_v43  ;;  %v2890_v60 = vmul.f32 1.442695, %v7541_v58 }
 0x799   :  { %v7549_v9 = vadd.f32 %v2912_v33, %v8402_v20  ;;  %v2884_v40 = vmul.f32 1.442695, %v2840_v42  ;;  %v2819_v34 = vmul.f32 %v7393_v11, %v2796_v5  ;;  %v5480_v62 = vpop.eup %5479  ;;  %vm2856_vm6 = vcmp.gt.f32.partialorder %v2840_v42, 0.0  ;;  %v3109_v33 = vld [vmem:[%s8078_s10 + $0x10] sm:$0xff] }
 0x79a   :  { %v4517_v55 = vadd.f32 -1.0, %v5480_v62  ;;  %v2917_v18 = vsel %vm2853_vm14, %v7472_v37, %v4516_v12 }
 0x79b   :  { %v2942_v56 = vpack.c.bf16 %v7552_v0, %v7549_v9  ;;  %5485 = vpow2.f32 %v2884_v40  ;;  %5018 = vmatpush3.bf16.msra.mxu0 %v3231_v30  ;;  %v2842_v38 = vadd.f32 %v7402_v7, %v2819_v34  ;;  %v2919_v7 = vsel %vm2855_vm3, %v7460_v2, %v4518_v31 }
 0x79c   :  { %5487 = vpow2.f32 %v2890_v60  ;;  %v2918_v25 = vsel %vm2854_vm15, %v7482_v57, %v4517_v55  ;;  %v7581_v28 = vadd.f32 %v2917_v18, %v8407_v13  ;;  %v7584_v57 = vadd.f32 %v2919_v7, %v8408_v10 }
 0x79d   :  { %v5482_v21 = vpop.eup %5481  ;;  %4983 = vmatprep.mubr.msk.bf16.mxu0 %vm253_vm1, %v2942_v56  ;;  %v2888_v49 = vmul.f32 1.442695, %v2842_v38  ;;  %v7575_v44 = vadd.f32 %v2918_v25, %v8405_v48  ;;  %vm2858_vm8 = vcmp.gt.f32.partialorder %v2842_v38, 0.0 }
 0x79e   :  { %4984 = vmatmul.mubr.msk.bf16.gmra.mrb[60].mxu0 %vm253_vm1, %v2943_v22  ;;  %v4515_v11 = vadd.f32 -1.0, %v5482_v21 }
 0x79f   :  { %5489 = vpow2.f32 %v2888_v49 }
 0x7a0   :  { %v2916_v17 = vsel %vm2852_vm4, %v7495_v32, %v4515_v11  ;;  %v5484_v37 = vpop.eup %5483  ;;  %v2945_v32 = vpack.c.bf16 %v7584_v57, %v7575_v44 }
 0x7a1   :  { %v7578_v15 = vadd.f32 %v2916_v17, %v8406_v35  ;;  %v4520_v2 = vadd.f32 -1.0, %v5484_v37 }
 0x7a3   :  { %v2944_v59 = vpack.c.bf16 %v7581_v28, %v7578_v15  ;;  %v2921_v6 = vsel %vm2857_vm5, %v7526_v14, %v4520_v2 }
 0x7a4   :  { %v7598_v53 = vadd.f32 %v2921_v6, %v8410_v51 }
 0x7a5   :  { %v5486_v46 = vpop.eup %5485  ;;  %4987 = vmatprep.mubr.msk.bf16.mxu0 %vm253_vm1, %v2944_v59 }
 0x7a6   :  { %v5488_v3 = vpop.eup %5487  ;;  %4988 = vmatmul.mubr.msk.bf16.gmra.mrb[64].mxu0 %vm253_vm1, %v2945_v32  ;;  %v4519_v30 = vadd.f32 -1.0, %v5486_v46 }
 0x7a7   :  { %v4522_v1 = vadd.f32 -1.0, %v5488_v3 }
 0x7a8   :  { %v2920_v27 = vsel %vm2856_vm6, %v2840_v42, %v4519_v30 }
 0x7a9   :  { %v7595_v29 = vadd.f32 %v2920_v27, %v8409_v52  ;;  %v5490_v63 = vpop.eup %5489  ;;  %v2923_v26 = vsel %vm2859_vm7, %v7541_v58, %v4522_v1  ;;  %v3110_v58 = vld [vmem:[%s8078_s10 + $0x18] sm:$0xff] }
 0x7aa   :  { %v4521_v39 = vadd.f32 -1.0, %v5490_v63  ;;  %v7609_v42 = vadd.f32 %v2923_v26, %v8412_v19  ;;  %v3112_v36 = vpack.c.bf16 %v3110_v58, %v3109_v33 }
 0x7ab   :  { %v2946_v24 = vpack.c.bf16 %v7598_v53, %v7595_v29 }
 0x7ac   :  { %v2922_v14 = vsel %vm2858_vm8, %v2842_v38, %v4521_v39  ;;  %4997 = vmatprep.subr.bf16.mxu1 %v3112_v36 }
 0x7ad   :  { %4991 = vmatprep.mubr.msk.bf16.mxu0 %vm253_vm1, %v2946_v24  ;;  %v7606_v23 = vadd.f32 %v2922_v14, %v8411_v4  ;;  %4998 = vmatpush3.bf16.msra.mxu1 %v3112_v36 }
 0x7af   :  { %v2947_v43 = vpack.c.bf16 %v7609_v42, %v7606_v23 }
 0x7b1   :  { %4992 = vmatmul.mubr.msk.bf16.gmra.mrb[68].mxu0 %vm253_vm1, %v2947_v43 }
 0x869   :  { %v4981_v5 = vpop.f32.mrb[56].mxu0 }
 0x86a   :  { %v3012_v20 = vpop.f32.mrb[57].mxu0 }
 0x86b   :  { %v4982_v41 = vpop.f32.mrb[58].mxu0 }
 0x86c   :  { %v3076_v40 = vpack.c.bf16 %v4982_v41, %v4981_v5  ;;  %v3015_v45 = vpop.f32.mrb[59].mxu0 }
 0x86d   :  { %v3075_v12 = vpack.c.bf16 %v3015_v45, %v3012_v20 }
 0x86e   :  { %v3087_v56 = vsel %vm253_vm1, %v3076_v40, 1065369472 }
 0x86f   :  { %4999 = vmatprep.mubr.msk.bf16.mxu1 %vm253_vm1, %v3075_v12  ;;  %5019 = vmatprep.mubr.msk.bf16.mxu0 %vm253_vm1, %v3075_v12  ;;  %v3084_v34 = vsel %vm253_vm1, %v3075_v12, 1065369472 }
 0x870   :  { %5000 = vmatmul.mubr.msk.bf16.vlgmr.msra.gmra.mrb[72].mxu1 %vm253_vm1, %v3076_v40  ;;  %5020 = vmatmul.mubr.msk.bf16.vlgmr.msra.gmra.mrb[72].mxu0 %vm253_vm1, %v3076_v40 }
 0x871   :  { %5035 = vmatprep.subr.bf16.mxu1 %v3084_v34  ;;  %v4985_v60 = vpop.f32.mrb[60].mxu0 }
 0x872   :  { %5036 = vmatpush3.bf16.msra.mxu1 %v3084_v34  ;;  %v3028_v62 = vpop.f32.mrb[61].mxu0 }
 0x873   :  { %5037 = vmatprep.subr.bf16.mxu1 %v3087_v56  ;;  %v4986_v31 = vpop.f32.mrb[62].mxu0 }
 0x874   :  { %v3078_v22 = vpack.c.bf16 %v4986_v31, %v4985_v60  ;;  %v3031_v55 = vpop.f32.mrb[63].mxu0 }
 0x875   :  { %v3077_v38 = vpack.c.bf16 %v3031_v55, %v3028_v62 }
 0x876   :  { %5038 = vmatpush3.bf16.msra.mxu1 %v3087_v56  ;;  %v3093_v25 = vsel %vm253_vm1, %v3078_v22, 1065369472 }
 0x877   :  { %5003 = vmatprep.mubr.msk.bf16.mxu1 %vm253_vm1, %v3077_v38  ;;  %5023 = vmatprep.mubr.msk.bf16.mxu0 %vm253_vm1, %v3077_v38  ;;  %v3090_v21 = vsel %vm253_vm1, %v3077_v38, 1065369472 }
 0x878   :  { %5004 = vmatmul.mubr.msk.bf16.gmra.mrb[76].mxu1 %vm253_vm1, %v3078_v22  ;;  %5024 = vmatmul.mubr.msk.bf16.gmra.mrb[76].mxu0 %vm253_vm1, %v3078_v22 }
 0x879   :  { %5039 = vmatprep.subr.bf16.mxu1 %v3090_v21  ;;  %v4989_v11 = vpop.f32.mrb[64].mxu0 }
 0x87a   :  { %5040 = vmatpush3.bf16.msra.mxu1 %v3090_v21  ;;  %v3044_v18 = vpop.f32.mrb[65].mxu0 }
 0x87b   :  { %5041 = vmatprep.subr.bf16.mxu1 %v3093_v25  ;;  %v4990_v49 = vpop.f32.mrb[66].mxu0 }
 0x87c   :  { %v3080_v7 = vpack.c.bf16 %v4990_v49, %v4989_v11  ;;  %v3047_v17 = vpop.f32.mrb[67].mxu0 }
 0x87d   :  { %v3079_v48 = vpack.c.bf16 %v3047_v17, %v3044_v18  ;;  %v8413_v18 = vmov 32  }
 0x87e   :  { %5042 = vmatpush3.bf16.msra.mxu1 %v3093_v25  ;;  %v3099_v13 = vsel %vm253_vm1, %v3080_v7, 1065369472 }
 0x87f   :  { %5007 = vmatprep.mubr.msk.bf16.mxu1 %vm253_vm1, %v3079_v48  ;;  %5027 = vmatprep.mubr.msk.bf16.mxu0 %vm253_vm1, %v3079_v48  ;;  %v3096_v35 = vsel %vm253_vm1, %v3079_v48, 1065369472 }
 0x880   :  { %5008 = vmatmul.mubr.msk.bf16.gmra.mrb[80].mxu1 %vm253_vm1, %v3080_v7  ;;  %5028 = vmatmul.mubr.msk.bf16.gmra.mrb[80].mxu0 %vm253_vm1, %v3080_v7 }
 0x881   :  { %5043 = vmatprep.subr.bf16.mxu1 %v3096_v35 }
 0x882   :  { %5044 = vmatpush3.bf16.msra.mxu1 %v3096_v35 }
 0x883   :  { %5045 = vmatprep.subr.bf16.mxu1 %v3099_v13 }
 0x884   :  { %v4993_v37 = vpop.f32.mrb[68].mxu0 }
 0x885   :  { %v3060_v10 = vpop.f32.mrb[69].mxu0 }
 0x886   :  { %5046 = vmatpush3.bf16.msra.mxu1 %v3099_v13  ;;  %v4994_v59 = vpop.f32.mrb[70].mxu0 }
 0x887   :  { %v3082_v2 = vpack.c.bf16 %v4994_v59, %v4993_v37  ;;  %v3063_v32 = vpop.f32.mrb[71].mxu0 }
 0x888   :  { %v3081_v46 = vpack.c.bf16 %v3063_v32, %v3060_v10 }
 0x889   :  { %v3105_v30 = vsel %vm253_vm1, %v3082_v2, 1065369472 }
 0x88a   :  { %5011 = vmatprep.mubr.msk.bf16.mxu1 %vm253_vm1, %v3081_v46  ;;  %5031 = vmatprep.mubr.msk.bf16.mxu0 %vm253_vm1, %v3081_v46  ;;  %v3102_v3 = vsel %vm253_vm1, %v3081_v46, 1065369472 }
 0x88b   :  { %5012 = vmatmul.mubr.msk.bf16.gmra.mrb[84].mxu1 %vm253_vm1, %v3082_v2  ;;  %5032 = vmatmul.mubr.msk.bf16.gmra.mrb[84].mxu0 %vm253_vm1, %v3082_v2  ;;  %v8414_v2 = vld [vmem:[#allocation85_spill] sm:$0xff] }
 0x88c   :  { %5047 = vmatprep.subr.bf16.mxu1 %v3102_v3 }
 0x88d   :  { %5048 = vmatpush3.bf16.msra.mxu1 %v3102_v3 }
 0x88e   :  { %5049 = vmatprep.subr.bf16.mxu1 %v3105_v30 }
 0x891   :  { %5050 = vmatpush3.bf16.msra.mxu1 %v3105_v30 }
 0x943   :  { %v5001_v6 = vpop.f32.mrb[72].mxu1  ;;  %v5021_v1 = vpop.f32.mrb[72].mxu0 }
 0x944   :  { %v3163_v27 = vpop.f32.mrb[73].mxu1  ;;  %3373 = vperm.xlu1 %5199, %v5021_v1   ;;  %v3266_v52 = vpop.f32.mrb[73].mxu0 }
 0x945   :  { %v5002_v51 = vpop.f32.mrb[74].mxu1  ;;  %v5022_v63 = vpop.f32.mrb[74].mxu0 }
 0x946   :  { %v3166_v24 = vpop.f32.mrb[75].mxu1  ;;  %v3269_v39 = vpop.f32.mrb[75].mxu0 }
 0x947   :  { %3368 = vperm.xlu0 %5200, %v3269_v39  }
 0x948   :  { %3363 = vperm.xlu1 %5199, %v3266_v52  }
 0x94b   :  { %v5005_v26 = vpop.f32.mrb[76].mxu1  ;;  %v5025_v14 = vpop.f32.mrb[76].mxu0 }
 0x94c   :  { %v3179_v4 = vpop.f32.mrb[77].mxu1  ;;  %3378 = vperm.xlu1 %5199, %v5022_v63   ;;  %3393 = vperm.xlu0 %5200, %v5025_v14   ;;  %v3282_v19 = vpop.f32.mrb[77].mxu0 }
 0x94d   :  { %v5006_v43 = vpop.f32.mrb[78].mxu1  ;;  %v5026_v33 = vpop.f32.mrb[78].mxu0 }
 0x94e   :  { %v3182_v58 = vpop.f32.mrb[79].mxu1  ;;  %v3285_v36 = vpop.f32.mrb[79].mxu0 }
 0x950   :  { %3383 = vperm.xlu0 %5200, %v3282_v19   ;;  %3388 = vperm.xlu1 %5199, %v3285_v36  }
 0x953   :  { %v5009_v5 = vpop.f32.mrb[80].mxu1  ;;  %v5029_v20 = vpop.f32.mrb[80].mxu0 }
 0x954   :  { %v3195_v41 = vpop.f32.mrb[81].mxu1  ;;  %3398 = vperm.xlu1 %5199, %v5026_v33   ;;  %3413 = vperm.xlu0 %5200, %v5029_v20   ;;  %v3298_v40 = vpop.f32.mrb[81].mxu0 }
 0x955   :  { %v5010_v45 = vpop.f32.mrb[82].mxu1  ;;  %v5030_v12 = vpop.f32.mrb[82].mxu0 }
 0x956   :  { %v3198_v34 = vpop.f32.mrb[83].mxu1  ;;  %v3301_v60 = vpop.f32.mrb[83].mxu0 }
 0x958   :  { %3403 = vperm.xlu0 %5200, %v3298_v40   ;;  %3408 = vperm.xlu1 %5199, %v3301_v60  }
 0x95c   :  { %3418 = vperm.xlu1 %5199, %v5030_v12  }
 0x95e   :  { %v5013_v62 = vpop.f32.mrb[84].mxu1  ;;  %v5033_v56 = vpop.f32.mrb[84].mxu0 }
 0x95f   :  { %3433 = vperm.xlu0 %5200, %v5033_v56   ;;  %v3211_v31 = vpop.f32.mrb[85].mxu1  ;;  %v3314_v22 = vpop.f32.mrb[85].mxu0 }
 0x960   :  { %v5014_v55 = vpop.f32.mrb[86].mxu1  ;;  %v5034_v38 = vpop.f32.mrb[86].mxu0 }
 0x961   :  { %v3214_v21 = vpop.f32.mrb[87].mxu1  ;;  %v3317_v11 = vpop.f32.mrb[87].mxu0 }
 0x962   :  { %3428 = vperm.xlu1 %5199, %v3317_v11   ;;  %v5592_v11 = vld [vmem:[%s8075_s1 + $0x30] sm:$0xff] }
 0x963   :  { %3423 = vperm.xlu0 %5200, %v3314_v22  }
 0x966   :  { %3438 = vperm.xlu1 %5199, %v5034_v38  }
 0x96a   :  { %5201 = vset.pattern.permute.xlu1 %v8413_v18 }
 0x981   :  { %3329 = vxpose.xlu0.b32.start [1/16] (narrow) %v3163_v27, 8 }
 0x985   :  { %3330 = vxpose.xlu0.b32.cont [2/16] (narrow) %v3166_v24, 8 }
 0x989   :  { %3331 = vxpose.xlu0.b32.cont [3/16] (narrow) %v5001_v6, 8 }
 0x98d   :  { %3332 = vxpose.xlu0.b32.cont [4/16] (narrow) %v5002_v51, 8 }
 0x991   :  { %3333 = vxpose.xlu0.b32.cont [5/16] (narrow) %v3179_v4, 8  ;;  %v5588_v4 = vld [vmem:[%s8075_s1] sm:$0xff] }
 0x995   :  { %3334 = vxpose.xlu0.b32.cont [6/16] (narrow) %v3182_v58, 8  ;;  %v5589_v58 = vld [vmem:[%s8075_s1 + $0x8] sm:$0xff] }
 0x999   :  { %3335 = vxpose.xlu0.b32.cont [7/16] (narrow) %v5005_v26, 8  ;;  %v5587_v26 = vld [vmem:[%s8075_s1 + $0x70] sm:$0xff] }
 0x99d   :  { %3336 = vxpose.xlu0.b32.cont [8/16] (narrow) %v5006_v43, 8 }
 0x9a1   :  { %3337 = vxpose.xlu0.b32.cont [9/16] (narrow) %v3195_v41, 8 }
 0x9a5   :  { %3338 = vxpose.xlu0.b32.cont [10/16] (narrow) %v3198_v34, 8 }
 0x9a9   :  { %3339 = vxpose.xlu0.b32.cont [11/16] (narrow) %v5009_v5, 8 }
 0x9ad   :  { %3340 = vxpose.xlu0.b32.cont [12/16] (narrow) %v5010_v45, 8  ;;  %v5590_v45 = vld [vmem:[%s8075_s1 + $0x10] sm:$0xff] }
 0x9b1   :  { %3341 = vxpose.xlu0.b32.cont [13/16] (narrow) %v3211_v31, 8  ;;  %v5591_v31 = vld [vmem:[%s8075_s1 + $0x18] sm:$0xff] }
 0x9b5   :  { %3342 = vxpose.xlu0.b32.cont [14/16] (narrow) %v3214_v21, 8 }
 0x9b9   :  { %3343 = vxpose.xlu0.b32.cont [15/16] (narrow) %v5013_v62, 8 }
 0x9bd   :  { %3344 = vxpose.xlu0.b32.end [16/16] (narrow) %v5014_v55, 8 }
 0x9c3   :  { %v3374_v13 = vpop.permute.xlu1 %3373 }
 0x9c6   :  { %v3369_v25 = vpop.permute.xlu0 %3368 }
 0x9c7   :  { %v3364_v59 = vpop.permute.xlu1 %3363 }
 0x9cb   :  { %v3394_v49 = vpop.permute.xlu0 %3393  ;;  %v3379_v51 = vpop.permute.xlu1 %3378 }
 0x9cf   :  { %v3384_v7 = vpop.permute.xlu0 %3383  ;;  %v3389_v40 = vpop.permute.xlu1 %3388 }
 0x9d3   :  { %v3414_v17 = vpop.permute.xlu0 %3413  ;;  %v3399_v56 = vpop.permute.xlu1 %3398 }
 0x9d7   :  { %v7646_v48 = vpop.permute.xlu0 %3403 }
 0x9de   :  { %v3434_v35 = vpop.permute.xlu0 %3433 }
 0x9e2   :  { %v7648_v37 = vpop.permute.xlu0 %3423 }
 0x9e6   :  { %5202 = vset.pattern.permute.xlu0 %v8413_v18 }
 0xa01   :  { %v3345_v10 = vpop.trf.xlu0 }
 0xa02   :  { %v7651_v32 = vrot.slane %v3345_v10, %v8414_v2 }
 0xa04   :  { %v3459_v46 = vadd.f32 %v7651_v32, %v3434_v35  ;;  %v3445_v3 = vadd.f32 %v7651_v32, %v3364_v59  ;;  %v3446_v30 = vadd.f32 %v7651_v32, %v3369_v25  ;;  %v3447_v52 = vadd.f32 %v7651_v32, %v3374_v13  ;;  %v5593_v35 = vld [vmem:[%s8075_s1 + $0x20] sm:$0xff] }
 0xa05   :  { %v3448_v39 = vadd.f32 %v7651_v32, %v3379_v51  ;;  %v3451_v41 = vadd.f32 %v7651_v32, %v3394_v49  ;;  %v3449_v62 = vadd.f32 %v7651_v32, %v3384_v7  ;;  %v3452_v21 = vadd.f32 %v7651_v32, %v3399_v56 }
 0xa06   :  { %v3475_v6 = vmul.f32 0.2, %v3459_v46  ;;  %v3461_v1 = vmul.f32 0.2, %v3445_v3  ;;  %v3462_v27 = vmul.f32 0.2, %v3446_v30  ;;  %v3450_v7 = vadd.f32 %v7651_v32, %v3389_v40 }
 0xa07   :  { %v3463_v33 = vmul.f32 0.2, %v3447_v52  ;;  %v3464_v20 = vmul.f32 0.2, %v3448_v39  ;;  %v3467_v60 = vmul.f32 0.2, %v3451_v41  ;;  %v3455_v2 = vadd.f32 %v7651_v32, %v3414_v17 }
 0xa08   :  { %v3491_v63 = vmax.f32 %v3459_v46, %v3475_v6  ;;  %v3477_v24 = vmax.f32 %v3445_v3, %v3461_v1  ;;  %v3478_v43 = vmax.f32 %v3446_v30, %v3462_v27  ;;  %v3465_v38 = vmul.f32 0.2, %v3449_v62  ;;  %v3409_v46 = vpop.permute.xlu1 %3408  ;;  %v5594_v3 = vld [vmem:[%s8075_s1 + $0x38] sm:$0xff]  ;;  %v5595_v17 = vld [vmem:[%s8075_s1 + $0x28] sm:$0xff] }
 0xa09   :  { %v3479_v5 = vmax.f32 %v3447_v52, %v3463_v33  ;;  %v3480_v34 = vmax.f32 %v3448_v39, %v3464_v20  ;;  %v3483_v55 = vmax.f32 %v3451_v41, %v3467_v60  ;;  %v3468_v49 = vmul.f32 0.2, %v3452_v21 }
 0xa0a   :  { %v7661_v14 = vadd.f32 %v5587_v26, %v3491_v63  ;;  %v7666_v19 = vadd.f32 %v5588_v4, %v3477_v24  ;;  %v7673_v36 = vadd.f32 %v5589_v58, %v3478_v43  ;;  %v3481_v25 = vmax.f32 %v3449_v62, %v3465_v38  ;;  %v5596_v26 = vld [vmem:[%s8075_s1 + $0x50] sm:$0xff]  ;;  %v5597_v58 = vld [vmem:[%s8075_s1 + $0x40] sm:$0xff] }
 0xa0b   :  { %v7680_v12 = vadd.f32 %v5590_v45, %v3479_v5  ;;  %v7687_v22 = vadd.f32 %v5591_v31, %v3480_v34  ;;  %v7694_v18 = vadd.f32 %v5592_v11, %v3483_v55  ;;  %v3484_v10 = vmax.f32 %v3452_v21, %v3468_v49  ;;  %v5598_v34 = vld [vmem:[%s8075_s1 + $0x58] sm:$0xff]  ;;  %v5600_v49 = vld [vmem:[%s8075_s1 + $0x60] sm:$0xff] }
 0xa0c   :  { %3537 = vmax.xlane.f32.xlu0 %v7661_v14  ;;  %3509 = vmax.xlane.f32.xlu1 %v7666_v19  ;;  %v7701_v13 = vadd.f32 %v5593_v35, %v3481_v25  ;;  %v3466_v59 = vmul.f32 0.2, %v3450_v7  ;;  %v3471_v1 = vmul.f32 0.2, %v3455_v2  ;;  %v3453_v27 = vadd.f32 %v7651_v32, %v7646_v48  ;;  %v3419_v52 = vpop.permute.xlu1 %3418 }
 0xa0d   :  { %v7708_v30 = vadd.f32 %v5594_v3, %v3484_v10  ;;  %v3456_v39 = vadd.f32 %v7651_v32, %v3419_v52  ;;  %v3454_v33 = vadd.f32 %v7651_v32, %v3409_v46  ;;  %v3457_v40 = vadd.f32 %v7651_v32, %v7648_v37  ;;  %v5599_v37 = vld [vmem:[%s8075_s1 + $0x48] sm:$0xff] }
 0xa0e   :  { %v3482_v6 = vmax.f32 %v3450_v7, %v3466_v59  ;;  %v3487_v63 = vmax.f32 %v3455_v2, %v3471_v1  ;;  %v3469_v24 = vmul.f32 0.2, %v3453_v27  ;;  %v5601_v59 = vld [vmem:[%s8075_s1 + $0x68] sm:$0xff] }
 0xa0f   :  { %v3472_v43 = vmul.f32 0.2, %v3456_v39  ;;  %v3470_v41 = vmul.f32 0.2, %v3454_v33  ;;  %v3473_v56 = vmul.f32 0.2, %v3457_v40 }
 0xa10   :  { %3511 = vmax.xlane.f32.xlu1 %v7673_v36  ;;  %v7716_v51 = vadd.f32 %v5595_v17, %v3482_v6  ;;  %v7723_v48 = vadd.f32 %v5596_v26, %v3487_v63  ;;  %v3485_v4 = vmax.f32 %v3453_v27, %v3469_v24  ;;  %v3429_v45 = vpop.permute.xlu1 %3428 }
 0xa11   :  { %v3488_v20 = vmax.f32 %v3456_v39, %v3472_v43  ;;  %v3486_v62 = vmax.f32 %v3454_v33, %v3470_v41  ;;  %v3458_v31 = vadd.f32 %v7651_v32, %v3429_v45  ;;  %v3489_v21 = vmax.f32 %v3457_v40, %v3473_v56 }
 0xa12   :  { %v7730_v5 = vadd.f32 %v5597_v58, %v3485_v4 }
 0xa13   :  { %v7738_v60 = vadd.f32 %v5598_v34, %v3488_v20  ;;  %v7745_v38 = vadd.f32 %v5599_v37, %v3486_v62  ;;  %v3474_v11 = vmul.f32 0.2, %v3458_v31  ;;  %v7752_v7 = vadd.f32 %v5600_v49, %v3489_v21 }
 0xa14   :  { %3513 = vmax.xlane.f32.xlu1 %v7680_v12  ;;  %v3439_v55 = vpop.permute.xlu1 %3438 }
 0xa15   :  { %v3460_v25 = vadd.f32 %v7651_v32, %v3439_v55  ;;  %v3490_v35 = vmax.f32 %v3458_v31, %v3474_v11  ;;  %v5602_v32 = vld [vmem:[%s8075_s1 + $0x78] sm:$0xff] }
 0xa17   :  { %v3476_v10 = vmul.f32 0.2, %v3460_v25  ;;  %v7758_v2 = vadd.f32 %v5601_v59, %v3490_v35 }
 0xa18   :  { %3515 = vmax.xlane.f32.xlu1 %v7687_v22 }
 0xa19   :  { %v3492_v46 = vmax.f32 %v3460_v25, %v3476_v10 }
 0xa1b   :  { %v7764_v3 = vadd.f32 %v5602_v32, %v3492_v46 }
 0xa1c   :  { %3521 = vmax.xlane.f32.xlu1 %v7694_v18 }
 0xa20   :  { %3517 = vmax.xlane.f32.xlu1 %v7701_v13 }
 0xa24   :  { %3523 = vmax.xlane.f32.xlu1 %v7708_v30 }
 0xa28   :  { %3519 = vmax.xlane.f32.xlu1 %v7716_v51 }
 0xa2c   :  { %3529 = vmax.xlane.f32.xlu1 %v7723_v48 }
 0xa30   :  { %3525 = vmax.xlane.f32.xlu1 %v7730_v5 }
 0xa34   :  { %3531 = vmax.xlane.f32.xlu1 %v7738_v60 }
 0xa38   :  { %3527 = vmax.xlane.f32.xlu1 %v7745_v38 }
 0xa3c   :  { %3533 = vmax.xlane.f32.xlu1 %v7752_v7 }
 0xa40   :  { %3535 = vmax.xlane.f32.xlu1 %v7758_v2 }
 0xa44   :  { %3539 = vmax.xlane.f32.xlu1 %v7764_v3 }
 0xa99   :  { %v3510_v6 = vpop.xlane.xlu1 %3509 }
 0xa9a   :  { %v3541_v1 = vsub.f32 %v7666_v19, %v3510_v6 }
 0xa9c   :  { %v3557_v27 = vmul.f32 1.442695, %v3541_v1 }
 0xa9d   :  { %v3512_v52 = vpop.xlane.xlu1 %3511 }
 0xa9e   :  { %v3542_v17 = vsub.f32 %v7673_v36, %v3512_v52  ;;  %5491 = vpow2.f32 %v3557_v27 }
 0xaa0   :  { %v3559_v63 = vmul.f32 1.442695, %v3542_v17 }
 0xaa1   :  { %v3514_v24 = vpop.xlane.xlu1 %3513 }
 0xaa2   :  { %5493 = vpow2.f32 %v3559_v63  ;;  %v3543_v39 = vsub.f32 %v7680_v12, %v3514_v24 }
 0xaa4   :  { %v3561_v26 = vmul.f32 1.442695, %v3543_v39 }
 0xaa5   :  { %v3516_v4 = vpop.xlane.xlu1 %3515 }
 0xaa6   :  { %v3544_v43 = vsub.f32 %v7687_v22, %v3516_v4  ;;  %5495 = vpow2.f32 %v3561_v26 }
 0xaa8   :  { %v3563_v33 = vmul.f32 1.442695, %v3544_v43  ;;  %v5492_v20 = vpop.eup %5491 }
 0xaa9   :  { %v3522_v58 = vpop.xlane.xlu1 %3521 }
 0xaaa   :  { %5497 = vpow2.f32 %v3563_v33  ;;  %v3547_v12 = vsub.f32 %v7694_v18, %v3522_v58 }
 0xaac   :  { %v5494_v19 = vpop.eup %5493  ;;  %v3569_v11 = vmul.f32 1.442695, %v3547_v12 }
 0xaad   :  { %v3518_v41 = vpop.xlane.xlu1 %3517  ;;  %v3589_v40 = vpack.c.bf16 %v5494_v19, %v5492_v20 }
 0xaae   :  { %v3545_v36 = vsub.f32 %v7701_v13, %v3518_v41 }
 0xaaf   :  { %5051 = vmatprep.mubr.bf16.mxu1 %v3589_v40 }
 0xab0   :  { %v5496_v62 = vpop.eup %5495  ;;  %v3565_v31 = vmul.f32 1.442695, %v3545_v36 }
 0xab1   :  { %v3524_v45 = vpop.xlane.xlu1 %3523 }
 0xab2   :  { %v3548_v34 = vsub.f32 %v7708_v30, %v3524_v45  ;;  %5499 = vpow2.f32 %v3565_v31 }
 0xab4   :  { %v5498_v56 = vpop.eup %5497  ;;  %v3571_v22 = vmul.f32 1.442695, %v3548_v34 }
 0xab5   :  { %v3520_v55 = vpop.xlane.xlu1 %3519  ;;  %v3590_v37 = vpack.c.bf16 %v5498_v56, %v5496_v62 }
 0xab6   :  { %v3546_v21 = vsub.f32 %v7716_v51, %v3520_v55  ;;  %5501 = vpow2.f32 %v3571_v22 }
 0xab7   :  { %5052 = vmatmul.mubr.bf16.vlgmr.msra.gmra.mrb[88].mxu1 %v3590_v37 }
 0xab8   :  { %v3567_v25 = vmul.f32 1.442695, %v3546_v21 }
 0xab9   :  { %v3530_v49 = vpop.xlane.xlu1 %3529 }
 0xaba   :  { %5503 = vpow2.f32 %v3567_v25  ;;  %v3551_v46 = vsub.f32 %v7723_v48, %v3530_v49 }
 0xabb   :  { %5505 = vpow2.f32 %v3569_v11 }
 0xabc   :  { %v5500_v18 = vpop.eup %5499  ;;  %v3577_v24 = vmul.f32 1.442695, %v3551_v46 }
 0xabd   :  { %v3526_v13 = vpop.xlane.xlu1 %3525 }
 0xabe   :  { %v3549_v30 = vsub.f32 %v7730_v5, %v3526_v13 }
 0xac0   :  { %v5502_v59 = vpop.eup %5501  ;;  %v3573_v51 = vmul.f32 1.442695, %v3549_v30 }
 0xac1   :  { %v3532_v35 = vpop.xlane.xlu1 %3531 }
 0xac2   :  { %v3552_v10 = vsub.f32 %v7738_v60, %v3532_v35  ;;  %5507 = vpow2.f32 %v3573_v51  ;;  %v3538_v60 = vpop.xlane.xlu0 %3537 }
 0xac3   :  { %v3555_v26 = vsub.f32 %v7661_v14, %v3538_v60 }
 0xac4   :  { %v5504_v32 = vpop.eup %5503  ;;  %v3579_v1 = vmul.f32 1.442695, %v3552_v10 }
 0xac5   :  { %v5506_v6 = vpop.eup %5505  ;;  %v3528_v27 = vpop.xlane.xlu1 %3527  ;;  %v3591_v52 = vpack.c.bf16 %v5504_v32, %v5500_v18  ;;  %v3585_v58 = vmul.f32 1.442695, %v3555_v26 }
 0xac6   :  { %v3550_v17 = vsub.f32 %v7745_v38, %v3528_v27  ;;  %v3592_v63 = vpack.c.bf16 %v5502_v59, %v5506_v6  ;;  %5509 = vpow2.f32 %v3579_v1 }
 0xac7   :  { %5055 = vmatprep.mubr.bf16.mxu1 %v3591_v52 }
 0xac8   :  { %v3575_v5 = vmul.f32 1.442695, %v3550_v17  ;;  %5056 = vmatmul.mubr.bf16.gmra.mrb[92].mxu1 %v3592_v63 }
 0xac9   :  { %v3534_v39 = vpop.xlane.xlu1 %3533 }
 0xaca   :  { %5511 = vpow2.f32 %v3575_v5  ;;  %v3553_v48 = vsub.f32 %v7752_v7, %v3534_v39 }
 0xacb   :  { %5513 = vpow2.f32 %v3577_v24 }
 0xacc   :  { %v3581_v4 = vmul.f32 1.442695, %v3553_v48  ;;  %v5508_v19 = vpop.eup %5507 }
 0xacd   :  { %v3536_v43 = vpop.xlane.xlu1 %3535 }
 0xace   :  { %v3554_v33 = vsub.f32 %v7758_v2, %v3536_v43  ;;  %5515 = vpow2.f32 %v3581_v4 }
 0xad0   :  { %v3583_v38 = vmul.f32 1.442695, %v3554_v33  ;;  %v5510_v40 = vpop.eup %5509 }
 0xad1   :  { %v3540_v20 = vpop.xlane.xlu1 %3539 }
 0xad2   :  { %5517 = vpow2.f32 %v3583_v38  ;;  %v3556_v41 = vsub.f32 %v7764_v3, %v3540_v20 }
 0xad3   :  { %5519 = vpow2.f32 %v3585_v58 }
 0xad4   :  { %v5512_v36 = vpop.eup %5511  ;;  %v3587_v45 = vmul.f32 1.442695, %v3556_v41 }
 0xad5   :  { %v5514_v34 = vpop.eup %5513  ;;  %v3593_v7 = vpack.c.bf16 %v5512_v36, %v5508_v19 }
 0xad6   :  { %5521 = vpow2.f32 %v3587_v45  ;;  %v3594_v14 = vpack.c.bf16 %v5510_v40, %v5514_v34 }
 0xad7   :  { %5059 = vmatprep.mubr.bf16.mxu1 %v3593_v7 }
 0xad8   :  { %5060 = vmatmul.mubr.bf16.gmra.mrb[96].mxu1 %v3594_v14  ;;  %v5516_v62 = vpop.eup %5515  ;;  %v4004_v14 = vld [vmem:[%s8081_s14] sm:$0xff] }
 0xadc   :  { %v5518_v2 = vpop.eup %5517 }
 0xadd   :  { %v3595_v12 = vpack.c.bf16 %v5518_v2, %v5516_v62  ;;  %v5520_v56 = vpop.eup %5519  ;;  %v4005_v62 = vld [vmem:[%s8081_s14 + $0x8] sm:$0xff] }
 0xade   :  { %v4008_v2 = vpack.c.bf16 %v4005_v62, %v4004_v14 }
 0xadf   :  { %5063 = vmatprep.mubr.bf16.mxu1 %v3595_v12 }
 0xae0   :  { %v5522_v31 = vpop.eup %5521  ;;  %5067 = vmatprep.subr.bf16.mxu0 %v4008_v2 }
 0xae1   :  { %v3596_v22 = vpack.c.bf16 %v5522_v31, %v5520_v56  ;;  %v4006_v56 = vld [vmem:[%s8081_s14 + $0x10] sm:$0xff]  ;;  %v4007_v31 = vld [vmem:[%s8081_s14 + $0x18] sm:$0xff]  ;;  %5068 = vmatpush3.bf16.msra.mxu0 %v4008_v2 }
 0xae3   :  { %5064 = vmatmul.mubr.bf16.gmra.mrb[100].mxu1 %v3596_v22 }
 0xb8a   :  { %v7783_v55 = vpop.f32.mrb[88].mxu1 }
 0xb8b   :  { %v3696_v3 = vmax.f32 %v7783_v55, 1e-09  ;;  %v7786_v37 = vpop.f32.mrb[89].mxu1 }
 0xb8c   :  { %v7788_v21 = vpop.f32.mrb[90].mxu1  ;;  %v3694_v11 = vmax.f32 %v7786_v37, 1e-09 }
 0xb8d   :  { %5523 = vrcp.f32 %v3696_v3  ;;  %v7791_v25 = vpop.f32.mrb[91].mxu1  ;;  %v3697_v49 = vmax.f32 %v7788_v21, 1e-09  ;;  %v4009_v3 = vpack.c.bf16 %v4007_v31, %v4006_v56 }
 0xb8e   :  { %5525 = vrcp.f32 %v3694_v11  ;;  %v3695_v13 = vmax.f32 %v7791_v25, 1e-09 }
 0xb8f   :  { %5527 = vrcp.f32 %v3697_v49  ;;  %5069 = vmatprep.subr.bf16.mxu0 %v4009_v3 }
 0xb90   :  { %5529 = vrcp.f32 %v3695_v13  ;;  %5070 = vmatpush3.bf16.msra.mxu0 %v4009_v3 }
 0xb97   :  { %v5524_v30 = vpop.eup %5523 }
 0xb98   :  { %3738 = vperm.xlu1 %5201, %v5524_v30   ;;  %v5526_v35 = vpop.eup %5525 }
 0xb99   :  { %v5528_v1 = vpop.eup %5527 }
 0xb9a   :  { %v5530_v52 = vpop.eup %5529 }
 0xb9b   :  { %v7795_v18 = vpop.f32.mrb[92].mxu1 }
 0xb9c   :  { %v3700_v10 = vmax.f32 %v7795_v18, 1e-09  ;;  %3728 = vperm.xlu1 %5201, %v5526_v35   ;;  %v7798_v59 = vpop.f32.mrb[93].mxu1 }
 0xb9d   :  { %v7800_v46 = vpop.f32.mrb[94].mxu1  ;;  %v3698_v32 = vmax.f32 %v7798_v59, 1e-09 }
 0xb9e   :  { %5531 = vrcp.f32 %v3700_v10  ;;  %v3701_v51 = vmax.f32 %v7800_v46, 1e-09  ;;  %v7804_v6 = vpop.f32.mrb[95].mxu1 }
 0xb9f   :  { %v3699_v27 = vmax.f32 %v7804_v6, 1e-09 }
 0xba0   :  { %5533 = vrcp.f32 %v3701_v51  ;;  %3743 = vperm.xlu1 %5201, %v5528_v1  }
 0xba1   :  { %5535 = vrcp.f32 %v3698_v32 }
 0xba2   :  { %5537 = vrcp.f32 %v3699_v27 }
 0xba4   :  { %3733 = vperm.xlu1 %5201, %v5530_v52  }
 0xba8   :  { %v5532_v17 = vpop.eup %5531 }
 0xba9   :  { %3758 = vperm.xlu1 %5201, %v5532_v17   ;;  %v7851_v17 = vld [vmem:[%s8082_s12] ss:$0 sm:$0xff] }
 0xbaa   :  { %v5534_v63 = vpop.eup %5533 }
 0xbab   :  { %3763 = vperm.xlu0 %5202, %v5534_v63   ;;  %v7807_v24 = vpop.f32.mrb[96].mxu1  ;;  %v5536_v5 = vpop.eup %5535 }
 0xbac   :  { %v3704_v39 = vmax.f32 %v7807_v24, 1e-09  ;;  %v7810_v60 = vpop.f32.mrb[97].mxu1  ;;  %v5538_v43 = vpop.eup %5537 }
 0xbad   :  { %3748 = vperm.xlu1 %5201, %v5536_v5   ;;  %v7812_v48 = vpop.f32.mrb[98].mxu1  ;;  %v3702_v26 = vmax.f32 %v7810_v60, 1e-09 }
 0xbae   :  { %5539 = vrcp.f32 %v3704_v39  ;;  %v7815_v4 = vpop.f32.mrb[99].mxu1  ;;  %v3705_v33 = vmax.f32 %v7812_v48, 1e-09 }
 0xbaf   :  { %5541 = vrcp.f32 %v3702_v26  ;;  %v3703_v38 = vmax.f32 %v7815_v4, 1e-09 }
 0xbb0   :  { %5543 = vrcp.f32 %v3705_v33 }
 0xbb1   :  { %3753 = vperm.xlu1 %5201, %v5538_v43   ;;  %5545 = vrcp.f32 %v3703_v38 }
 0xbb6   :  { %v7819_v58 = vpop.f32.mrb[100].mxu1 }
 0xbb7   :  { %v7821_v20 = vpop.f32.mrb[101].mxu1  ;;  %v3708_v36 = vmax.f32 %v7819_v58, 1e-09 }
 0xbb8   :  { %v5540_v19 = vpop.eup %5539  ;;  %v7823_v41 = vpop.f32.mrb[102].mxu1  ;;  %v3706_v34 = vmax.f32 %v7821_v20, 1e-09 }
 0xbb9   :  { %3778 = vperm.xlu1 %5201, %v5540_v19   ;;  %v7825_v40 = vpop.f32.mrb[103].mxu1  ;;  %v5542_v45 = vpop.eup %5541  ;;  %5547 = vrcp.f32 %v3708_v36  ;;  %v3709_v11 = vmax.f32 %v7823_v41, 1e-09 }
 0xbba   :  { %v5544_v7 = vpop.eup %5543  ;;  %5549 = vrcp.f32 %v3706_v34  ;;  %v3707_v12 = vmax.f32 %v7825_v40, 1e-09 }
 0xbbb   :  { %v5546_v22 = vpop.eup %5545 }
 0xbbc   :  { %5551 = vrcp.f32 %v3707_v12 }
 0xbbd   :  { %3768 = vperm.xlu1 %5201, %v5542_v45   ;;  %5553 = vrcp.f32 %v3709_v11 }
 0xbc1   :  { %3783 = vperm.xlu1 %5201, %v5544_v7  }
 0xbc3   :  { %v5548_v49 = vpop.eup %5547 }
 0xbc4   :  { %v5550_v13 = vpop.eup %5549 }
 0xbc5   :  { %3773 = vperm.xlu1 %5201, %v5546_v22  }
 0xbc6   :  { %v5552_v30 = vpop.eup %5551 }
 0xbc7   :  { %v5554_v35 = vpop.eup %5553 }
 0xbc9   :  { %3798 = vperm.xlu1 %5201, %v5548_v49  }
 0xbcd   :  { %3788 = vperm.xlu1 %5201, %v5550_v13  }
 0xbd1   :  { %3793 = vperm.xlu1 %5201, %v5552_v30  }
 0xbd5   :  { %3803 = vperm.xlu1 %5201, %v5554_v35  }
 0xc17   :  { %v3739_v10 = vpop.permute.xlu1 %3738 }
 0xc18   :  { %v3808_v32 = vmul.f32 %v7783_v55, %v3739_v10 }
 0xc1a   :  { %3824 = vst.msk [vmem:[#allocation2 + $0x10] sm:$0xff] %vm253_vm1, %v3808_v32 }
 0xc1b   :  { %v3729_v51 = vpop.permute.xlu1 %3728 }
 0xc1c   :  { %v3806_v1 = vmul.f32 %v3729_v51, %v7786_v37  ;;  %v7859_v37 = vld [vmem:[%s8083_s13] ss:$0 sm:$0xff] }
 0xc1e   :  { %3822 = vst.msk [vmem:[#allocation2] sm:$0xff] %vm253_vm1, %v3806_v1 }
 0xc1f   :  { %v3744_v27 = vpop.permute.xlu1 %3743 }
 0xc20   :  { %v3809_v52 = vmul.f32 %v7788_v21, %v3744_v27 }
 0xc21   :  { %v3840_v63 = vld [vmem:[#allocation2 + $0x10] sm:$0xff] }
 0xc22   :  { %3825 = vst.msk [vmem:[#allocation2 + $0x18] sm:$0xff] %vm253_vm1, %v3809_v52  ;;  %v3863_v55 = vmul.f32 %v7851_v17, %v3840_v63 }
 0xc23   :  { %v3734_v5 = vpop.permute.xlu1 %3733 }
 0xc24   :  { %v3807_v39 = vmul.f32 %v3734_v5, %v7791_v25  ;;  %v7864_v43 = vadd.f32 %v7859_v37, %v3863_v55 }
 0xc25   :  { %v3838_v26 = vld [vmem:[#allocation2] sm:$0xff] }
 0xc26   :  { %3823 = vst.msk [vmem:[#allocation2 + $0x8] sm:$0xff] %vm253_vm1, %v3807_v39  ;;  %v3861_v21 = vmul.f32 %v7851_v17, %v3838_v26  ;;  %v3920_v14 = vmul.f32 1.442695, %v7864_v43  ;;  %vm3902_vm11 = vcmp.gt.f32.partialorder %v7864_v43, 0.0 }
 0xc28   :  { %v3759_v33 = vpop.permute.xlu1 %3758  ;;  %v3884_v38 = vadd.f32 %v7859_v37, %v3861_v21 }
 0xc29   :  { %v3812_v19 = vmul.f32 %v7795_v18, %v3759_v33  ;;  %v3841_v36 = vld [vmem:[#allocation2 + $0x18] sm:$0xff] }
 0xc2a   :  { %v3764_v25 = vpop.permute.xlu0 %3763  ;;  %v3916_v45 = vmul.f32 1.442695, %v3884_v38  ;;  %v3864_v34 = vmul.f32 %v7851_v17, %v3841_v36  ;;  %vm3900_vm10 = vcmp.gt.f32.partialorder %v3884_v38, 0.0 }
 0xc2b   :  { %3828 = vst.msk [vmem:[#allocation2 + $0x30] sm:$0xff] %vm253_vm1, %v3812_v19  ;;  %v3813_v7 = vmul.f32 %v7800_v46, %v3764_v25 }
 0xc2c   :  { %v3749_v62 = vpop.permute.xlu1 %3748  ;;  %v3887_v2 = vadd.f32 %v7859_v37, %v3864_v34  ;;  %5555 = vpow2.f32 %v3916_v45 }
 0xc2d   :  { %3829 = vst.msk [vmem:[#allocation2 + $0x38] sm:$0xff] %vm253_vm1, %v3813_v7  ;;  %v3810_v12 = vmul.f32 %v3749_v62, %v7798_v59  ;;  %v3839_v56 = vld [vmem:[#allocation2 + $0x8] sm:$0xff]  ;;  %5557 = vpow2.f32 %v3920_v14 }
 0xc2e   :  { %v3862_v18 = vmul.f32 %v7851_v17, %v3839_v56  ;;  %v3922_v31 = vmul.f32 1.442695, %v3887_v2  ;;  %vm3903_vm9 = vcmp.gt.f32.partialorder %v3887_v2, 0.0 }
 0xc2f   :  { %3826 = vst.msk [vmem:[#allocation2 + $0x20] sm:$0xff] %vm253_vm1, %v3810_v12 }
 0xc30   :  { %v3754_v22 = vpop.permute.xlu1 %3753  ;;  %v3885_v46 = vadd.f32 %v7859_v37, %v3862_v18  ;;  %5559 = vpow2.f32 %v3922_v31 }
 0xc31   :  { %v3811_v3 = vmul.f32 %v3754_v22, %v7804_v6 }
 0xc32   :  { %v3918_v11 = vmul.f32 1.442695, %v3885_v46  ;;  %v3844_v49 = vld [vmem:[#allocation2 + $0x30] sm:$0xff]  ;;  %vm3901_vm12 = vcmp.gt.f32.partialorder %v3885_v46, 0.0 }
 0xc33   :  { %3827 = vst.msk [vmem:[#allocation2 + $0x28] sm:$0xff] %vm253_vm1, %v3811_v3  ;;  %v3867_v59 = vmul.f32 %v7851_v17, %v3844_v49 }
 0xc34   :  { %5561 = vpow2.f32 %v3918_v11  ;;  %v3845_v13 = vld [vmem:[#allocation2 + $0x38] sm:$0xff] }
 0xc35   :  { %v3868_v30 = vmul.f32 %v7851_v17, %v3845_v13  ;;  %v7883_v35 = vadd.f32 %v7859_v37, %v3867_v59 }
 0xc36   :  { %v3842_v10 = vld [vmem:[#allocation2 + $0x20] sm:$0xff]  ;;  %v5556_v32 = vpop.eup %5555 }
 0xc37   :  { %v3865_v51 = vmul.f32 %v7851_v17, %v3842_v10  ;;  %v7887_v1 = vadd.f32 %v7859_v37, %v3868_v30  ;;  %v3928_v27 = vmul.f32 1.442695, %v7883_v35  ;;  %v5558_v52 = vpop.eup %5557  ;;  %v4549_v39 = vadd.f32 -1.0, %v5556_v32 }
 0xc38   :  { %v3779_v6 = vpop.permute.xlu1 %3778  ;;  %v4551_v45 = vadd.f32 -1.0, %v5558_v52  ;;  %vm3906_vm15 = vcmp.gt.f32.partialorder %v7883_v35, 0.0 }
 0xc39   :  { %v3816_v63 = vmul.f32 %v7807_v24, %v3779_v6  ;;  %v7892_v5 = vadd.f32 %v7859_v37, %v3865_v51  ;;  %v3930_v21 = vmul.f32 1.442695, %v7887_v1  ;;  %5563 = vpow2.f32 %v3928_v27 }
 0xc3a   :  { %v5560_v55 = vpop.eup %5559  ;;  %v3843_v26 = vld [vmem:[#allocation2 + $0x28] sm:$0xff]  ;;  %v3964_v12 = vsel %vm3900_vm10, %v3884_v38, %v4549_v39  ;;  %v3966_v31 = vsel %vm3902_vm11, %v7864_v43, %v4551_v45  ;;  %vm3907_vm14 = vcmp.gt.f32.partialorder %v7887_v1, 0.0 }
 0xc3b   :  { %3832 = vst.msk [vmem:[#allocation2 + $0x50] sm:$0xff] %vm253_vm1, %v3816_v63  ;;  %v4552_v33 = vadd.f32 -1.0, %v5560_v55  ;;  %v3866_v19 = vmul.f32 %v7851_v17, %v3843_v26  ;;  %v3924_v36 = vmul.f32 1.442695, %v7892_v5  ;;  %5565 = vpow2.f32 %v3930_v21 }
 0xc3c   :  { %v3769_v25 = vpop.permute.xlu1 %3768  ;;  %v3980_v11 = vadd.f32 %v3964_v12, %v7510_v16  ;;  %v3982_v38 = vadd.f32 %v3966_v31, %v7506_v54  ;;  %vm3904_vm13 = vcmp.gt.f32.partialorder %v7892_v5, 0.0 }
 0xc3d   :  { %v3814_v24 = vmul.f32 %v3769_v25, %v7810_v60  ;;  %v3889_v34 = vadd.f32 %v7859_v37, %v3866_v19  ;;  %5567 = vpow2.f32 %v3924_v36  ;;  %v3967_v14 = vsel %vm3903_vm9, %v3887_v2, %v4552_v33 }
 0xc3e   :  { %v5562_v7 = vpop.eup %5561  ;;  %v3983_v3 = vadd.f32 %v3967_v14, %v7517_v50 }
 0xc3f   :  { %3830 = vst.msk [vmem:[#allocation2 + $0x40] sm:$0xff] %vm253_vm1, %v3814_v24  ;;  %v4550_v62 = vadd.f32 -1.0, %v5562_v7  ;;  %v3926_v56 = vmul.f32 1.442695, %v3889_v34  ;;  %vm3905_vm3 = vcmp.gt.f32.partialorder %v3889_v34, 0.0 }
 0xc40   :  { %v3784_v18 = vpop.permute.xlu1 %3783 }
 0xc41   :  { %v3817_v60 = vmul.f32 %v7812_v48, %v3784_v18  ;;  %v3965_v22 = vsel %vm3901_vm12, %v3885_v46, %v4550_v62  ;;  %5569 = vpow2.f32 %v3926_v56  ;;  %v3997_v46 = vpack.c.bf16 %v3983_v3, %v3982_v38 }
 0xc42   :  { %v3981_v2 = vadd.f32 %v3965_v22, %v7513_v47  ;;  %v3848_v49 = vld [vmem:[#allocation2 + $0x50] sm:$0xff] }
 0xc43   :  { %3833 = vst.msk [vmem:[#allocation2 + $0x58] sm:$0xff] %vm253_vm1, %v3817_v60  ;;  %v3871_v30 = vmul.f32 %v7851_v17, %v3848_v49  ;;  %v5564_v43 = vpop.eup %5563 }
 0xc44   :  { %v3774_v59 = vpop.permute.xlu1 %3773  ;;  %v3996_v13 = vpack.c.bf16 %v3981_v2, %v3980_v11  ;;  %v4555_v27 = vadd.f32 -1.0, %v5564_v43 }
 0xc45   :  { %v3815_v48 = vmul.f32 %v3774_v59, %v7815_v4  ;;  %v5566_v10 = vpop.eup %5565  ;;  %v7916_v6 = vadd.f32 %v7859_v37, %v3871_v30 }
 0xc46   :  { %5071 = vmatprep.mubr.msk.bf16.mxu0 %vm253_vm1, %v3996_v13  ;;  %v3846_v50 = vld [vmem:[#allocation2 + $0x40] sm:$0xff]  ;;  %v4556_v47 = vadd.f32 -1.0, %v5566_v10  ;;  %v3970_v45 = vsel %vm3906_vm15, %v7883_v35, %v4555_v27 }
 0xc47   :  { %v5568_v16 = vpop.eup %5567  ;;  %3831 = vst.msk [vmem:[#allocation2 + $0x48] sm:$0xff] %vm253_vm1, %v3815_v48  ;;  %5072 = vmatmul.mubr.msk.bf16.vlgmr.msra.gmra.mrb[88].mxu0 %vm253_vm1, %v3997_v46  ;;  %v3869_v54 = vmul.f32 %v7851_v17, %v3846_v50  ;;  %v3936_v36 = vmul.f32 1.442695, %v7916_v6  ;;  %v3986_v18 = vadd.f32 %v3970_v45, %v7546_v8  ;;  %vm3910_vm6 = vcmp.gt.f32.partialorder %v7916_v6, 0.0 }
 0xc48   :  { %v3799_v32 = vpop.permute.xlu1 %3798  ;;  %v4553_v51 = vadd.f32 -1.0, %v5568_v16  ;;  %v3971_v26 = vsel %vm3907_vm14, %v7887_v1, %v4556_v47 }
 0xc49   :  { %v3820_v4 = vmul.f32 %v7819_v58, %v3799_v32  ;;  %v7920_v52 = vadd.f32 %v7859_v37, %v3869_v54  ;;  %v3987_v7 = vadd.f32 %v3971_v26, %v7555_v61 }
 0xc4a   :  { %v3849_v63 = vld [vmem:[#allocation2 + $0x58] sm:$0xff]  ;;  %v3968_v39 = vsel %vm3904_vm13, %v7892_v5, %v4553_v51 }
 0xc4b   :  { %v5570_v55 = vpop.eup %5569  ;;  %3836 = vst.msk [vmem:[#allocation2 + $0x70] sm:$0xff] %vm253_vm1, %v3820_v4  ;;  %v3932_v21 = vmul.f32 1.442695, %v7920_v52  ;;  %v3872_v58 = vmul.f32 %v7851_v17, %v3849_v63  ;;  %v3984_v1 = vadd.f32 %v3968_v39, %v7549_v9  ;;  %v3999_v61 = vpack.c.bf16 %v3987_v7, %v3986_v18 }
 0xc4c   :  { %v3789_v33 = vpop.permute.xlu1 %3788  ;;  %v4554_v19 = vadd.f32 -1.0, %v5570_v55  ;;  %vm3908_vm4 = vcmp.gt.f32.partialorder %v7920_v52, 0.0 }
 0xc4d   :  { %v3818_v25 = vmul.f32 %v3789_v33, %v7821_v20  ;;  %v3895_v24 = vadd.f32 %v7859_v37, %v3872_v58  ;;  %5571 = vpow2.f32 %v3932_v21 }
 0xc4e   :  { %v3969_v5 = vsel %vm3905_vm3, %v3889_v34, %v4554_v19  ;;  %v3847_v14 = vld [vmem:[#allocation2 + $0x48] sm:$0xff]  ;;  %5573 = vpow2.f32 %v3936_v36 }
 0xc4f   :  { %3834 = vst.msk [vmem:[#allocation2 + $0x60] sm:$0xff] %vm253_vm1, %v3818_v25  ;;  %v3985_v62 = vadd.f32 %v3969_v5, %v7552_v0  ;;  %v3870_v12 = vmul.f32 %v7851_v17, %v3847_v14  ;;  %v3938_v56 = vmul.f32 1.442695, %v3895_v24  ;;  %vm3911_vm5 = vcmp.gt.f32.partialorder %v3895_v24, 0.0 }
 0xc50   :  { %v3794_v20 = vpop.permute.xlu1 %3793 }
 0xc51   :  { %v3819_v35 = vmul.f32 %v3794_v20, %v7825_v40  ;;  %v3998_v34 = vpack.c.bf16 %v3985_v62, %v3984_v1  ;;  %v3893_v9 = vadd.f32 %v7859_v37, %v3870_v12  ;;  %5575 = vpow2.f32 %v3938_v56 }
 0xc52   :  { %v3852_v31 = vld [vmem:[#allocation2 + $0x70] sm:$0xff] }
 0xc53   :  { %3835 = vst.msk [vmem:[#allocation2 + $0x68] sm:$0xff] %vm253_vm1, %v3819_v35  ;;  %5075 = vmatprep.mubr.msk.bf16.mxu0 %vm253_vm1, %v3998_v34  ;;  %v3934_v0 = vmul.f32 1.442695, %v3893_v9  ;;  %v3875_v60 = vmul.f32 %v7851_v17, %v3852_v31  ;;  %vm3909_vm7 = vcmp.gt.f32.partialorder %v3893_v9, 0.0 }
 0xc54   :  { %5076 = vmatmul.mubr.msk.bf16.gmra.mrb[92].mxu0 %vm253_vm1, %v3999_v61  ;;  %v3804_v22 = vpop.permute.xlu1 %3803 }
 0xc55   :  { %v3821_v8 = vmul.f32 %v7823_v41, %v3804_v22  ;;  %5577 = vpow2.f32 %v3934_v0  ;;  %v3898_v11 = vadd.f32 %v7859_v37, %v3875_v60 }
 0xc56   :  { %v3850_v40 = vld [vmem:[#allocation2 + $0x60] sm:$0xff] }
 0xc57   :  { %3837 = vst.msk [vmem:[#allocation2 + $0x78] sm:$0xff] %vm253_vm1, %v3821_v8  ;;  %v3873_v3 = vmul.f32 %v7851_v17, %v3850_v40  ;;  %v5572_v2 = vpop.eup %5571  ;;  %v3944_v48 = vmul.f32 1.442695, %v3898_v11  ;;  %vm3914_vm10 = vcmp.gt.f32.partialorder %v3898_v11, 0.0 }
 0xc58   :  { %v5574_v38 = vpop.eup %5573  ;;  %v4557_v46 = vadd.f32 -1.0, %v5572_v2 }
 0xc59   :  { %v3896_v49 = vadd.f32 %v7859_v37, %v3873_v3  ;;  %v4559_v10 = vadd.f32 -1.0, %v5574_v38 }
 0xc5a   :  { %v3851_v59 = vld [vmem:[#allocation2 + $0x68] sm:$0xff]  ;;  %v3972_v27 = vsel %vm3908_vm4, %v7920_v52, %v4557_v46 }
 0xc5b   :  { %v5576_v13 = vpop.eup %5575  ;;  %v3874_v30 = vmul.f32 %v7851_v17, %v3851_v59  ;;  %v3940_v43 = vmul.f32 1.442695, %v3896_v49  ;;  %v3974_v63 = vsel %vm3910_vm6, %v7916_v6, %v4559_v10  ;;  %v3988_v21 = vadd.f32 %v3972_v27, %v7578_v15 }
 0xc5c   :  { %v4560_v41 = vadd.f32 -1.0, %v5576_v13  ;;  %v3990_v33 = vadd.f32 %v3974_v63, %v7575_v44  ;;  %vm3912_vm8 = vcmp.gt.f32.partialorder %v3896_v49, 0.0 }
 0xc5d   :  { %v3897_v50 = vadd.f32 %v7859_v37, %v3874_v30  ;;  %5579 = vpow2.f32 %v3940_v43 }
 0xc5e   :  { %v3853_v16 = vld [vmem:[#allocation2 + $0x78] sm:$0xff]  ;;  %v3975_v54 = vsel %vm3911_vm5, %v3895_v24, %v4560_v41  ;;  %5581 = vpow2.f32 %v3944_v48 }
 0xc5f   :  { %v5578_v47 = vpop.eup %5577  ;;  %v3942_v32 = vmul.f32 1.442695, %v3897_v50  ;;  %v3876_v51 = vmul.f32 %v7851_v17, %v3853_v16  ;;  %v3991_v26 = vadd.f32 %v3975_v54, %v7584_v57  ;;  %vm3913_vm9 = vcmp.gt.f32.partialorder %v3897_v50, 0.0 }
 0xc60   :  { %v4558_v4 = vadd.f32 -1.0, %v5578_v47 }
 0xc61   :  { %5583 = vpow2.f32 %v3942_v32  ;;  %v3899_v55 = vadd.f32 %v7859_v37, %v3876_v51  ;;  %v4001_v52 = vpack.c.bf16 %v3991_v26, %v3990_v33 }
 0xc62   :  { %v3973_v39 = vsel %vm3909_vm7, %v3893_v9, %v4558_v4 }
 0xc63   :  { %v3989_v58 = vadd.f32 %v3973_v39, %v7581_v28  ;;  %v3946_v17 = vmul.f32 1.442695, %v3899_v55  ;;  %vm3915_vm11 = vcmp.gt.f32.partialorder %v3899_v55, 0.0 }
 0xc65   :  { %v4000_v19 = vpack.c.bf16 %v3989_v58, %v3988_v21  ;;  %5585 = vpow2.f32 %v3946_v17 }
 0xc67   :  { %v5580_v36 = vpop.eup %5579  ;;  %5079 = vmatprep.mubr.msk.bf16.mxu0 %vm253_vm1, %v4000_v19 }
 0xc68   :  { %5080 = vmatmul.mubr.msk.bf16.gmra.mrb[96].mxu0 %vm253_vm1, %v4001_v52  ;;  %v4561_v6 = vadd.f32 -1.0, %v5580_v36  ;;  %v5582_v37 = vpop.eup %5581 }
 0xc69   :  { %v4563_v15 = vadd.f32 -1.0, %v5582_v37 }
 0xc6a   :  { %v3976_v45 = vsel %vm3912_vm8, %v3896_v49, %v4561_v6 }
 0xc6b   :  { %v5584_v25 = vpop.eup %5583  ;;  %v3992_v44 = vadd.f32 %v3976_v45, %v7595_v29  ;;  %v3978_v7 = vsel %vm3914_vm10, %v3898_v11, %v4563_v15  ;;  %v4162_v29 = vld [vmem:[%s8084_s16] sm:$0xff] }
 0xc6c   :  { %v4562_v57 = vadd.f32 -1.0, %v5584_v25  ;;  %v3994_v12 = vadd.f32 %v3978_v7, %v7606_v23  ;;  %v4565_v23 = vld [vmem:[%s8085_s15] ss:$0 sm:$0xff] }
 0xc6e   :  { %v3977_v28 = vsel %vm3913_vm9, %v3897_v50, %v4562_v57 }
 0xc6f   :  { %v5586_v24 = vpop.eup %5585  ;;  %v3993_v5 = vadd.f32 %v3977_v28, %v7598_v53  ;;  %v4163_v53 = vld [vmem:[%s8084_s16 + $0x8] sm:$0xff] }
 0xc70   :  { %v4564_v1 = vadd.f32 -1.0, %v5586_v24  ;;  %v4164_v18 = vpack.c.bf16 %v4163_v53, %v4162_v29 }
 0xc71   :  { %v4002_v14 = vpack.c.bf16 %v3993_v5, %v3992_v44 }
 0xc72   :  { %v3979_v62 = vsel %vm3915_vm11, %v3899_v55, %v4564_v1  ;;  %5087 = vmatprep.subr.bf16.mxu1 %v4164_v18 }
 0xc73   :  { %5083 = vmatprep.mubr.msk.bf16.mxu0 %vm253_vm1, %v4002_v14  ;;  %v3995_v56 = vadd.f32 %v3979_v62, %v7609_v42  ;;  %5088 = vmatpush3.bf16.msra.mxu1 %v4164_v18  ;;  %v4317_v62 = vld [vmem:[%s8086_s18] sm:$0xff] }
 0xc75   :  { %v4003_v20 = vpack.c.bf16 %v3995_v56, %v3994_v12  ;;  %v4318_v12 = vpack.c.bf16 %v4317_v62, %v4317_v62 }
 0xc77   :  { %5084 = vmatmul.mubr.msk.bf16.gmra.mrb[100].mxu0 %vm253_vm1, %v4003_v20  ;;  %vm4350_vm1 = vcmask 1043456   ;;  %v4574_v20 = vld [vmem:[%s8087_s17] ss:$0 sm:$0xff] }
 0xc78   :  { %5125 = vmatprep.subr.msk.bf16.mxu0 %vm4350_vm1, %v4318_v12  ;;  %v4352_v56 = vsel %vm4350_vm1, %v4318_v12, 0 }
 0xc79   :  { %5106 = vmatpush3.bf16.msra.mxu0 %v4352_v56 }
 0xd1a   :  { %v5073_v35 = vpop.f32.mrb[88].mxu0 }
 0xd1b   :  { %v4084_v42 = vadd.f32 %v5073_v35, %v4565_v23  ;;  %v4075_v34 = vpop.f32.mrb[89].mxu0 }
 0xd1c   :  { %v4076_v9 = vadd.f32 %v4565_v23, %v4075_v34  ;;  %v5074_v61 = vpop.f32.mrb[90].mxu0 }
 0xd1d   :  { %v4087_v31 = vadd.f32 %v5074_v61, %v4565_v23  ;;  %v4078_v0 = vpop.f32.mrb[91].mxu0  ;;  %v4140_v22 = vmax.f32 %v4084_v42, 0.0 }
 0xd1e   :  { %v4079_v60 = vadd.f32 %v4565_v23, %v4078_v0  ;;  %v4138_v40 = vmax.f32 %v4076_v9, 0.0 }
 0xd1f   :  { %v4141_v8 = vmax.f32 %v4087_v31, 0.0 }
 0xd20   :  { %v4139_v3 = vmax.f32 %v4079_v60, 0.0 }
 0xd21   :  { %v4155_v11 = vpack.c.bf16 %v4141_v8, %v4140_v22 }
 0xd22   :  { %v4154_v2 = vpack.c.bf16 %v4139_v3, %v4138_v40 }
 0xd24   :  { %5089 = vmatprep.mubr.msk.bf16.mxu1 %vm117_vm0, %v4154_v2 }
 0xd25   :  { %5090 = vmatmul.mubr.msk.bf16.vlgmr.msra.gmra.mrb[104].mxu1 %vm117_vm0, %v4155_v11 }
 0xd27   :  { %v5077_v49 = vpop.f32.mrb[92].mxu0 }
 0xd28   :  { %v4100_v38 = vadd.f32 %v5077_v49, %v4565_v23  ;;  %v4091_v59 = vpop.f32.mrb[93].mxu0 }
 0xd29   :  { %v4092_v13 = vadd.f32 %v4565_v23, %v4091_v59  ;;  %v5078_v30 = vpop.f32.mrb[94].mxu0 }
 0xd2a   :  { %v4103_v43 = vadd.f32 %v5078_v30, %v4565_v23  ;;  %v4094_v48 = vpop.f32.mrb[95].mxu0  ;;  %v4144_v41 = vmax.f32 %v4100_v38, 0.0 }
 0xd2b   :  { %v4095_v46 = vadd.f32 %v4565_v23, %v4094_v48  ;;  %v4142_v50 = vmax.f32 %v4092_v13, 0.0 }
 0xd2c   :  { %v4145_v10 = vmax.f32 %v4103_v43, 0.0 }
 0xd2d   :  { %v4143_v16 = vmax.f32 %v4095_v46, 0.0 }
 0xd2e   :  { %v4157_v47 = vpack.c.bf16 %v4145_v10, %v4144_v41 }
 0xd2f   :  { %v4156_v54 = vpack.c.bf16 %v4143_v16, %v4142_v50 }
 0xd31   :  { %5093 = vmatprep.mubr.msk.bf16.mxu1 %vm117_vm0, %v4156_v54 }
 0xd32   :  { %5094 = vmatmul.mubr.msk.bf16.gmra.mrb[108].mxu1 %vm117_vm0, %v4157_v47 }
 0xd3b   :  { %v5081_v32 = vpop.f32.mrb[96].mxu0 }
 0xd3c   :  { %v4116_v51 = vadd.f32 %v5081_v32, %v4565_v23  ;;  %v4107_v4 = vpop.f32.mrb[97].mxu0 }
 0xd3d   :  { %v4108_v27 = vadd.f32 %v4565_v23, %v4107_v4  ;;  %v5082_v63 = vpop.f32.mrb[98].mxu0 }
 0xd3e   :  { %v4119_v55 = vadd.f32 %v5082_v63, %v4565_v23  ;;  %v4110_v39 = vpop.f32.mrb[99].mxu0  ;;  %v4148_v21 = vmax.f32 %v4116_v51, 0.0 }
 0xd3f   :  { %v4111_v26 = vadd.f32 %v4565_v23, %v4110_v39  ;;  %v4146_v17 = vmax.f32 %v4108_v27, 0.0 }
 0xd40   :  { %v4149_v58 = vmax.f32 %v4119_v55, 0.0 }
 0xd41   :  { %v4147_v33 = vmax.f32 %v4111_v26, 0.0 }
 0xd42   :  { %v4159_v19 = vpack.c.bf16 %v4149_v58, %v4148_v21 }
 0xd43   :  { %v4158_v52 = vpack.c.bf16 %v4147_v33, %v4146_v17 }
 0xd45   :  { %5097 = vmatprep.mubr.msk.bf16.mxu1 %vm117_vm0, %v4158_v52 }
 0xd46   :  { %5098 = vmatmul.mubr.msk.bf16.gmra.mrb[112].mxu1 %vm117_vm0, %v4159_v19 }
 0xd4a   :  { %v5085_v36 = vpop.f32.mrb[100].mxu0 }
 0xd4b   :  { %v4132_v6 = vadd.f32 %v5085_v36, %v4565_v23  ;;  %v4123_v37 = vpop.f32.mrb[101].mxu0 }
 0xd4c   :  { %v4124_v25 = vadd.f32 %v4565_v23, %v4123_v37  ;;  %v5086_v57 = vpop.f32.mrb[102].mxu0 }
 0xd4d   :  { %v4135_v45 = vadd.f32 %v5086_v57, %v4565_v23  ;;  %v4126_v15 = vpop.f32.mrb[103].mxu0  ;;  %v4152_v24 = vmax.f32 %v4132_v6, 0.0 }
 0xd4e   :  { %v4127_v28 = vadd.f32 %v4565_v23, %v4126_v15  ;;  %v4150_v5 = vmax.f32 %v4124_v25, 0.0 }
 0xd4f   :  { %v4153_v44 = vmax.f32 %v4135_v45, 0.0 }
 0xd50   :  { %v4151_v1 = vmax.f32 %v4127_v28, 0.0 }
 0xd51   :  { %v4161_v7 = vpack.c.bf16 %v4153_v44, %v4152_v24 }
 0xd52   :  { %v4160_v14 = vpack.c.bf16 %v4151_v1, %v4150_v5  ;;  %v4583_v5 = vld [vmem:[%s8088_s19] ss:$0 sm:$0xff] }
 0xd54   :  { %5101 = vmatprep.mubr.msk.bf16.mxu1 %vm117_vm0, %v4160_v14 }
 0xd55   :  { %5102 = vmatmul.mubr.msk.bf16.gmra.mrb[116].mxu1 %vm117_vm0, %v4161_v7  ;;  %vm4451_vm0 = vcmask 31744  }
 0xdf8   :  { %v5091_v29 = vpop.f32.mrb[104].mxu1 }
 0xdf9   :  { %v4239_v53 = vadd.f32 %v5091_v29, %v4574_v20  ;;  %v4230_v18 = vpop.f32.mrb[105].mxu1 }
 0xdfa   :  { %v4231_v23 = vadd.f32 %v4574_v20, %v4230_v18  ;;  %v5092_v35 = vpop.f32.mrb[106].mxu1 }
 0xdfb   :  { %v4242_v42 = vadd.f32 %v5092_v35, %v4574_v20  ;;  %v4233_v34 = vpop.f32.mrb[107].mxu1  ;;  %v4295_v61 = vmax.f32 %v4239_v53, 0.0 }
 0xdfc   :  { %v4234_v9 = vadd.f32 %v4574_v20, %v4233_v34  ;;  %v4293_v0 = vmax.f32 %v4231_v23, 0.0 }
 0xdfd   :  { %v4296_v31 = vmax.f32 %v4242_v42, 0.0 }
 0xdfe   :  { %v4294_v60 = vmax.f32 %v4234_v9, 0.0 }
 0xdff   :  { %v4310_v22 = vpack.c.bf16 %v4296_v31, %v4295_v61 }
 0xe00   :  { %v4309_v8 = vpack.c.bf16 %v4294_v60, %v4293_v0 }
 0xe02   :  { %5107 = vmatprep.mubr.msk.bf16.mxu0 %vm1123_vm2, %v4309_v8 }
 0xe03   :  { %5108 = vmatmul.mubr.msk.bf16.vlgmr.msra.gmra.mrb[104].mxu0 %vm1123_vm2, %v4310_v22 }
 0xe05   :  { %v5095_v40 = vpop.f32.mrb[108].mxu1 }
 0xe06   :  { %v4255_v3 = vadd.f32 %v5095_v40, %v4574_v20  ;;  %v4246_v11 = vpop.f32.mrb[109].mxu1 }
 0xe07   :  { %v4247_v2 = vadd.f32 %v4574_v20, %v4246_v11  ;;  %v5096_v49 = vpop.f32.mrb[110].mxu1 }
 0xe08   :  { %v4258_v38 = vadd.f32 %v5096_v49, %v4574_v20  ;;  %v4249_v59 = vpop.f32.mrb[111].mxu1  ;;  %v4299_v30 = vmax.f32 %v4255_v3, 0.0 }
 0xe09   :  { %v4250_v13 = vadd.f32 %v4574_v20, %v4249_v59  ;;  %v4297_v48 = vmax.f32 %v4247_v2, 0.0 }
 0xe0a   :  { %v4300_v43 = vmax.f32 %v4258_v38, 0.0 }
 0xe0b   :  { %v4298_v46 = vmax.f32 %v4250_v13, 0.0 }
 0xe0c   :  { %v4312_v41 = vpack.c.bf16 %v4300_v43, %v4299_v30 }
 0xe0d   :  { %v4311_v10 = vpack.c.bf16 %v4298_v46, %v4297_v48 }
 0xe0f   :  { %5111 = vmatprep.mubr.msk.bf16.mxu0 %vm1123_vm2, %v4311_v10 }
 0xe10   :  { %5112 = vmatmul.mubr.msk.bf16.gmra.mrb[108].mxu0 %vm1123_vm2, %v4312_v41 }
 0xe19   :  { %v5099_v50 = vpop.f32.mrb[112].mxu1 }
 0xe1a   :  { %v4271_v16 = vadd.f32 %v5099_v50, %v4574_v20  ;;  %v4262_v47 = vpop.f32.mrb[113].mxu1 }
 0xe1b   :  { %v4263_v54 = vadd.f32 %v4574_v20, %v4262_v47  ;;  %v5100_v32 = vpop.f32.mrb[114].mxu1 }
 0xe1c   :  { %v4274_v51 = vadd.f32 %v5100_v32, %v4574_v20  ;;  %v4265_v4 = vpop.f32.mrb[115].mxu1  ;;  %v4303_v63 = vmax.f32 %v4271_v16, 0.0 }
 0xe1d   :  { %v4266_v27 = vadd.f32 %v4574_v20, %v4265_v4  ;;  %v4301_v39 = vmax.f32 %v4263_v54, 0.0 }
 0xe1e   :  { %v4304_v55 = vmax.f32 %v4274_v51, 0.0 }
 0xe1f   :  { %v4302_v26 = vmax.f32 %v4266_v27, 0.0 }
 0xe20   :  { %v4314_v21 = vpack.c.bf16 %v4304_v55, %v4303_v63 }
 0xe21   :  { %v4313_v58 = vpack.c.bf16 %v4302_v26, %v4301_v39 }
 0xe23   :  { %5115 = vmatprep.mubr.msk.bf16.mxu0 %vm1123_vm2, %v4313_v58 }
 0xe24   :  { %5116 = vmatmul.mubr.msk.bf16.gmra.mrb[112].mxu0 %vm1123_vm2, %v4314_v21 }
 0xe28   :  { %v5103_v17 = vpop.f32.mrb[116].mxu1 }
 0xe29   :  { %v4287_v33 = vadd.f32 %v5103_v17, %v4574_v20  ;;  %v4278_v19 = vpop.f32.mrb[117].mxu1 }
 0xe2a   :  { %v4279_v52 = vadd.f32 %v4574_v20, %v4278_v19  ;;  %v5104_v36 = vpop.f32.mrb[118].mxu1 }
 0xe2b   :  { %v4290_v6 = vadd.f32 %v5104_v36, %v4574_v20  ;;  %v4281_v37 = vpop.f32.mrb[119].mxu1  ;;  %v4307_v57 = vmax.f32 %v4287_v33, 0.0 }
 0xe2c   :  { %v4282_v25 = vadd.f32 %v4574_v20, %v4281_v37  ;;  %v4305_v15 = vmax.f32 %v4279_v52, 0.0 }
 0xe2d   :  { %v4308_v45 = vmax.f32 %v4290_v6, 0.0 }
 0xe2e   :  { %v4306_v28 = vmax.f32 %v4282_v25, 0.0 }
 0xe2f   :  { %v4316_v24 = vpack.c.bf16 %v4308_v45, %v4307_v57 }
 0xe30   :  { %v4315_v44 = vpack.c.bf16 %v4306_v28, %v4305_v15 }
 0xe32   :  { %5119 = vmatprep.mubr.msk.bf16.mxu0 %vm1123_vm2, %v4315_v44 }
 0xe33   :  { %5120 = vmatmul.mubr.msk.bf16.gmra.mrb[116].mxu0 %vm1123_vm2, %v4316_v24 }
 0xed6   :  { %v5109_v1 = vpop.f32.mrb[104].mxu0 }
 0xed7   :  { %v4397_v7 = vadd.f32 %v5109_v1, %v4583_v5  ;;  %v4388_v14 = vpop.f32.mrb[105].mxu0 }
 0xed8   :  { %v4389_v62 = vadd.f32 %v4583_v5, %v4388_v14  ;;  %v5110_v12 = vpop.f32.mrb[106].mxu0 }
 0xed9   :  { %4454 = vst.msk [vmem:[%s8089_s20 + $0x10] sm:$0xff] %vm4451_vm0, %v4397_v7  ;;  %v4400_v56 = vadd.f32 %v5110_v12, %v4583_v5  ;;  %v4391_v20 = vpop.f32.mrb[107].mxu0 }
 0xeda   :  { %4452 = vst.msk [vmem:[%s8089_s20] sm:$0xff] %vm4451_vm0, %v4389_v62  ;;  %v4392_v29 = vadd.f32 %v4583_v5, %v4391_v20 }
 0xedb   :  { %4455 = vst.msk [vmem:[%s8089_s20 + $0x18] sm:$0xff] %vm4451_vm0, %v4400_v56 }
 0xedc   :  { %4453 = vst.msk [vmem:[%s8089_s20 + $0x8] sm:$0xff] %vm4451_vm0, %v4392_v29 }
 0xee3   :  { %v5113_v53 = vpop.f32.mrb[108].mxu0 }
 0xee4   :  { %v4413_v18 = vadd.f32 %v5113_v53, %v4583_v5  ;;  %v4404_v23 = vpop.f32.mrb[109].mxu0 }
 0xee5   :  { %v4405_v35 = vadd.f32 %v4583_v5, %v4404_v23  ;;  %v5114_v42 = vpop.f32.mrb[110].mxu0 }
 0xee6   :  { %4458 = vst.msk [vmem:[%s8089_s20 + $0x30] sm:$0xff] %vm4451_vm0, %v4413_v18  ;;  %v4416_v34 = vadd.f32 %v5114_v42, %v4583_v5  ;;  %v4407_v9 = vpop.f32.mrb[111].mxu0 }
 0xee7   :  { %4456 = vst.msk [vmem:[%s8089_s20 + $0x20] sm:$0xff] %vm4451_vm0, %v4405_v35  ;;  %v4408_v61 = vadd.f32 %v4583_v5, %v4407_v9 }
 0xee8   :  { %4459 = vst.msk [vmem:[%s8089_s20 + $0x38] sm:$0xff] %vm4451_vm0, %v4416_v34 }
 0xee9   :  { %4457 = vst.msk [vmem:[%s8089_s20 + $0x28] sm:$0xff] %vm4451_vm0, %v4408_v61 }
 0xef7   :  { %v5117_v31 = vpop.f32.mrb[112].mxu0 }
 0xef8   :  { %v4429_v0 = vadd.f32 %v5117_v31, %v4583_v5  ;;  %v4420_v60 = vpop.f32.mrb[113].mxu0 }
 0xef9   :  { %v4421_v22 = vadd.f32 %v4583_v5, %v4420_v60  ;;  %v5118_v8 = vpop.f32.mrb[114].mxu0 }
 0xefa   :  { %4462 = vst.msk [vmem:[%s8089_s20 + $0x50] sm:$0xff] %vm4451_vm0, %v4429_v0  ;;  %v4432_v40 = vadd.f32 %v5118_v8, %v4583_v5  ;;  %v4423_v3 = vpop.f32.mrb[115].mxu0 }
 0xefb   :  { %4460 = vst.msk [vmem:[%s8089_s20 + $0x40] sm:$0xff] %vm4451_vm0, %v4421_v22  ;;  %v4424_v11 = vadd.f32 %v4583_v5, %v4423_v3 }
 0xefc   :  { %4463 = vst.msk [vmem:[%s8089_s20 + $0x58] sm:$0xff] %vm4451_vm0, %v4432_v40 }
 0xefd   :  { %4461 = vst.msk [vmem:[%s8089_s20 + $0x48] sm:$0xff] %vm4451_vm0, %v4424_v11 }
 0xf06   :  { %v5121_v2 = vpop.f32.mrb[116].mxu0 }
 0xf07   :  { %v4445_v49 = vadd.f32 %v5121_v2, %v4583_v5  ;;  %v4436_v38 = vpop.f32.mrb[117].mxu0 }
 0xf08   :  { %v4437_v59 = vadd.f32 %v4583_v5, %v4436_v38  ;;  %v5122_v13 = vpop.f32.mrb[118].mxu0 }
 0xf09   :  { %4466 = vst.msk [vmem:[%s8089_s20 + $0x70] sm:$0xff] %vm4451_vm0, %v4445_v49  ;;  %v4448_v30 = vadd.f32 %v5122_v13, %v4583_v5  ;;  %v4439_v43 = vpop.f32.mrb[119].mxu0 }
 0xf0a   :  { %4464 = vst.msk [vmem:[%s8089_s20 + $0x60] sm:$0xff] %vm4451_vm0, %v4437_v59  ;;  %v4440_v48 = vadd.f32 %v4583_v5, %v4439_v43 }
 0xf0b   :  { %4467 = vst.msk [vmem:[%s8089_s20 + $0x78] sm:$0xff] %vm4451_vm0, %v4448_v30 }
 0xf0c   :  { %4465 = vst.msk [vmem:[%s8089_s20 + $0x68] sm:$0xff] %vm4451_vm0, %v4440_v48 }

</bundles_post_ra>
